<compile_context>
chip_gen: v6e
topology: v6e:2x2x1
jax: 0.10.0
libtpu: 0.0.40
codegen_flags: <defaults>
</compile_context>

<pallas_src>
import functools

import jax
import jax.numpy as jnp
from jax.experimental import pallas as pl
from jax.experimental.pallas import tpu as pltpu


# ---------------------------------------------------------------------------
# Pallas kernel: PPOValue forward for a block of BB batch elements.
# ---------------------------------------------------------------------------
def _ppo_value_kernel(
    x_ref,        # (BB*S, Din)  bf16  pre-flattened block of batch elements
    w_in_ref,     # (Din, H)     bf16  input Linear weight (pre-transposed)
    b_in_ref,     # (1, H)       f32
    wqkv_ref,     # (NB, H, 3H)  bf16  per-block in_proj weight (Q-scaled)
    bqkv_ref,     # (NB, 1, 3H)  f32   per-block in_proj bias   (Q-scaled)
    wo_ref,       # (NB, H, H)   bf16  per-block out_proj weight
    bo_ref,       # (NB, 1, H)   f32
    wconv_ref,    # (1, S, H)    f32   Conv1d(seq_len,1,1) weight, pre-broadcast over H
    wout_ref,     # (H, 1)       f32   output Linear weight
    bout_ref,     # (1, 1)       f32   output bias with conv bias folded in
    out_ref,      # (1, 1, BB)   f32   lane-dense per-step output row
    *,
    num_blocks: int,
    num_heads: int,
):
    rows, _ = x_ref.shape
    H = w_in_ref.shape[1]
    S = wconv_ref.shape[1]
    BB = rows // S
    hd = H // num_heads

    # input_layer + ReLU on the flattened (BB*S, Din) rows -> one big MXU job.
    h = jnp.dot(x_ref[...], w_in_ref[...],
                preferred_element_type=jnp.float32) + b_in_ref[...]
    h = jnp.maximum(h, 0.0)                                   # (rows, H) f32

    # SelfAttentionBlock x num_blocks (multi-head self attention, batch_first).
    for blk in range(num_blocks):
        # One fused QKV matmul over all rows; 1/sqrt(hd) folded into Q columns.
        qkv = jnp.dot(h.astype(jnp.bfloat16), wqkv_ref[blk],
                      preferred_element_type=jnp.float32) + bqkv_ref[blk]
        qkv3 = qkv.reshape(BB, S, 3 * H)                      # (BB, S, 3H) f32

        ctx_heads = []
        for head in range(num_heads):
            lo = head * hd
            qh = qkv3[:, :, lo:lo + hd].astype(jnp.bfloat16)            # (BB,S,hd)
            kh = qkv3[:, :, H + lo:H + lo + hd].astype(jnp.bfloat16)
            vh = qkv3[:, :, 2 * H + lo:2 * H + lo + hd].astype(jnp.bfloat16)
            s = jnp.einsum("bqd,bkd->bqk", qh, kh,
                           preferred_element_type=jnp.float32)          # (BB,S,S) f32
            s = s - jnp.max(s, axis=-1, keepdims=True)
            p = jnp.exp(s)
            # approx reciprocal -> EUP slot, co-issues with VPU work.
            p = p * pl.reciprocal(jnp.sum(p, axis=-1, keepdims=True), approx=True)
            ctx_heads.append(
                jnp.einsum("bqk,bkd->bqd", p.astype(jnp.bfloat16), vh,
                           preferred_element_type=jnp.float32))         # (BB,S,hd)

        # Single out_proj matmul for all heads.
        ctx = jnp.concatenate(ctx_heads, axis=-1).reshape(rows, H)
        h = jnp.dot(ctx.astype(jnp.bfloat16), wo_ref[blk],
                    preferred_element_type=jnp.float32) + bo_ref[blk]   # (rows, H) f32

    # Conv1d(seq_len, 1, 1): weighted sum over the seq (sublane) axis; weight
    # pre-broadcast to (1, S, H) -> aligned VPU multiply, then sublane reduce.
    h3 = h.reshape(BB, S, H)
    c = jnp.sum(h3 * wconv_ref[...], axis=1)                  # (BB, H) f32

    # output_layer: Linear(H, 1); conv bias folded into bout.
    y = jnp.dot(c, wout_ref[...], preferred_element_type=jnp.float32) + bout_ref[0, 0]
    # Lane-dense store: (BB, 1) column -> (1, BB) row (single small 2-D transpose).
    out_ref[...] = jnp.transpose(y).reshape(1, 1, BB)


# ---------------------------------------------------------------------------
# Batch-block planning: balanced blocks + >=2 steps for v7x megacore.
# ---------------------------------------------------------------------------
def _plan_batch_blocks(B: int, S: int, target_rows: int = 1024):
    """Return (n_steps, BB) with n_steps * BB >= B and BB a multiple of 8.

    target_rows ~ fused rows (BB*S) per grid step; 1024 amortizes the ~0.35us
    per-step overhead. Sweep to 2048-4096 on v6e if desired (set vmem_limit_bytes
    on v5e's 16 MiB scoped default before going big).
    """
    bb_target = max(8, ((-(-target_rows // S)) + 7) // 8 * 8)
    n_steps = max(1, -(-B // bb_target))
    if B >= 16:
        n_steps = max(n_steps, 2)   # v7x: 2 TensorCores, keep both busy.
    BB = (-(-B // n_steps) + 7) // 8 * 8
    return n_steps, BB


# ---------------------------------------------------------------------------
# Wrapper
# ---------------------------------------------------------------------------
def ppo_value_forward(x, params, *, num_blocks: int, num_heads: int):
    """x: (B, S, in_dim) float32 -> (B,) float32 (squeezed like PyTorch)."""
    B, S, Din = x.shape
    H = params["w_in"].shape[1]
    NB = num_blocks
    hd = H // num_heads
    scale = 1.0 / float(hd) ** 0.5

    # --- One-time, mathematically exact parameter transforms (outside kernel) ---
    # Fold 1/sqrt(hd) into the Q columns of the in_proj weight AND bias.
    qscale = jnp.concatenate(
        [jnp.full((H,), scale, jnp.float32), jnp.ones((2 * H,), jnp.float32)]
    )
    w_in = params["w_in"].astype(jnp.bfloat16)
    b_in = params["b_in"]
    wqkv = (params["wqkv"] * qscale).astype(jnp.bfloat16)
    bqkv = params["bqkv"] * qscale
    wo = params["wo"].astype(jnp.bfloat16)
    bo = params["bo"]
    # Conv weight pre-broadcast to (1, S, H): aligned VPU multiply in the kernel.
    wconv_b = jnp.broadcast_to(
        params["wconv"].T.reshape(1, S, 1), (1, S, H)
    ).astype(jnp.float32)
    # Fold the conv bias into the output bias: (c + bc) @ Wout + bo
    #   = c @ Wout + bc * sum(Wout) + bo.
    wout = params["wout"]
    bout_eff = params["bout"] + params["bconv"][0, 0] * jnp.sum(params["wout"])

    # --- Batch blocking (balanced, >=2 steps when B >= 16) ---
    n_steps, BB = _plan_batch_blocks(B, S)
    B_pad = n_steps * BB
    if B_pad != B:
        x = jnp.pad(x, ((0, B_pad - B), (0, 0), (0, 0)))
    # Pre-flattened, bf16 input stream (the only B-scaling HBM traffic).
    x_flat = x.reshape(B_pad * S, Din).astype(jnp.bfloat16)

    kernel = functools.partial(
        _ppo_value_kernel, num_blocks=num_blocks, num_heads=num_heads
    )

    zero2 = lambda b: (0, 0)
    zero3 = lambda b: (0, 0, 0)

    out = pl.pallas_call(
        kernel,
        out_shape=jax.ShapeDtypeStruct((n_steps, 1, BB), jnp.float32),
        grid_spec=pltpu.PrefetchScalarGridSpec(
            num_scalar_prefetch=0,
            grid=(n_steps,),
            in_specs=[
                pl.BlockSpec((BB * S, Din), lambda b: (b, 0)),
                pl.BlockSpec((Din, H), zero2),
                pl.BlockSpec((1, H), zero2),
                pl.BlockSpec((NB, H, 3 * H), zero3),
                pl.BlockSpec((NB, 1, 3 * H), zero3),
                pl.BlockSpec((NB, H, H), zero3),
                pl.BlockSpec((NB, 1, H), zero3),
                pl.BlockSpec((1, S, H), zero3),
                pl.BlockSpec((H, 1), zero2),
                pl.BlockSpec((1, 1), zero2),
            ],
            # Per-step lane-dense output block (no shared resident buffer), so the
            # batch axis is legally "parallel" (megacore sharding on v7x).
            out_specs=pl.BlockSpec((1, 1, BB), lambda b: (b, 0, 0)),
        ),
        compiler_params=pltpu.CompilerParams(dimension_semantics=("parallel",)),
    )(
        x_flat,
        w_in, b_in,
        wqkv, bqkv,
        wo, bo,
        wconv_b, wout, bout_eff,
    )
    vals = out.reshape(B_pad)[:B]
    return jnp.squeeze(vals)   # matches PyTorch output.squeeze()


# ---------------------------------------------------------------------------
# Pure-JAX reference (original un-folded f32 parameters; validates the folds)
# ---------------------------------------------------------------------------
def ppo_value_reference(x, params, *, num_blocks, num_heads):
    H = params["w_in"].shape[1]
    hd = H // num_heads
    scale = 1.0 / float(hd) ** 0.5

    h = jnp.maximum(jnp.einsum("bsd,dh->bsh", x, params["w_in"]) + params["b_in"], 0.0)
    for blk in range(num_blocks):
        qkv = jnp.einsum("bsh,hk->bsk", h, params["wqkv"][blk]) + params["bqkv"][blk]
        q, k, v = qkv[..., :H], qkv[..., H:2 * H], qkv[..., 2 * H:]
        acc = jnp.zeros_like(h)
        for head in range(num_heads):
            lo, hi = head * hd, (head + 1) * hd
            s = jnp.einsum("bqd,bkd->bqk", q[..., lo:hi], k[..., lo:hi]) * scale
            p = jax.nn.softmax(s, axis=-1)
            oh = jnp.einsum("bqk,bkd->bqd", p, v[..., lo:hi])
            acc = acc + jnp.einsum("bqd,dh->bqh", oh, params["wo"][blk][lo:hi, :])
        h = acc + params["bo"][blk]
    c = jnp.einsum("os,bsh->boh", params["wconv"], h) + params["bconv"][0, 0]
    y = jnp.einsum("boh,hk->bok", c, params["wout"]) + params["bout"][0, 0]
    return jnp.squeeze(y)


# ---------------------------------------------------------------------------
# Deterministic parameter construction (synthetic init, no checkpoint)
# ---------------------------------------------------------------------------
def make_params(key, *, in_dim, hidden_dim, seq_len, num_blocks):
    ks = jax.random.split(key, 11)
    H = hidden_dim
    scale = 0.2
    return {
        "w_in":  scale * jax.random.normal(ks[0], (in_dim, H), jnp.float32),
        "b_in":  scale * jax.random.normal(ks[1], (1, H), jnp.float32),
        "wqkv":  scale * jax.random.normal(ks[2], (num_blocks, H, 3 * H), jnp.float32),
        "bqkv":  scale * jax.random.normal(ks[3], (num_blocks, 1, 3 * H), jnp.float32),
        "wo":    scale * jax.random.normal(ks[4], (num_blocks, H, H), jnp.float32),
        "bo":    scale * jax.random.normal(ks[5], (num_blocks, 1, H), jnp.float32),
        "wconv": scale * jax.random.normal(ks[6], (1, seq_len), jnp.float32),
        "bconv": scale * jax.random.normal(ks[7], (1, 1), jnp.float32),
        "wout":  scale * jax.random.normal(ks[8], (H, 1), jnp.float32),
        "bout":  scale * jax.random.normal(ks[9], (1, 1), jnp.float32),
    }


if __name__ == "__main__":
    # Small, module-consistent shapes.
    B, S, IN_DIM, HIDDEN, NUM_BLOCKS, NUM_HEADS = 2, 8, 16, 32, 2, 4

    key = jax.random.PRNGKey(0)
    k_x, k_p = jax.random.split(key)
    x = jax.random.normal(k_x, (B, S, IN_DIM), jnp.float32)
    params = make_params(
        k_p, in_dim=IN_DIM, hidden_dim=HIDDEN, seq_len=S, num_blocks=NUM_BLOCKS
    )

    out = ppo_value_forward(x, params, num_blocks=NUM_BLOCKS, num_heads=NUM_HEADS)
    out = jax.block_until_ready(out)

    ref = ppo_value_reference(x, params, num_blocks=NUM_BLOCKS, num_heads=NUM_HEADS)
    assert out.shape == ref.shape == (B,), (out.shape, ref.shape)
    # Tolerance covers bf16 MXU operands + pl.reciprocal(approx=True) in the softmax;
    # accumulation and softmax statistics remain f32.
    assert jnp.allclose(out, ref, rtol=5e-2, atol=5e-2), (out, ref)

    print("KERNEL_OK")
</pallas_src>

<mosaic_0001>
module attributes {stable_mosaic.version = 11 : i64} {
  func.func @_ppo_value_kernel(%arg0: i32, %arg1: memref<64x16xbf16, #tpu.memory_space<vmem>>, %arg2: memref<16x32xbf16, #tpu.memory_space<vmem>>, %arg3: memref<1x32xf32, #tpu.memory_space<vmem>>, %arg4: memref<2x32x96xbf16, #tpu.memory_space<vmem>>, %arg5: memref<2x1x96xf32, #tpu.memory_space<vmem>>, %arg6: memref<2x32x32xbf16, #tpu.memory_space<vmem>>, %arg7: memref<2x1x32xf32, #tpu.memory_space<vmem>>, %arg8: memref<1x8x32xf32, #tpu.memory_space<vmem>>, %arg9: memref<32x1xf32, #tpu.memory_space<vmem>>, %arg10: memref<1x1xf32, #tpu.memory_space<vmem>>, %arg11: memref<1x1x8xf32, #tpu.memory_space<vmem>>) attributes {dimension_semantics = [#tpu.dimension_semantics<parallel>], iteration_bounds = array<i64: 1>, scalar_prefetch = 0 : i64, scratch_operands = 0 : i64, tpu.core_type = #tpu.core_type<tc>, window_params = [{transform_indices = @transform_0, window_bounds = array<i64: 64, 16>}, {pipeline_mode = #tpu.pipeline_mode<synchronous>, transform_indices = @transform_1, window_bounds = array<i64: 16, 32>}, {pipeline_mode = #tpu.pipeline_mode<synchronous>, transform_indices = @transform_2, window_bounds = array<i64: 1, 32>}, {pipeline_mode = #tpu.pipeline_mode<synchronous>, transform_indices = @transform_3, window_bounds = array<i64: 2, 32, 96>}, {pipeline_mode = #tpu.pipeline_mode<synchronous>, transform_indices = @transform_4, window_bounds = array<i64: 2, 1, 96>}, {pipeline_mode = #tpu.pipeline_mode<synchronous>, transform_indices = @transform_5, window_bounds = array<i64: 2, 32, 32>}, {pipeline_mode = #tpu.pipeline_mode<synchronous>, transform_indices = @transform_6, window_bounds = array<i64: 2, 1, 32>}, {pipeline_mode = #tpu.pipeline_mode<synchronous>, transform_indices = @transform_7, window_bounds = array<i64: 1, 8, 32>}, {pipeline_mode = #tpu.pipeline_mode<synchronous>, transform_indices = @transform_8, window_bounds = array<i64: 32, 1>}, {pipeline_mode = #tpu.pipeline_mode<synchronous>, transform_indices = @transform_9, window_bounds = array<i64: 1, 1>}, {transform_indices = @transform_10, window_bounds = array<i64: 1, 1, 8>}]} {
    %c0 = arith.constant 0 : index
    %c0_0 = arith.constant 0 : index
    %0 = vector.load %arg1[%c0, %c0_0] : memref<64x16xbf16, #tpu.memory_space<vmem>>, vector<64x16xbf16>
    %c0_1 = arith.constant 0 : index
    %c0_2 = arith.constant 0 : index
    %1 = vector.load %arg2[%c0_1, %c0_2] : memref<16x32xbf16, #tpu.memory_space<vmem>>, vector<16x32xbf16>
    %cst = arith.constant dense<0.000000e+00> : vector<64x32xf32>
    %2 = tpu.matmul %0, %1, %cst {dimension_numbers = #tpu.dot_dimension_numbers<[1], [0], [0], [1], [0, 0, 1, 1], [], []>} : vector<64x16xbf16>, vector<16x32xbf16>, vector<64x32xf32> -> vector<64x32xf32>
    %c0_3 = arith.constant 0 : index
    %c0_4 = arith.constant 0 : index
    %3 = vector.load %arg3[%c0_3, %c0_4] : memref<1x32xf32, #tpu.memory_space<vmem>>, vector<1x32xf32>
    %4 = vector.broadcast %3 : vector<1x32xf32> to vector<64x32xf32>
    %5 = arith.addf %2, %4 : vector<64x32xf32>
    %cst_5 = arith.constant 0.000000e+00 : f32
    %6 = vector.broadcast %cst_5 : f32 to vector<64x32xf32>
    %7 = arith.maximumf %5, %6 : vector<64x32xf32>
    %8 = arith.truncf %7 : vector<64x32xf32> to vector<64x32xbf16>
    %c0_6 = arith.constant 0 : index
    %c0_7 = arith.constant 0 : index
    %c0_8 = arith.constant 0 : index
    %9 = vector.load %arg4[%c0_6, %c0_7, %c0_8] : memref<2x32x96xbf16, #tpu.memory_space<vmem>>, vector<1x32x96xbf16>
    %10 = vector.shape_cast %9 : vector<1x32x96xbf16> to vector<32x96xbf16>
    %cst_9 = arith.constant dense<0.000000e+00> : vector<64x96xf32>
    %11 = tpu.matmul %8, %10, %cst_9 {dimension_numbers = #tpu.dot_dimension_numbers<[1], [0], [0], [1], [0, 0, 1, 1], [], []>} : vector<64x32xbf16>, vector<32x96xbf16>, vector<64x96xf32> -> vector<64x96xf32>
    %c0_10 = arith.constant 0 : index
    %c0_11 = arith.constant 0 : index
    %c0_12 = arith.constant 0 : index
    %12 = vector.load %arg5[%c0_10, %c0_11, %c0_12] : memref<2x1x96xf32, #tpu.memory_space<vmem>>, vector<1x1x96xf32>
    %13 = vector.shape_cast %12 : vector<1x1x96xf32> to vector<1x96xf32>
    %14 = vector.broadcast %13 : vector<1x96xf32> to vector<64x96xf32>
    %15 = arith.addf %11, %14 : vector<64x96xf32>
    %16 = vector.shape_cast %15 : vector<64x96xf32> to vector<8x8x96xf32>
    %17 = vector.extract_strided_slice %16 {offsets = [0, 0, 0], sizes = [8, 8, 8], strides = [1, 1, 1]} : vector<8x8x96xf32> to vector<8x8x8xf32>
    %18 = arith.truncf %17 : vector<8x8x8xf32> to vector<8x8x8xbf16>
    %19 = vector.extract_strided_slice %16 {offsets = [0, 0, 32], sizes = [8, 8, 8], strides = [1, 1, 1]} : vector<8x8x96xf32> to vector<8x8x8xf32>
    %20 = arith.truncf %19 : vector<8x8x8xf32> to vector<8x8x8xbf16>
    %21 = vector.extract_strided_slice %16 {offsets = [0, 0, 64], sizes = [8, 8, 8], strides = [1, 1, 1]} : vector<8x8x96xf32> to vector<8x8x8xf32>
    %22 = arith.truncf %21 : vector<8x8x8xf32> to vector<8x8x8xbf16>
    "tpu.trace_start"() <{level = 10 : i32, message = "bqd,bkd->bqk"}> : () -> ()
    %cst_13 = arith.constant dense<0.000000e+00> : vector<8x8x8xf32>
    %23 = tpu.matmul %18, %20, %cst_13 {dimension_numbers = #tpu.dot_dimension_numbers<[2], [2], [1], [1], [0, 0, 0, 1, 1, 1], [0], [0]>} : vector<8x8x8xbf16>, vector<8x8x8xbf16>, vector<8x8x8xf32> -> vector<8x8x8xf32>
    "tpu.trace_stop"() : () -> ()
    %cst_14 = arith.constant dense<0xFF800000> : vector<8x8xf32>
    %24 = vector.multi_reduction <maximumf>, %23, %cst_14 [2] : vector<8x8x8xf32> to vector<8x8xf32>
    %25 = vector.shape_cast %24 : vector<8x8xf32> to vector<8x8x1xf32>
    %26 = vector.broadcast %25 : vector<8x8x1xf32> to vector<8x8x8xf32>
    %27 = arith.subf %23, %26 : vector<8x8x8xf32>
    %28 = math.exp %27 : vector<8x8x8xf32>
    %cst_15 = arith.constant dense<0.000000e+00> : vector<8x8xf32>
    %29 = vector.multi_reduction <add>, %28, %cst_15 [2] : vector<8x8x8xf32> to vector<8x8xf32>
    %30 = vector.shape_cast %29 : vector<8x8xf32> to vector<8x8x1xf32>
    %31 = tpu.reciprocal %30 {approx = true} : vector<8x8x1xf32> -> vector<8x8x1xf32>
    %32 = vector.broadcast %31 : vector<8x8x1xf32> to vector<8x8x8xf32>
    %33 = arith.mulf %28, %32 : vector<8x8x8xf32>
    %34 = arith.truncf %33 : vector<8x8x8xf32> to vector<8x8x8xbf16>
    "tpu.trace_start"() <{level = 10 : i32, message = "bqk,bkd->bqd"}> : () -> ()
    %cst_16 = arith.constant dense<0.000000e+00> : vector<8x8x8xf32>
    %35 = tpu.matmul %34, %22, %cst_16 {dimension_numbers = #tpu.dot_dimension_numbers<[2], [1], [1], [2], [0, 0, 0, 1, 1, 2], [0], [0]>} : vector<8x8x8xbf16>, vector<8x8x8xbf16>, vector<8x8x8xf32> -> vector<8x8x8xf32>
    "tpu.trace_stop"() : () -> ()
    %36 = vector.extract_strided_slice %16 {offsets = [0, 0, 8], sizes = [8, 8, 8], strides = [1, 1, 1]} : vector<8x8x96xf32> to vector<8x8x8xf32>
    %37 = arith.truncf %36 : vector<8x8x8xf32> to vector<8x8x8xbf16>
    %38 = vector.extract_strided_slice %16 {offsets = [0, 0, 40], sizes = [8, 8, 8], strides = [1, 1, 1]} : vector<8x8x96xf32> to vector<8x8x8xf32>
    %39 = arith.truncf %38 : vector<8x8x8xf32> to vector<8x8x8xbf16>
    %40 = vector.extract_strided_slice %16 {offsets = [0, 0, 72], sizes = [8, 8, 8], strides = [1, 1, 1]} : vector<8x8x96xf32> to vector<8x8x8xf32>
    %41 = arith.truncf %40 : vector<8x8x8xf32> to vector<8x8x8xbf16>
    "tpu.trace_start"() <{level = 10 : i32, message = "bqd,bkd->bqk"}> : () -> ()
    %cst_17 = arith.constant dense<0.000000e+00> : vector<8x8x8xf32>
    %42 = tpu.matmul %37, %39, %cst_17 {dimension_numbers = #tpu.dot_dimension_numbers<[2], [2], [1], [1], [0, 0, 0, 1, 1, 1], [0], [0]>} : vector<8x8x8xbf16>, vector<8x8x8xbf16>, vector<8x8x8xf32> -> vector<8x8x8xf32>
    "tpu.trace_stop"() : () -> ()
    %cst_18 = arith.constant dense<0xFF800000> : vector<8x8xf32>
    %43 = vector.multi_reduction <maximumf>, %42, %cst_18 [2] : vector<8x8x8xf32> to vector<8x8xf32>
    %44 = vector.shape_cast %43 : vector<8x8xf32> to vector<8x8x1xf32>
    %45 = vector.broadcast %44 : vector<8x8x1xf32> to vector<8x8x8xf32>
    %46 = arith.subf %42, %45 : vector<8x8x8xf32>
    %47 = math.exp %46 : vector<8x8x8xf32>
    %cst_19 = arith.constant dense<0.000000e+00> : vector<8x8xf32>
    %48 = vector.multi_reduction <add>, %47, %cst_19 [2] : vector<8x8x8xf32> to vector<8x8xf32>
    %49 = vector.shape_cast %48 : vector<8x8xf32> to vector<8x8x1xf32>
    %50 = tpu.reciprocal %49 {approx = true} : vector<8x8x1xf32> -> vector<8x8x1xf32>
    %51 = vector.broadcast %50 : vector<8x8x1xf32> to vector<8x8x8xf32>
    %52 = arith.mulf %47, %51 : vector<8x8x8xf32>
    %53 = arith.truncf %52 : vector<8x8x8xf32> to vector<8x8x8xbf16>
    "tpu.trace_start"() <{level = 10 : i32, message = "bqk,bkd->bqd"}> : () -> ()
    %cst_20 = arith.constant dense<0.000000e+00> : vector<8x8x8xf32>
    %54 = tpu.matmul %53, %41, %cst_20 {dimension_numbers = #tpu.dot_dimension_numbers<[2], [1], [1], [2], [0, 0, 0, 1, 1, 2], [0], [0]>} : vector<8x8x8xbf16>, vector<8x8x8xbf16>, vector<8x8x8xf32> -> vector<8x8x8xf32>
    "tpu.trace_stop"() : () -> ()
    %55 = vector.extract_strided_slice %16 {offsets = [0, 0, 16], sizes = [8, 8, 8], strides = [1, 1, 1]} : vector<8x8x96xf32> to vector<8x8x8xf32>
    %56 = arith.truncf %55 : vector<8x8x8xf32> to vector<8x8x8xbf16>
    %57 = vector.extract_strided_slice %16 {offsets = [0, 0, 48], sizes = [8, 8, 8], strides = [1, 1, 1]} : vector<8x8x96xf32> to vector<8x8x8xf32>
    %58 = arith.truncf %57 : vector<8x8x8xf32> to vector<8x8x8xbf16>
    %59 = vector.extract_strided_slice %16 {offsets = [0, 0, 80], sizes = [8, 8, 8], strides = [1, 1, 1]} : vector<8x8x96xf32> to vector<8x8x8xf32>
    %60 = arith.truncf %59 : vector<8x8x8xf32> to vector<8x8x8xbf16>
    "tpu.trace_start"() <{level = 10 : i32, message = "bqd,bkd->bqk"}> : () -> ()
    %cst_21 = arith.constant dense<0.000000e+00> : vector<8x8x8xf32>
    %61 = tpu.matmul %56, %58, %cst_21 {dimension_numbers = #tpu.dot_dimension_numbers<[2], [2], [1], [1], [0, 0, 0, 1, 1, 1], [0], [0]>} : vector<8x8x8xbf16>, vector<8x8x8xbf16>, vector<8x8x8xf32> -> vector<8x8x8xf32>
    "tpu.trace_stop"() : () -> ()
    %cst_22 = arith.constant dense<0xFF800000> : vector<8x8xf32>
    %62 = vector.multi_reduction <maximumf>, %61, %cst_22 [2] : vector<8x8x8xf32> to vector<8x8xf32>
    %63 = vector.shape_cast %62 : vector<8x8xf32> to vector<8x8x1xf32>
    %64 = vector.broadcast %63 : vector<8x8x1xf32> to vector<8x8x8xf32>
    %65 = arith.subf %61, %64 : vector<8x8x8xf32>
    %66 = math.exp %65 : vector<8x8x8xf32>
    %cst_23 = arith.constant dense<0.000000e+00> : vector<8x8xf32>
    %67 = vector.multi_reduction <add>, %66, %cst_23 [2] : vector<8x8x8xf32> to vector<8x8xf32>
    %68 = vector.shape_cast %67 : vector<8x8xf32> to vector<8x8x1xf32>
    %69 = tpu.reciprocal %68 {approx = true} : vector<8x8x1xf32> -> vector<8x8x1xf32>
    %70 = vector.broadcast %69 : vector<8x8x1xf32> to vector<8x8x8xf32>
    %71 = arith.mulf %66, %70 : vector<8x8x8xf32>
    %72 = arith.truncf %71 : vector<8x8x8xf32> to vector<8x8x8xbf16>
    "tpu.trace_start"() <{level = 10 : i32, message = "bqk,bkd->bqd"}> : () -> ()
    %cst_24 = arith.constant dense<0.000000e+00> : vector<8x8x8xf32>
    %73 = tpu.matmul %72, %60, %cst_24 {dimension_numbers = #tpu.dot_dimension_numbers<[2], [1], [1], [2], [0, 0, 0, 1, 1, 2], [0], [0]>} : vector<8x8x8xbf16>, vector<8x8x8xbf16>, vector<8x8x8xf32> -> vector<8x8x8xf32>
    "tpu.trace_stop"() : () -> ()
    %74 = vector.extract_strided_slice %16 {offsets = [0, 0, 24], sizes = [8, 8, 8], strides = [1, 1, 1]} : vector<8x8x96xf32> to vector<8x8x8xf32>
    %75 = arith.truncf %74 : vector<8x8x8xf32> to vector<8x8x8xbf16>
    %76 = vector.extract_strided_slice %16 {offsets = [0, 0, 56], sizes = [8, 8, 8], strides = [1, 1, 1]} : vector<8x8x96xf32> to vector<8x8x8xf32>
    %77 = arith.truncf %76 : vector<8x8x8xf32> to vector<8x8x8xbf16>
    %78 = vector.extract_strided_slice %16 {offsets = [0, 0, 88], sizes = [8, 8, 8], strides = [1, 1, 1]} : vector<8x8x96xf32> to vector<8x8x8xf32>
    %79 = arith.truncf %78 : vector<8x8x8xf32> to vector<8x8x8xbf16>
    "tpu.trace_start"() <{level = 10 : i32, message = "bqd,bkd->bqk"}> : () -> ()
    %cst_25 = arith.constant dense<0.000000e+00> : vector<8x8x8xf32>
    %80 = tpu.matmul %75, %77, %cst_25 {dimension_numbers = #tpu.dot_dimension_numbers<[2], [2], [1], [1], [0, 0, 0, 1, 1, 1], [0], [0]>} : vector<8x8x8xbf16>, vector<8x8x8xbf16>, vector<8x8x8xf32> -> vector<8x8x8xf32>
    "tpu.trace_stop"() : () -> ()
    %cst_26 = arith.constant dense<0xFF800000> : vector<8x8xf32>
    %81 = vector.multi_reduction <maximumf>, %80, %cst_26 [2] : vector<8x8x8xf32> to vector<8x8xf32>
    %82 = vector.shape_cast %81 : vector<8x8xf32> to vector<8x8x1xf32>
    %83 = vector.broadcast %82 : vector<8x8x1xf32> to vector<8x8x8xf32>
    %84 = arith.subf %80, %83 : vector<8x8x8xf32>
    %85 = math.exp %84 : vector<8x8x8xf32>
    %cst_27 = arith.constant dense<0.000000e+00> : vector<8x8xf32>
    %86 = vector.multi_reduction <add>, %85, %cst_27 [2] : vector<8x8x8xf32> to vector<8x8xf32>
    %87 = vector.shape_cast %86 : vector<8x8xf32> to vector<8x8x1xf32>
    %88 = tpu.reciprocal %87 {approx = true} : vector<8x8x1xf32> -> vector<8x8x1xf32>
    %89 = vector.broadcast %88 : vector<8x8x1xf32> to vector<8x8x8xf32>
    %90 = arith.mulf %85, %89 : vector<8x8x8xf32>
    %91 = arith.truncf %90 : vector<8x8x8xf32> to vector<8x8x8xbf16>
    "tpu.trace_start"() <{level = 10 : i32, message = "bqk,bkd->bqd"}> : () -> ()
    %cst_28 = arith.constant dense<0.000000e+00> : vector<8x8x8xf32>
    %92 = tpu.matmul %91, %79, %cst_28 {dimension_numbers = #tpu.dot_dimension_numbers<[2], [1], [1], [2], [0, 0, 0, 1, 1, 2], [0], [0]>} : vector<8x8x8xbf16>, vector<8x8x8xbf16>, vector<8x8x8xf32> -> vector<8x8x8xf32>
    "tpu.trace_stop"() : () -> ()
    %93 = tpu.concatenate %35, %54, %73, %92 in 2 : vector<8x8x8xf32>, vector<8x8x8xf32>, vector<8x8x8xf32>, vector<8x8x8xf32> -> vector<8x8x32xf32>
    %94 = vector.shape_cast %93 : vector<8x8x32xf32> to vector<64x32xf32>
    %95 = arith.truncf %94 : vector<64x32xf32> to vector<64x32xbf16>
    %c0_29 = arith.constant 0 : index
    %c0_30 = arith.constant 0 : index
    %c0_31 = arith.constant 0 : index
    %96 = vector.load %arg6[%c0_29, %c0_30, %c0_31] : memref<2x32x32xbf16, #tpu.memory_space<vmem>>, vector<1x32x32xbf16>
    %97 = vector.shape_cast %96 : vector<1x32x32xbf16> to vector<32x32xbf16>
    %cst_32 = arith.constant dense<0.000000e+00> : vector<64x32xf32>
    %98 = tpu.matmul %95, %97, %cst_32 {dimension_numbers = #tpu.dot_dimension_numbers<[1], [0], [0], [1], [0, 0, 1, 1], [], []>} : vector<64x32xbf16>, vector<32x32xbf16>, vector<64x32xf32> -> vector<64x32xf32>
    %c0_33 = arith.constant 0 : index
    %c0_34 = arith.constant 0 : index
    %c0_35 = arith.constant 0 : index
    %99 = vector.load %arg7[%c0_33, %c0_34, %c0_35] : memref<2x1x32xf32, #tpu.memory_space<vmem>>, vector<1x1x32xf32>
    %100 = vector.shape_cast %99 : vector<1x1x32xf32> to vector<1x32xf32>
    %101 = vector.broadcast %100 : vector<1x32xf32> to vector<64x32xf32>
    %102 = arith.addf %98, %101 : vector<64x32xf32>
    %103 = arith.truncf %102 : vector<64x32xf32> to vector<64x32xbf16>
    %c1 = arith.constant 1 : index
    %c0_36 = arith.constant 0 : index
    %c0_37 = arith.constant 0 : index
    %104 = vector.load %arg4[%c1, %c0_36, %c0_37] : memref<2x32x96xbf16, #tpu.memory_space<vmem>>, vector<1x32x96xbf16>
    %105 = vector.shape_cast %104 : vector<1x32x96xbf16> to vector<32x96xbf16>
    %cst_38 = arith.constant dense<0.000000e+00> : vector<64x96xf32>
    %106 = tpu.matmul %103, %105, %cst_38 {dimension_numbers = #tpu.dot_dimension_numbers<[1], [0], [0], [1], [0, 0, 1, 1], [], []>} : vector<64x32xbf16>, vector<32x96xbf16>, vector<64x96xf32> -> vector<64x96xf32>
    %c1_39 = arith.constant 1 : index
    %c0_40 = arith.constant 0 : index
    %c0_41 = arith.constant 0 : index
    %107 = vector.load %arg5[%c1_39, %c0_40, %c0_41] : memref<2x1x96xf32, #tpu.memory_space<vmem>>, vector<1x1x96xf32>
    %108 = vector.shape_cast %107 : vector<1x1x96xf32> to vector<1x96xf32>
    %109 = vector.broadcast %108 : vector<1x96xf32> to vector<64x96xf32>
    %110 = arith.addf %106, %109 : vector<64x96xf32>
    %111 = vector.shape_cast %110 : vector<64x96xf32> to vector<8x8x96xf32>
    %112 = vector.extract_strided_slice %111 {offsets = [0, 0, 0], sizes = [8, 8, 8], strides = [1, 1, 1]} : vector<8x8x96xf32> to vector<8x8x8xf32>
    %113 = arith.truncf %112 : vector<8x8x8xf32> to vector<8x8x8xbf16>
    %114 = vector.extract_strided_slice %111 {offsets = [0, 0, 32], sizes = [8, 8, 8], strides = [1, 1, 1]} : vector<8x8x96xf32> to vector<8x8x8xf32>
    %115 = arith.truncf %114 : vector<8x8x8xf32> to vector<8x8x8xbf16>
    %116 = vector.extract_strided_slice %111 {offsets = [0, 0, 64], sizes = [8, 8, 8], strides = [1, 1, 1]} : vector<8x8x96xf32> to vector<8x8x8xf32>
    %117 = arith.truncf %116 : vector<8x8x8xf32> to vector<8x8x8xbf16>
    "tpu.trace_start"() <{level = 10 : i32, message = "bqd,bkd->bqk"}> : () -> ()
    %cst_42 = arith.constant dense<0.000000e+00> : vector<8x8x8xf32>
    %118 = tpu.matmul %113, %115, %cst_42 {dimension_numbers = #tpu.dot_dimension_numbers<[2], [2], [1], [1], [0, 0, 0, 1, 1, 1], [0], [0]>} : vector<8x8x8xbf16>, vector<8x8x8xbf16>, vector<8x8x8xf32> -> vector<8x8x8xf32>
    "tpu.trace_stop"() : () -> ()
    %cst_43 = arith.constant dense<0xFF800000> : vector<8x8xf32>
    %119 = vector.multi_reduction <maximumf>, %118, %cst_43 [2] : vector<8x8x8xf32> to vector<8x8xf32>
    %120 = vector.shape_cast %119 : vector<8x8xf32> to vector<8x8x1xf32>
    %121 = vector.broadcast %120 : vector<8x8x1xf32> to vector<8x8x8xf32>
    %122 = arith.subf %118, %121 : vector<8x8x8xf32>
    %123 = math.exp %122 : vector<8x8x8xf32>
    %cst_44 = arith.constant dense<0.000000e+00> : vector<8x8xf32>
    %124 = vector.multi_reduction <add>, %123, %cst_44 [2] : vector<8x8x8xf32> to vector<8x8xf32>
    %125 = vector.shape_cast %124 : vector<8x8xf32> to vector<8x8x1xf32>
    %126 = tpu.reciprocal %125 {approx = true} : vector<8x8x1xf32> -> vector<8x8x1xf32>
    %127 = vector.broadcast %126 : vector<8x8x1xf32> to vector<8x8x8xf32>
    %128 = arith.mulf %123, %127 : vector<8x8x8xf32>
    %129 = arith.truncf %128 : vector<8x8x8xf32> to vector<8x8x8xbf16>
    "tpu.trace_start"() <{level = 10 : i32, message = "bqk,bkd->bqd"}> : () -> ()
    %cst_45 = arith.constant dense<0.000000e+00> : vector<8x8x8xf32>
    %130 = tpu.matmul %129, %117, %cst_45 {dimension_numbers = #tpu.dot_dimension_numbers<[2], [1], [1], [2], [0, 0, 0, 1, 1, 2], [0], [0]>} : vector<8x8x8xbf16>, vector<8x8x8xbf16>, vector<8x8x8xf32> -> vector<8x8x8xf32>
    "tpu.trace_stop"() : () -> ()
    %131 = vector.extract_strided_slice %111 {offsets = [0, 0, 8], sizes = [8, 8, 8], strides = [1, 1, 1]} : vector<8x8x96xf32> to vector<8x8x8xf32>
    %132 = arith.truncf %131 : vector<8x8x8xf32> to vector<8x8x8xbf16>
    %133 = vector.extract_strided_slice %111 {offsets = [0, 0, 40], sizes = [8, 8, 8], strides = [1, 1, 1]} : vector<8x8x96xf32> to vector<8x8x8xf32>
    %134 = arith.truncf %133 : vector<8x8x8xf32> to vector<8x8x8xbf16>
    %135 = vector.extract_strided_slice %111 {offsets = [0, 0, 72], sizes = [8, 8, 8], strides = [1, 1, 1]} : vector<8x8x96xf32> to vector<8x8x8xf32>
    %136 = arith.truncf %135 : vector<8x8x8xf32> to vector<8x8x8xbf16>
    "tpu.trace_start"() <{level = 10 : i32, message = "bqd,bkd->bqk"}> : () -> ()
    %cst_46 = arith.constant dense<0.000000e+00> : vector<8x8x8xf32>
    %137 = tpu.matmul %132, %134, %cst_46 {dimension_numbers = #tpu.dot_dimension_numbers<[2], [2], [1], [1], [0, 0, 0, 1, 1, 1], [0], [0]>} : vector<8x8x8xbf16>, vector<8x8x8xbf16>, vector<8x8x8xf32> -> vector<8x8x8xf32>
    "tpu.trace_stop"() : () -> ()
    %cst_47 = arith.constant dense<0xFF800000> : vector<8x8xf32>
    %138 = vector.multi_reduction <maximumf>, %137, %cst_47 [2] : vector<8x8x8xf32> to vector<8x8xf32>
    %139 = vector.shape_cast %138 : vector<8x8xf32> to vector<8x8x1xf32>
    %140 = vector.broadcast %139 : vector<8x8x1xf32> to vector<8x8x8xf32>
    %141 = arith.subf %137, %140 : vector<8x8x8xf32>
    %142 = math.exp %141 : vector<8x8x8xf32>
    %cst_48 = arith.constant dense<0.000000e+00> : vector<8x8xf32>
    %143 = vector.multi_reduction <add>, %142, %cst_48 [2] : vector<8x8x8xf32> to vector<8x8xf32>
    %144 = vector.shape_cast %143 : vector<8x8xf32> to vector<8x8x1xf32>
    %145 = tpu.reciprocal %144 {approx = true} : vector<8x8x1xf32> -> vector<8x8x1xf32>
    %146 = vector.broadcast %145 : vector<8x8x1xf32> to vector<8x8x8xf32>
    %147 = arith.mulf %142, %146 : vector<8x8x8xf32>
    %148 = arith.truncf %147 : vector<8x8x8xf32> to vector<8x8x8xbf16>
    "tpu.trace_start"() <{level = 10 : i32, message = "bqk,bkd->bqd"}> : () -> ()
    %cst_49 = arith.constant dense<0.000000e+00> : vector<8x8x8xf32>
    %149 = tpu.matmul %148, %136, %cst_49 {dimension_numbers = #tpu.dot_dimension_numbers<[2], [1], [1], [2], [0, 0, 0, 1, 1, 2], [0], [0]>} : vector<8x8x8xbf16>, vector<8x8x8xbf16>, vector<8x8x8xf32> -> vector<8x8x8xf32>
    "tpu.trace_stop"() : () -> ()
    %150 = vector.extract_strided_slice %111 {offsets = [0, 0, 16], sizes = [8, 8, 8], strides = [1, 1, 1]} : vector<8x8x96xf32> to vector<8x8x8xf32>
    %151 = arith.truncf %150 : vector<8x8x8xf32> to vector<8x8x8xbf16>
    %152 = vector.extract_strided_slice %111 {offsets = [0, 0, 48], sizes = [8, 8, 8], strides = [1, 1, 1]} : vector<8x8x96xf32> to vector<8x8x8xf32>
    %153 = arith.truncf %152 : vector<8x8x8xf32> to vector<8x8x8xbf16>
    %154 = vector.extract_strided_slice %111 {offsets = [0, 0, 80], sizes = [8, 8, 8], strides = [1, 1, 1]} : vector<8x8x96xf32> to vector<8x8x8xf32>
    %155 = arith.truncf %154 : vector<8x8x8xf32> to vector<8x8x8xbf16>
    "tpu.trace_start"() <{level = 10 : i32, message = "bqd,bkd->bqk"}> : () -> ()
    %cst_50 = arith.constant dense<0.000000e+00> : vector<8x8x8xf32>
    %156 = tpu.matmul %151, %153, %cst_50 {dimension_numbers = #tpu.dot_dimension_numbers<[2], [2], [1], [1], [0, 0, 0, 1, 1, 1], [0], [0]>} : vector<8x8x8xbf16>, vector<8x8x8xbf16>, vector<8x8x8xf32> -> vector<8x8x8xf32>
    "tpu.trace_stop"() : () -> ()
    %cst_51 = arith.constant dense<0xFF800000> : vector<8x8xf32>
    %157 = vector.multi_reduction <maximumf>, %156, %cst_51 [2] : vector<8x8x8xf32> to vector<8x8xf32>
    %158 = vector.shape_cast %157 : vector<8x8xf32> to vector<8x8x1xf32>
    %159 = vector.broadcast %158 : vector<8x8x1xf32> to vector<8x8x8xf32>
    %160 = arith.subf %156, %159 : vector<8x8x8xf32>
    %161 = math.exp %160 : vector<8x8x8xf32>
    %cst_52 = arith.constant dense<0.000000e+00> : vector<8x8xf32>
    %162 = vector.multi_reduction <add>, %161, %cst_52 [2] : vector<8x8x8xf32> to vector<8x8xf32>
    %163 = vector.shape_cast %162 : vector<8x8xf32> to vector<8x8x1xf32>
    %164 = tpu.reciprocal %163 {approx = true} : vector<8x8x1xf32> -> vector<8x8x1xf32>
    %165 = vector.broadcast %164 : vector<8x8x1xf32> to vector<8x8x8xf32>
    %166 = arith.mulf %161, %165 : vector<8x8x8xf32>
    %167 = arith.truncf %166 : vector<8x8x8xf32> to vector<8x8x8xbf16>
    "tpu.trace_start"() <{level = 10 : i32, message = "bqk,bkd->bqd"}> : () -> ()
    %cst_53 = arith.constant dense<0.000000e+00> : vector<8x8x8xf32>
    %168 = tpu.matmul %167, %155, %cst_53 {dimension_numbers = #tpu.dot_dimension_numbers<[2], [1], [1], [2], [0, 0, 0, 1, 1, 2], [0], [0]>} : vector<8x8x8xbf16>, vector<8x8x8xbf16>, vector<8x8x8xf32> -> vector<8x8x8xf32>
    "tpu.trace_stop"() : () -> ()
    %169 = vector.extract_strided_slice %111 {offsets = [0, 0, 24], sizes = [8, 8, 8], strides = [1, 1, 1]} : vector<8x8x96xf32> to vector<8x8x8xf32>
    %170 = arith.truncf %169 : vector<8x8x8xf32> to vector<8x8x8xbf16>
    %171 = vector.extract_strided_slice %111 {offsets = [0, 0, 56], sizes = [8, 8, 8], strides = [1, 1, 1]} : vector<8x8x96xf32> to vector<8x8x8xf32>
    %172 = arith.truncf %171 : vector<8x8x8xf32> to vector<8x8x8xbf16>
    %173 = vector.extract_strided_slice %111 {offsets = [0, 0, 88], sizes = [8, 8, 8], strides = [1, 1, 1]} : vector<8x8x96xf32> to vector<8x8x8xf32>
    %174 = arith.truncf %173 : vector<8x8x8xf32> to vector<8x8x8xbf16>
    "tpu.trace_start"() <{level = 10 : i32, message = "bqd,bkd->bqk"}> : () -> ()
    %cst_54 = arith.constant dense<0.000000e+00> : vector<8x8x8xf32>
    %175 = tpu.matmul %170, %172, %cst_54 {dimension_numbers = #tpu.dot_dimension_numbers<[2], [2], [1], [1], [0, 0, 0, 1, 1, 1], [0], [0]>} : vector<8x8x8xbf16>, vector<8x8x8xbf16>, vector<8x8x8xf32> -> vector<8x8x8xf32>
    "tpu.trace_stop"() : () -> ()
    %cst_55 = arith.constant dense<0xFF800000> : vector<8x8xf32>
    %176 = vector.multi_reduction <maximumf>, %175, %cst_55 [2] : vector<8x8x8xf32> to vector<8x8xf32>
    %177 = vector.shape_cast %176 : vector<8x8xf32> to vector<8x8x1xf32>
    %178 = vector.broadcast %177 : vector<8x8x1xf32> to vector<8x8x8xf32>
    %179 = arith.subf %175, %178 : vector<8x8x8xf32>
    %180 = math.exp %179 : vector<8x8x8xf32>
    %cst_56 = arith.constant dense<0.000000e+00> : vector<8x8xf32>
    %181 = vector.multi_reduction <add>, %180, %cst_56 [2] : vector<8x8x8xf32> to vector<8x8xf32>
    %182 = vector.shape_cast %181 : vector<8x8xf32> to vector<8x8x1xf32>
    %183 = tpu.reciprocal %182 {approx = true} : vector<8x8x1xf32> -> vector<8x8x1xf32>
    %184 = vector.broadcast %183 : vector<8x8x1xf32> to vector<8x8x8xf32>
    %185 = arith.mulf %180, %184 : vector<8x8x8xf32>
    %186 = arith.truncf %185 : vector<8x8x8xf32> to vector<8x8x8xbf16>
    "tpu.trace_start"() <{level = 10 : i32, message = "bqk,bkd->bqd"}> : () -> ()
    %cst_57 = arith.constant dense<0.000000e+00> : vector<8x8x8xf32>
    %187 = tpu.matmul %186, %174, %cst_57 {dimension_numbers = #tpu.dot_dimension_numbers<[2], [1], [1], [2], [0, 0, 0, 1, 1, 2], [0], [0]>} : vector<8x8x8xbf16>, vector<8x8x8xbf16>, vector<8x8x8xf32> -> vector<8x8x8xf32>
    "tpu.trace_stop"() : () -> ()
    %188 = tpu.concatenate %130, %149, %168, %187 in 2 : vector<8x8x8xf32>, vector<8x8x8xf32>, vector<8x8x8xf32>, vector<8x8x8xf32> -> vector<8x8x32xf32>
    %189 = vector.shape_cast %188 : vector<8x8x32xf32> to vector<64x32xf32>
    %190 = arith.truncf %189 : vector<64x32xf32> to vector<64x32xbf16>
    %c1_58 = arith.constant 1 : index
    %c0_59 = arith.constant 0 : index
    %c0_60 = arith.constant 0 : index
    %191 = vector.load %arg6[%c1_58, %c0_59, %c0_60] : memref<2x32x32xbf16, #tpu.memory_space<vmem>>, vector<1x32x32xbf16>
    %192 = vector.shape_cast %191 : vector<1x32x32xbf16> to vector<32x32xbf16>
    %cst_61 = arith.constant dense<0.000000e+00> : vector<64x32xf32>
    %193 = tpu.matmul %190, %192, %cst_61 {dimension_numbers = #tpu.dot_dimension_numbers<[1], [0], [0], [1], [0, 0, 1, 1], [], []>} : vector<64x32xbf16>, vector<32x32xbf16>, vector<64x32xf32> -> vector<64x32xf32>
    %c1_62 = arith.constant 1 : index
    %c0_63 = arith.constant 0 : index
    %c0_64 = arith.constant 0 : index
    %194 = vector.load %arg7[%c1_62, %c0_63, %c0_64] : memref<2x1x32xf32, #tpu.memory_space<vmem>>, vector<1x1x32xf32>
    %195 = vector.shape_cast %194 : vector<1x1x32xf32> to vector<1x32xf32>
    %196 = vector.broadcast %195 : vector<1x32xf32> to vector<64x32xf32>
    %197 = arith.addf %193, %196 : vector<64x32xf32>
    %198 = vector.shape_cast %197 : vector<64x32xf32> to vector<8x8x32xf32>
    %c0_65 = arith.constant 0 : index
    %c0_66 = arith.constant 0 : index
    %c0_67 = arith.constant 0 : index
    %199 = vector.load %arg8[%c0_65, %c0_66, %c0_67] : memref<1x8x32xf32, #tpu.memory_space<vmem>>, vector<1x8x32xf32>
    %200 = vector.broadcast %199 : vector<1x8x32xf32> to vector<8x8x32xf32>
    %201 = arith.mulf %198, %200 : vector<8x8x32xf32>
    %cst_68 = arith.constant dense<0.000000e+00> : vector<8x32xf32>
    %202 = vector.multi_reduction <add>, %201, %cst_68 [1] : vector<8x8x32xf32> to vector<8x32xf32>
    %c0_69 = arith.constant 0 : index
    %c0_70 = arith.constant 0 : index
    %203 = vector.load %arg9[%c0_69, %c0_70] : memref<32x1xf32, #tpu.memory_space<vmem>>, vector<32x1xf32>
    %cst_71 = arith.constant dense<0.000000e+00> : vector<8x1xf32>
    %204 = tpu.matmul %202, %203, %cst_71 {dimension_numbers = #tpu.dot_dimension_numbers<[1], [0], [0], [1], [0, 0, 1, 1], [], []>} : vector<8x32xf32>, vector<32x1xf32>, vector<8x1xf32> -> vector<8x1xf32>
    %c0_72 = arith.constant 0 : index
    %c0_73 = arith.constant 0 : index
    %205 = vector.load %arg10[%c0_72, %c0_73] : memref<1x1xf32, #tpu.memory_space<vmem>>, vector<1x1xf32>
    %206 = vector.extract %205[0, 0] : f32 from vector<1x1xf32>
    %207 = vector.broadcast %206 : f32 to vector<8x1xf32>
    %208 = arith.addf %204, %207 : vector<8x1xf32>
    %209 = tpu.transpose %208, [1, 0] : vector<8x1xf32> -> vector<1x8xf32>
    %210 = vector.shape_cast %209 : vector<1x8xf32> to vector<1x1x8xf32>
    %c0_74 = arith.constant 0 : index
    %c0_75 = arith.constant 0 : index
    %c0_76 = arith.constant 0 : index
    %211 = vector.load %arg11[%c0_74, %c0_75, %c0_76] : memref<1x1x8xf32, #tpu.memory_space<vmem>>, vector<1x1x8xf32>
    tpu.vector_store %arg11[%c0_74, %c0_75, %c0_76], %210 {strides = array<i32>} : memref<1x1x8xf32, #tpu.memory_space<vmem>>, vector<1x1x8xf32>,
    return
  }
  func.func @transform_0(%arg0: i32) -> (i32, i32) {
    %c0_i32 = arith.constant 0 : i32
    %c0_i32_0 = arith.constant 0 : i32
    return %arg0, %c0_i32 : i32, i32
  }
  func.func @transform_1(%arg0: i32) -> (i32, i32) {
    %c0_i32 = arith.constant 0 : i32
    %c0_i32_0 = arith.constant 0 : i32
    %c0_i32_1 = arith.constant 0 : i32
    return %c0_i32, %c0_i32_0 : i32, i32
  }
  func.func @transform_2(%arg0: i32) -> (i32, i32) {
    %c0_i32 = arith.constant 0 : i32
    %c0_i32_0 = arith.constant 0 : i32
    %c0_i32_1 = arith.constant 0 : i32
    return %c0_i32, %c0_i32_0 : i32, i32
  }
  func.func @transform_3(%arg0: i32) -> (i32, i32, i32) {
    %c0_i32 = arith.constant 0 : i32
    %c0_i32_0 = arith.constant 0 : i32
    %c0_i32_1 = arith.constant 0 : i32
    %c0_i32_2 = arith.constant 0 : i32
    return %c0_i32, %c0_i32_0, %c0_i32_1 : i32, i32, i32
  }
  func.func @transform_4(%arg0: i32) -> (i32, i32, i32) {
    %c0_i32 = arith.constant 0 : i32
    %c0_i32_0 = arith.constant 0 : i32
    %c0_i32_1 = arith.constant 0 : i32
    %c0_i32_2 = arith.constant 0 : i32
    return %c0_i32, %c0_i32_0, %c0_i32_1 : i32, i32, i32
  }
  func.func @transform_5(%arg0: i32) -> (i32, i32, i32) {
    %c0_i32 = arith.constant 0 : i32
    %c0_i32_0 = arith.constant 0 : i32
    %c0_i32_1 = arith.constant 0 : i32
    %c0_i32_2 = arith.constant 0 : i32
    return %c0_i32, %c0_i32_0, %c0_i32_1 : i32, i32, i32
  }
  func.func @transform_6(%arg0: i32) -> (i32, i32, i32) {
    %c0_i32 = arith.constant 0 : i32
    %c0_i32_0 = arith.constant 0 : i32
    %c0_i32_1 = arith.constant 0 : i32
    %c0_i32_2 = arith.constant 0 : i32
    return %c0_i32, %c0_i32_0, %c0_i32_1 : i32, i32, i32
  }
  func.func @transform_7(%arg0: i32) -> (i32, i32, i32) {
    %c0_i32 = arith.constant 0 : i32
    %c0_i32_0 = arith.constant 0 : i32
    %c0_i32_1 = arith.constant 0 : i32
    %c0_i32_2 = arith.constant 0 : i32
    return %c0_i32, %c0_i32_0, %c0_i32_1 : i32, i32, i32
  }
  func.func @transform_8(%arg0: i32) -> (i32, i32) {
    %c0_i32 = arith.constant 0 : i32
    %c0_i32_0 = arith.constant 0 : i32
    %c0_i32_1 = arith.constant 0 : i32
    return %c0_i32, %c0_i32_0 : i32, i32
  }
  func.func @transform_9(%arg0: i32) -> (i32, i32) {
    %c0_i32 = arith.constant 0 : i32
    %c0_i32_0 = arith.constant 0 : i32
    %c0_i32_1 = arith.constant 0 : i32
    return %c0_i32, %c0_i32_0 : i32, i32
  }
  func.func @transform_10(%arg0: i32) -> (i32, i32, i32) {
    %c0_i32 = arith.constant 0 : i32
    %c0_i32_0 = arith.constant 0 : i32
    %c0_i32_1 = arith.constant 0 : i32
    return %arg0, %c0_i32, %c0_i32_0 : i32, i32, i32
  }
}

</mosaic_0001>

<bundles_post_ra>
// kernel: tpu_custom_call.1
= control target key start
LH: loop header
LB: loop body
LE: loop exit
PB: predicated region body
PF: predicated region fallthrough
CT: control target
= control target key end

     0   :  { %s11801_s0 = inlined_call_operand.vmem [shape: bf16[64,16], index: 0, kind: input, shape index: {}]   ;;  %s11802_s1 = inlined_call_operand.vmem [shape: bf16[16,32], index: 1, kind: input, shape index: {}]   ;;  %s11803_s2 = inlined_call_operand.hbm [shape: f32[1,32], index: 2, kind: input, shape index: {}]   ;;  %s11804_s3 = inlined_call_operand.vmem [shape: bf16[2,32,96], index: 3, kind: input, shape index: {}]   ;;  %s11805_s4 = inlined_call_operand.vmem [shape: f32[2,1,96], index: 4, kind: input, shape index: {}]   ;;  %s11806_s5 = inlined_call_operand.vmem [shape: bf16[2,32,32], index: 5, kind: input, shape index: {}]   ;;  %s11807_s6 = inlined_call_operand.vmem [shape: f32[2,1,32], index: 6, kind: input, shape index: {}]   ;;  %s11808_s7 = inlined_call_operand.vmem [shape: f32[1,8,32], index: 7, kind: input, shape index: {}]   ;;  %s11809_s8 = inlined_call_operand.vmem [shape: f32[32,1], index: 8, kind: input, shape index: {}]   ;;  %s11810_s9 = inlined_call_operand.<no memory space> [shape: f32[1,1], index: 9, kind: input, shape index: {}]   ;;  %s11811_s10 = inlined_call_operand.hbm [shape: f32[1,1,8], index: 10, kind: output, shape index: {}]  }
   0x1   :  { %v15_v0 = vstv %s11810_s9 }
   0x2   :  { %16 = vst [vmem:[#allocation2] sm:$0x1] %v15_v0 }
   0x3   :  { %17 = vsyncpa [#allocation4], 0 }
   0x4   :  { %18 = vsyncpa [#allocation5], 0  ;;  %s9858_s15 = smov [#allocation3]  }
   0x5   :  { %s29_s16 = sshll.u32 %s9858_s15, 4  ;;  %s30_s16 = int_to_ptr.vmem [resolvable:$true] %s29_s16 }
   0x6   :  { %s9822_s17 = scalar_lea.vmem %s30_s16, 16  ;;  %s9826_s18 = scalar_lea.vmem %s30_s16, 32 }
   0x7   :  { %p9823_p0 = scmp.ne.s32.totalorder %s30_s16, %s9822_s17  ;;  %p9827_p1 = scmp.lt.s32.totalorder %s30_s16, %s30_s16 }
   0x8   :  { %p9828_p2 = scmp.lt.s32.totalorder %s9826_s18, %s9822_s17 }
   0xa   :  { %p9829_p3 = por %p9828_p2, %p9827_p1 }
   0xc   :  { %p9830_p4 = pnand %p9829_p3, %p9823_p0 }
   0xe   :  { %9833 = shalt.err (!%p9830_p4)
}
   0xf   :  { %32 = dma.hbm_to_vmem [thread:$0]  %s11803_s2, 16, %s30_s16, [#allocation4]  }
  0x10   :  { %9854 = dma.done.wait [#allocation4], 16  }
  0x11   :  { %9855 = vsyncadd [#allocation4], 4294967280  ;;  %v9545_v1 = vld [vmem:[%s11802_s1] sm:$0xff]   ;;  %vm94_vm0 = vcmask 130048   ;;  %v9547_v3 = vld [vmem:[%s11801_s0 + $0x8] sm:$0xff]   ;;  %vm207_vm1 = vcmask 261120  }
  0x12   :  { %v9546_v2 = vld [vmem:[%s11801_s0] sm:$0xff]   ;;  %8566 = vmatprep.subr.bf16.mxu0 %v9545_v1  ;;  %9403 = vmatprep.subr.bf16.mxu1 %v9545_v1  ;;  %v9548_v4 = vld [vmem:[%s11801_s0 + $0x10] sm:$0xff]   ;;  %v9549_v5 = vld [vmem:[%s11801_s0 + $0x18] sm:$0xff]   ;;  %v9859_v37 = vmov 0.0   ;;  %vm9860_vm2 = vmmov 0   ;;  %s9861_s13 = smov 96  }
  0x13   :  { %8567 = vmatpush3.bf16.msra.mxu0 %v9545_v1  ;;  %8568 = vmatprep.mubr.msk.bf16.mxu0 %vm94_vm0, %v9546_v2  ;;  %v9550_v6 = vld [vmem:[%s11804_s3 + $0x8] sm:$0xff]   ;;  %v9551_v7 = vld [vmem:[%s11804_s3] sm:$0xff]   ;;  %s9862_s14 = smov 64   ;;  %vm296_vm3 = vcmask 64512   ;;  %vm787_vm4 = vcmask 1043456   ;;  %s9863_s15 = smov 88  }
  0x14   :  { %9404 = vmatpush3.bf16.msra.mxu1 %v9545_v1  ;;  %8572 = vmatprep.mubr.msk.bf16.mxu1 %vm94_vm0, %v9548_v4  ;;  %v8099_v11 = vld [vmem:[#allocation3] ss:$0 sm:$0xff]  ;;  %v8109_v38 = vld [vmem:[%s11805_s4] ss:$0 sm:$0xff]  ;;  %s9864_s16 = smov 120   ;;  %s9865_s17 = smov 56  }
  0x15   :  { %8576 = vmatprep.subr.bf16.mxu1 %v9550_v6  ;;  %8588 = vmatprep.subr.bf16.mxu0 %v9859_v37  ;;  %s9866_s18 = smov 80   ;;  %s9867_s19 = smov 112   ;;  %vm3919_vm5 = vcmask 195584   ;;  %vm7964_vm6 = vcmask 1041409   ;;  %vm7966_vm7 = vcmask 1042434   ;;  %vm7968_vm8 = vcmask 1043459  }
  0x16   :  { %8569 = vmatmul.mubr.msk.bf16.vlgmr.msra.gmra.mxu0 %vm94_vm0, %v9547_v3  ;;  %s9868_s20 = smov 48   ;;  %s9869_s9 = smov 72   ;;  %vm7970_vm9 = vcmask 1044484   ;;  %vm7972_vm10 = vcmask 1045509   ;;  %vm7974_vm11 = vcmask 1046534   ;;  %vm7976_vm12 = vcmask 1047559  }
  0x17   :  { %8573 = vmatmul.mubr.msk.bf16.vlgmr.msra.gmra.mxu1 %vm94_vm0, %v9549_v5  ;;  %8590 = vmatprep.mubr.msk.bf16.mxu0 %vm9860_vm2, %v9859_v37  ;;  %s9870_s21 = smov 104   ;;  %s9871_s22 = smov 40   ;;  %vm8082_vm13 = vcmask 57344  }
  0x18   :  { %8577 = vmatpush3.bf16.msra.mxu1 %v9550_v6  ;;  %s9872_s23 = smov 8   ;;  %s9873_s24 = smov 16  }
  0x19   :  { %8578 = vmatprep.subr.bf16.mxu1 %v9551_v7  ;;  %s9874_s27 = smov 24  }
  0x1c   :  { %8579 = vmatpush3.bf16.msra.mxu1 %v9551_v7 }
  0x1d   :  { %8594 = vmatprep.subr.bf16.mxu1 %v9859_v37 }
  0xd6   :  { %v8570_v8 = vpop.f32.mrf.mxu0 }
  0xd7   :  { %v8574_v9 = vpop.f32.mrf.mxu1  ;;  %v150_v18 = vadd.f32 %v8570_v8, %v8099_v11 }
  0xd8   :  { %v141_v10 = vpop.f32.mrf.mxu0  ;;  %v166_v28 = vadd.f32 %v8574_v9, %v8099_v11 }
  0xd9   :  { %v157_v12 = vpop.f32.mrf.mxu1  ;;  %v142_v15 = vadd.f32 %v8099_v11, %v141_v10  ;;  %v174_v27 = vmax.f32 %v150_v18, 0.0 }
  0xda   :  { %v8571_v13 = vpop.f32.mrf.mxu0  ;;  %v158_v14 = vadd.f32 %v8099_v11, %v157_v12  ;;  %v178_v34 = vmax.f32 %v166_v28, 0.0 }
  0xdb   :  { %v153_v16 = vadd.f32 %v8571_v13, %v8099_v11  ;;  %v8575_v17 = vpop.f32.mrf.mxu1  ;;  %v172_v25 = vmax.f32 %v142_v15, 0.0 }
  0xdc   :  { %v144_v19 = vpop.f32.mrf.mxu0  ;;  %v176_v23 = vmax.f32 %v158_v14, 0.0  ;;  %v169_v29 = vadd.f32 %v8575_v17, %v8099_v11 }
  0xdd   :  { %v145_v20 = vadd.f32 %v8099_v11, %v144_v19  ;;  %v160_v21 = vpop.f32.mrf.mxu1  ;;  %v175_v22 = vmax.f32 %v153_v16, 0.0 }
  0xde   :  { %v161_v24 = vadd.f32 %v8099_v11, %v160_v21  ;;  %v179_v35 = vmax.f32 %v169_v29, 0.0 }
  0xdf   :  { %v173_v26 = vmax.f32 %v145_v20, 0.0  ;;  %v181_v32 = vpack.c.bf16 %v175_v22, %v174_v27 }
  0xe0   :  { %v177_v30 = vmax.f32 %v161_v24, 0.0  ;;  %v183_v36 = vpack.c.bf16 %v179_v35, %v178_v34 }
  0xe1   :  { %v180_v31 = vpack.c.bf16 %v173_v26, %v172_v25 }
  0xe2   :  { %v182_v33 = vpack.c.bf16 %v177_v30, %v176_v23 }
  0xe3   :  { %8580 = vmatprep.mubr.msk.bf16.mxu1 %vm207_vm1, %v180_v31 }
  0xe4   :  { %8581 = vmatmul.mubr.msk.bf16.vlgmr.msra.gmra.mxu1 %vm207_vm1, %v181_v32 }
  0xe5   :  { %8584 = vmatprep.mubr.msk.bf16.mxu1 %vm207_vm1, %v182_v33 }
  0xec   :  { %8585 = vmatmul.mubr.msk.bf16.gmra.mxu1 %vm207_vm1, %v183_v36 }
  0xed   :  { %8596 = vmatprep.mubr.msk.bf16.mxu1 %vm9860_vm2, %v9859_v37 }
 0x1a4   :  { %v8582_v39 = vpop.f32.mrf.mxu1 }
 0x1a5   :  { %v263_v40 = vadd.f32 %v8582_v39, %v8109_v38 }
 0x1a6   :  { %v254_v41 = vpop.f32.mrf.mxu1 }
 0x1a7   :  { %v9975_v42 = vpack.c.bf16 %v263_v40, %v263_v40  ;;  %v255_v43 = vadd.f32 %v8109_v38, %v254_v41 }
 0x1a8   :  { %v8583_v44 = vpop.f32.mrf.mxu1 }
 0x1a9   :  { %v9977_v45 = vpack.c.bf16 %v255_v43, %v255_v43  ;;  %v266_v46 = vadd.f32 %v8583_v44, %v8109_v38  ;;  %393 = vrot.lane.b32.xlu1 %v9975_v42, %s9861_s13 }
 0x1aa   :  { %v257_v47 = vpop.f32.mrf.mxu1 }
 0x1ab   :  { %v9981_v48 = vpack.c.bf16 %v266_v46, %v266_v46  ;;  %v258_v49 = vadd.f32 %v8109_v38, %v257_v47  ;;  %294 = vrot.lane.b32.xlu0 %v9977_v45, %s9861_s13 }
 0x1ac   :  { %v8586_v50 = vpop.f32.mrf.mxu1 }
 0x1ad   :  { %v9985_v51 = vpack.c.bf16 %v258_v49, %v258_v49  ;;  %442 = vrot.lane.b32.xlu1 %v9981_v48, %s9861_s13  ;;  %v279_v55 = vadd.f32 %v8586_v50, %v8109_v38 }
 0x1ae   :  { %v270_v52 = vpop.f32.mrf.mxu1 }
 0x1af   :  { %v271_v53 = vadd.f32 %v8109_v38, %v270_v52  ;;  %344 = vrot.lane.b32.xlu0 %v9985_v51, %s9861_s13  ;;  %v9995_v59 = vpack.c.bf16 %v279_v55, %v279_v55 }
 0x1b0   :  { %v8587_v54 = vpop.f32.mrf.mxu1 }
 0x1b1   :  { %v9991_v56 = vpack.c.bf16 %v271_v53, %v271_v53  ;;  %v282_v60 = vadd.f32 %v8587_v54, %v8109_v38 }
 0x1b2   :  { %v273_v57 = vpop.f32.mrf.mxu1 }
 0x1b3   :  { %v274_v58 = vadd.f32 %v8109_v38, %v273_v57  ;;  %491 = vrot.lane.b32.xlu0 %v9991_v56, %s9861_s13  ;;  %v10003_v62 = vpack.c.bf16 %v282_v60, %v282_v60 }
 0x1b5   :  { %v9997_v61 = vpack.c.bf16 %v274_v58, %v274_v58 }
 0x1b7   :  { %540 = vrot.lane.b32.xlu1 %v9997_v61, %s9861_s13  ;;  %589 = vrot.lane.b32.xlu0 %v9995_v59, %s9861_s13 }
 0x1bb   :  { %638 = vrot.lane.b32.xlu1 %v10003_v62, %s9861_s13  ;;  %831 = vrot.lane.b32.xlu0 %v9985_v51, %s9862_s14 }
 0x1bf   :  { %782 = vrot.lane.b32.xlu1 %v9977_v45, %s9862_s14 }
 0x1c3   :  { %879 = vrot.lane.b32.xlu1 %v9975_v42, %s9862_s14 }
 0x1c7   :  { %927 = vrot.lane.b32.xlu1 %v9981_v48, %s9862_s14 }
 0x21b   :  { %v394_v1 = vpop.permute.xlu1 %393 }
 0x21c   :  { %v399_v4 = vsel %vm296_vm3, %v394_v1, 0 }
 0x21d   :  { %v295_v63 = vpop.permute.xlu0 %294 }
 0x21e   :  { %v301_v0 = vsel %vm296_vm3, %v295_v63, 0 }
 0x21f   :  { %8589 = vmatpush3.bf16.xpose.msra.mxu0 %v301_v0  ;;  %v443_v5 = vpop.permute.xlu1 %442 }
 0x220   :  { %8600 = vmatprep.subr.bf16.mxu0 %v9859_v37  ;;  %v448_v6 = vsel %vm296_vm3, %v443_v5, 0 }
 0x221   :  { %v345_v2 = vpop.permute.xlu0 %344 }
 0x222   :  { %v350_v3 = vsel %vm296_vm3, %v345_v2, 0 }
 0x223   :  { %8595 = vmatpush3.bf16.xpose.msra.mxu1 %v350_v3 }
 0x224   :  { %8606 = vmatprep.subr.bf16.mxu1 %v9859_v37 }
 0x225   :  { %v492_v7 = vpop.permute.xlu0 %491 }
 0x226   :  { %8591 = vmatmul.mubr.msk.bf16.vlgmr.msra.gmra.mxu0 %vm296_vm3, %v9977_v45  ;;  %v497_v8 = vsel %vm296_vm3, %v492_v7, 0 }
 0x227   :  { %8601 = vmatpush3.bf16.xpose.msra.mxu0 %v399_v4  ;;  %8602 = vmatprep.mubr.msk.bf16.mxu0 %vm9860_vm2, %v9859_v37 }
 0x228   :  { %8612 = vmatprep.subr.bf16.mxu0 %v9859_v37 }
 0x229   :  { %v541_v9 = vpop.permute.xlu1 %540  ;;  %v590_v11 = vpop.permute.xlu0 %589 }
 0x22a   :  { %8597 = vmatmul.mubr.msk.bf16.vlgmr.msra.gmra.mxu1 %vm296_vm3, %v9985_v51  ;;  %v546_v10 = vsel %vm296_vm3, %v541_v9, 0  ;;  %v595_v13 = vsel %vm296_vm3, %v590_v11, 0 }
 0x22b   :  { %8607 = vmatpush3.bf16.xpose.msra.mxu1 %v448_v6  ;;  %8608 = vmatprep.mubr.msk.bf16.mxu1 %vm9860_vm2, %v9859_v37 }
 0x22c   :  { %8618 = vmatprep.subr.bf16.mxu1 %v9859_v37 }
 0x22d   :  { %v639_v12 = vpop.permute.xlu1 %638  ;;  %v832_v17 = vpop.permute.xlu0 %831 }
 0x22e   :  { %8603 = vmatmul.mubr.msk.bf16.vlgmr.msra.gmra.mxu0 %vm296_vm3, %v9975_v42  ;;  %v644_v14 = vsel %vm296_vm3, %v639_v12, 0  ;;  %v837_v18 = vsel %vm787_vm4, %v832_v17, 0 }
 0x22f   :  { %8613 = vmatpush3.bf16.xpose.msra.mxu0 %v497_v8  ;;  %8614 = vmatprep.mubr.msk.bf16.mxu0 %vm9860_vm2, %v9859_v37 }
 0x230   :  { %8624 = vmatprep.subr.bf16.mxu0 %v9859_v37 }
 0x231   :  { %v783_v15 = vpop.permute.xlu1 %782 }
 0x232   :  { %8609 = vmatmul.mubr.msk.bf16.vlgmr.msra.gmra.mxu1 %vm296_vm3, %v9981_v48  ;;  %v789_v16 = vsel %vm787_vm4, %v783_v15, 0 }
 0x233   :  { %8619 = vmatpush3.bf16.xpose.msra.mxu1 %v546_v10  ;;  %8620 = vmatprep.mubr.msk.bf16.mxu1 %vm9860_vm2, %v9859_v37 }
 0x234   :  { %8630 = vmatprep.subr.bf16.mxu1 %v9859_v37 }
 0x235   :  { %v10082_v4 = vpop.permute.xlu1 %879 }
 0x236   :  { %8615 = vmatmul.mubr.msk.bf16.vlgmr.msra.gmra.mxu0 %vm296_vm3, %v9991_v56 }
 0x237   :  { %8625 = vmatpush3.bf16.xpose.msra.mxu0 %v595_v13  ;;  %8626 = vmatprep.mubr.msk.bf16.mxu0 %vm9860_vm2, %v9859_v37 }
 0x238   :  { %8636 = vmatprep.subr.bf16.mxu0 %v9859_v37 }
 0x239   :  { %v10084_v5 = vpop.permute.xlu1 %927 }
 0x23a   :  { %8621 = vmatmul.mubr.msk.bf16.vlgmr.msra.gmra.mxu1 %vm296_vm3, %v9997_v61 }
 0x23b   :  { %8631 = vmatpush3.bf16.xpose.msra.mxu1 %v644_v14  ;;  %8632 = vmatprep.mubr.msk.bf16.mxu1 %vm9860_vm2, %v9859_v37 }
 0x23c   :  { %8642 = vmatprep.subr.bf16.mxu1 %v9859_v37 }
 0x23e   :  { %8627 = vmatmul.mubr.msk.bf16.vlgmr.msra.gmra.mxu0 %vm296_vm3, %v9995_v59 }
 0x23f   :  { %8637 = vmatpush3.bf16.msra.mxu0 %v789_v16  ;;  %8638 = vmatprep.mubr.msk.bf16.mxu0 %vm9860_vm2, %v9859_v37 }
 0x240   :  { %8648 = vmatprep.subr.bf16.mxu0 %v9859_v37 }
 0x242   :  { %8633 = vmatmul.mubr.msk.bf16.vlgmr.msra.gmra.mxu1 %vm296_vm3, %v10003_v62 }
 0x243   :  { %8643 = vmatpush3.bf16.msra.mxu1 %v837_v18  ;;  %8644 = vmatprep.mubr.msk.bf16.mxu1 %vm9860_vm2, %v9859_v37 }
 0x244   :  { %8654 = vmatprep.subr.bf16.mxu1 %v9859_v37 }
 0x2e6   :  { %v337_v19 = vpop.f32.mrf.mxu0 }
 0x2e7   :  { %v686_v20 = vsel %vm296_vm3, %v337_v19, -inf }
 0x2e8   :  { %687 = vmax.xlane.f32.xlu0 %v686_v20  ;;  %v8592_v21 = vpop.f32.mrf.mxu0 }
 0x2ea   :  { %v340_v22 = vpop.f32.mrf.mxu0  ;;  %v386_v23 = vpop.f32.mrf.mxu1 }
 0x2eb   :  { %v689_v24 = vsel %vm296_vm3, %v386_v23, -inf }
 0x2ec   :  { %v8593_v25 = vpop.f32.mrf.mxu0  ;;  %690 = vmax.xlane.f32.xlu1 %v689_v24  ;;  %v8598_v26 = vpop.f32.mrf.mxu1 }
 0x2ee   :  { %v389_v27 = vpop.f32.mrf.mxu1  ;;  %v435_v28 = vpop.f32.mrf.mxu0 }
 0x2ef   :  { %v692_v29 = vsel %vm296_vm3, %v435_v28, -inf }
 0x2f0   :  { %693 = vmax.xlane.f32.xlu0 %v692_v29  ;;  %v8599_v30 = vpop.f32.mrf.mxu1  ;;  %v8604_v31 = vpop.f32.mrf.mxu0 }
 0x2f2   :  { %v438_v32 = vpop.f32.mrf.mxu0  ;;  %v484_v33 = vpop.f32.mrf.mxu1 }
 0x2f3   :  { %v695_v34 = vsel %vm296_vm3, %v484_v33, -inf }
 0x2f4   :  { %v8605_v35 = vpop.f32.mrf.mxu0  ;;  %696 = vmax.xlane.f32.xlu0 %v695_v34  ;;  %v8610_v36 = vpop.f32.mrf.mxu1 }
 0x2f6   :  { %v487_v38 = vpop.f32.mrf.mxu1  ;;  %v533_v39 = vpop.f32.mrf.mxu0 }
 0x2f7   :  { %v698_v40 = vsel %vm296_vm3, %v533_v39, -inf }
 0x2f8   :  { %v8611_v41 = vpop.f32.mrf.mxu1  ;;  %699 = vmax.xlane.f32.xlu1 %v698_v40  ;;  %v8616_v43 = vpop.f32.mrf.mxu0 }
 0x2fa   :  { %v536_v44 = vpop.f32.mrf.mxu0  ;;  %v582_v46 = vpop.f32.mrf.mxu1 }
 0x2fb   :  { %v701_v47 = vsel %vm296_vm3, %v582_v46, -inf }
 0x2fc   :  { %702 = vmax.xlane.f32.xlu0 %v701_v47  ;;  %v8617_v49 = vpop.f32.mrf.mxu0  ;;  %v8622_v50 = vpop.f32.mrf.mxu1 }
 0x2fe   :  { %v585_v52 = vpop.f32.mrf.mxu1  ;;  %v10073_v53 = vpop.f32.mrf.mxu0 }
 0x2ff   :  { %v704_v54 = vsel %vm296_vm3, %v10073_v53, -inf }
 0x300   :  { %v8623_v55 = vpop.f32.mrf.mxu1  ;;  %705 = vmax.xlane.f32.xlu1 %v704_v54  ;;  %v8628_v57 = vpop.f32.mrf.mxu0 }
 0x302   :  { %v634_v58 = vpop.f32.mrf.mxu0  ;;  %v680_v60 = vpop.f32.mrf.mxu1 }
 0x303   :  { %v707_v63 = vsel %vm296_vm3, %v680_v60, -inf }
 0x304   :  { %708 = vmax.xlane.f32.xlu0 %v707_v63  ;;  %v8629_v0 = vpop.f32.mrf.mxu0  ;;  %v8634_v1 = vpop.f32.mrf.mxu1 }
 0x306   :  { %v683_v2 = vpop.f32.mrf.mxu1 }
 0x307   :  { %v885_v2 = vsel %vm787_vm4, %v10082_v4, 0 }
 0x308   :  { %v8635_v3 = vpop.f32.mrf.mxu1 }
 0x311   :  { %1023 = vrot.lane.b32.xlu1 %v9997_v61, %s9862_s14 }
 0x31a   :  { %975 = vrot.lane.b32.xlu0 %v9991_v56, %s9862_s14 }
 0x371   :  { %v688_v6 = vpop.xlane.xlu0 %687 }
 0x372   :  { %v710_v7 = vsub.f32 %v337_v19, %v688_v6 }
 0x374   :  { %v718_v8 = vmul.f32 1.442695, %v710_v7 }
 0x375   :  { %v691_v9 = vpop.xlane.xlu1 %690 }
 0x376   :  { %9558 = vpow2.f32 %v718_v8  ;;  %v711_v10 = vsub.f32 %v386_v23, %v691_v9  ;;  %v933_v9 = vsel %vm787_vm4, %v10084_v5, 0 }
 0x378   :  { %v720_v11 = vmul.f32 1.442695, %v711_v10 }
 0x379   :  { %v694_v12 = vpop.xlane.xlu0 %693 }
 0x37a   :  { %9560 = vpow2.f32 %v720_v11  ;;  %v712_v13 = vsub.f32 %v435_v28, %v694_v12 }
 0x37c   :  { %v722_v14 = vmul.f32 1.442695, %v712_v13 }
 0x37d   :  { %v697_v15 = vpop.xlane.xlu0 %696 }
 0x37e   :  { %9562 = vpow2.f32 %v722_v14  ;;  %v713_v16 = vsub.f32 %v484_v33, %v697_v15 }
 0x380   :  { %v724_v17 = vmul.f32 1.442695, %v713_v16 }
 0x381   :  { %v700_v18 = vpop.xlane.xlu1 %699 }
 0x382   :  { %9564 = vpow2.f32 %v724_v17  ;;  %v714_v20 = vsub.f32 %v533_v39, %v700_v18 }
 0x383   :  { %v10086_v21 = vpop.eup %9558 }
 0x384   :  { %v726_v22 = vmul.f32 1.442695, %v714_v20  ;;  %v734_v19 = vsel %vm296_vm3, %v10086_v21, 0.0 }
 0x385   :  { %735 = vadd.xlane.f32.xlu1 %v734_v19  ;;  %v703_v23 = vpop.xlane.xlu0 %702 }
 0x386   :  { %9566 = vpow2.f32 %v726_v22  ;;  %v715_v24 = vsub.f32 %v582_v46, %v703_v23 }
 0x387   :  { %v10090_v25 = vpop.eup %9560 }
 0x388   :  { %v728_v26 = vmul.f32 1.442695, %v715_v24  ;;  %v737_v27 = vsel %vm296_vm3, %v10090_v25, 0.0 }
 0x389   :  { %738 = vadd.xlane.f32.xlu0 %v737_v27  ;;  %v706_v36 = vpop.xlane.xlu1 %705 }
 0x38a   :  { %9568 = vpow2.f32 %v728_v26  ;;  %v716_v38 = vsub.f32 %v10073_v53, %v706_v36 }
 0x38b   :  { %v10094_v28 = vpop.eup %9562 }
 0x38c   :  { %v740_v29 = vsel %vm296_vm3, %v10094_v28, 0.0  ;;  %v730_v40 = vmul.f32 1.442695, %v716_v38 }
 0x38d   :  { %741 = vadd.xlane.f32.xlu1 %v740_v29  ;;  %v709_v39 = vpop.xlane.xlu0 %708  ;;  %v1024_v50 = vpop.permute.xlu1 %1023 }
 0x38e   :  { %v717_v41 = vsub.f32 %v680_v60, %v709_v39  ;;  %9570 = vpow2.f32 %v730_v40  ;;  %v1029_v15 = vsel %vm787_vm4, %v1024_v50, 0 }
 0x38f   :  { %v10098_v30 = vpop.eup %9564 }
 0x390   :  { %v743_v31 = vsel %vm296_vm3, %v10098_v30, 0.0  ;;  %v732_v43 = vmul.f32 1.442695, %v717_v41 }
 0x391   :  { %744 = vadd.xlane.f32.xlu0 %v743_v31  ;;  %v976_v52 = vpop.permute.xlu0 %975 }
 0x392   :  { %9572 = vpow2.f32 %v732_v43  ;;  %v981_v12 = vsel %vm787_vm4, %v976_v52, 0 }
 0x393   :  { %v10102_v32 = vpop.eup %9566 }
 0x394   :  { %v746_v33 = vsel %vm296_vm3, %v10102_v32, 0.0 }
 0x395   :  { %747 = vadd.xlane.f32.xlu1 %v746_v33 }
 0x397   :  { %v10106_v34 = vpop.eup %9568 }
 0x398   :  { %v749_v35 = vsel %vm296_vm3, %v10106_v34, 0.0 }
 0x399   :  { %750 = vadd.xlane.f32.xlu0 %v749_v35 }
 0x39b   :  { %v10115_v44 = vpop.eup %9570 }
 0x39c   :  { %v752_v46 = vsel %vm296_vm3, %v10115_v44, 0.0 }
 0x39f   :  { %v10119_v47 = vpop.eup %9572 }
 0x3a0   :  { %v755_v49 = vsel %vm296_vm3, %v10119_v47, 0.0 }
 0x3a6   :  { %1119 = vrot.lane.b32.xlu1 %v10003_v62, %s9862_s14 }
 0x3af   :  { %1071 = vrot.lane.b32.xlu0 %v9995_v59, %s9862_s14 }
 0x3ca   :  { %753 = vadd.xlane.f32.xlu1 %v752_v46 }
 0x3ce   :  { %756 = vadd.xlane.f32.xlu0 %v755_v49 }
 0x3db   :  { %1219 = vrot.lane.b32.xlu1 %v9985_v51, %s9863_s15 }
 0x3df   :  { %1217 = vrot.lane.b32.xlu1 %v9985_v51, %s9864_s16 }
 0x3e3   :  { %1319 = vrot.lane.b32.xlu1 %v9981_v48, %s9863_s15 }
 0x3e4   :  { %1169 = vrot.lane.b32.xlu0 %v9977_v45, %s9863_s15 }
 0x3e7   :  { %1317 = vrot.lane.b32.xlu1 %v9981_v48, %s9864_s16 }
 0x3e8   :  { %1167 = vrot.lane.b32.xlu0 %v9977_v45, %s9864_s16 }
 0x3eb   :  { %1419 = vrot.lane.b32.xlu1 %v9997_v61, %s9863_s15 }
 0x3ec   :  { %1269 = vrot.lane.b32.xlu0 %v9975_v42, %s9863_s15 }
 0x3ef   :  { %1417 = vrot.lane.b32.xlu1 %v9997_v61, %s9864_s16 }
 0x3f0   :  { %1267 = vrot.lane.b32.xlu0 %v9975_v42, %s9864_s16 }
 0x3f3   :  { %1519 = vrot.lane.b32.xlu1 %v10003_v62, %s9863_s15 }
 0x3f4   :  { %1369 = vrot.lane.b32.xlu0 %v9991_v56, %s9863_s15 }
 0x3f7   :  { %1517 = vrot.lane.b32.xlu1 %v10003_v62, %s9864_s16 }
 0x3f8   :  { %1367 = vrot.lane.b32.xlu0 %v9991_v56, %s9864_s16 }
 0x3fb   :  { %1663 = vrot.lane.b32.xlu1 %v9977_v45, %s9865_s17 }
 0x3fc   :  { %1469 = vrot.lane.b32.xlu0 %v9995_v59, %s9863_s15 }
 0x3ff   :  { %1759 = vrot.lane.b32.xlu1 %v9975_v42, %s9865_s17 }
 0x400   :  { %1467 = vrot.lane.b32.xlu0 %v9995_v59, %s9864_s16 }
 0x403   :  { %1807 = vrot.lane.b32.xlu1 %v9981_v48, %s9865_s17 }
 0x404   :  { %1711 = vrot.lane.b32.xlu0 %v9985_v51, %s9865_s17 }
 0x40e   :  { %v736_v53 = vpop.xlane.xlu1 %735 }
 0x40f   :  { %9574 = vrcp.f32 %v736_v53 }
 0x412   :  { %v739_v54 = vpop.xlane.xlu0 %738 }
 0x413   :  { %9576 = vrcp.f32 %v739_v54 }
 0x416   :  { %v742_v55 = vpop.xlane.xlu1 %741 }
 0x417   :  { %9578 = vrcp.f32 %v742_v55 }
 0x41a   :  { %v745_v57 = vpop.xlane.xlu0 %744 }
 0x41b   :  { %9580 = vrcp.f32 %v745_v57 }
 0x41c   :  { %v9575_v58 = vpop.eup %9574 }
 0x41d   :  { %v766_v60 = vmul.f32 %v9575_v58, %v10086_v21 }
 0x41e   :  { %v748_v63 = vpop.xlane.xlu1 %747 }
 0x41f   :  { %9582 = vrcp.f32 %v748_v63  ;;  %v774_v0 = vpack.c.bf16 %v766_v60, %v766_v60 }
 0x420   :  { %v9577_v1 = vpop.eup %9576 }
 0x421   :  { %8639 = vmatmul.mubr.msk.bf16.vlgmr.msra.gmra.mxu0 %vm296_vm3, %v774_v0  ;;  %v767_v3 = vmul.f32 %v9577_v1, %v10090_v25 }
 0x422   :  { %8649 = vmatpush3.bf16.msra.mxu0 %v885_v2  ;;  %v751_v6 = vpop.xlane.xlu0 %750  ;;  %8650 = vmatprep.mubr.msk.bf16.mxu0 %vm9860_vm2, %v9859_v37  ;;  %v1120_v19 = vpop.permute.xlu1 %1119 }
 0x423   :  { %9584 = vrcp.f32 %v751_v6  ;;  %v775_v7 = vpack.c.bf16 %v767_v3, %v767_v3  ;;  %8660 = vmatprep.subr.bf16.mxu0 %v9859_v37  ;;  %v1125_v24 = vsel %vm787_vm4, %v1120_v19, 0 }
 0x424   :  { %v9579_v8 = vpop.eup %9578 }
 0x425   :  { %8645 = vmatmul.mubr.msk.bf16.vlgmr.msra.gmra.mxu1 %vm296_vm3, %v775_v7  ;;  %v768_v4 = vmul.f32 %v9579_v8, %v10094_v28 }
 0x426   :  { %8655 = vmatpush3.bf16.msra.mxu1 %v933_v9  ;;  %8656 = vmatprep.mubr.msk.bf16.mxu1 %vm9860_vm2, %v9859_v37  ;;  %v1072_v17 = vpop.permute.xlu0 %1071 }
 0x427   :  { %v776_v10 = vpack.c.bf16 %v768_v4, %v768_v4  ;;  %8666 = vmatprep.subr.bf16.mxu1 %v9859_v37  ;;  %v1077_v21 = vsel %vm787_vm4, %v1072_v17, 0 }
 0x428   :  { %v9581_v11 = vpop.eup %9580 }
 0x429   :  { %8651 = vmatmul.mubr.msk.bf16.vlgmr.msra.gmra.mxu0 %vm296_vm3, %v776_v10  ;;  %v769_v13 = vmul.f32 %v9581_v11, %v10098_v30 }
 0x42a   :  { %8661 = vmatpush3.bf16.msra.mxu0 %v981_v12  ;;  %8662 = vmatprep.mubr.msk.bf16.mxu0 %vm9860_vm2, %v9859_v37 }
 0x42b   :  { %v777_v5 = vpack.c.bf16 %v769_v13, %v769_v13  ;;  %8672 = vmatprep.subr.bf16.mxu0 %v9859_v37 }
 0x42c   :  { %v9583_v14 = vpop.eup %9582 }
 0x42d   :  { %8657 = vmatmul.mubr.msk.bf16.vlgmr.msra.gmra.mxu1 %vm296_vm3, %v777_v5  ;;  %v770_v16 = vmul.f32 %v9583_v14, %v10102_v32 }
 0x42e   :  { %8667 = vmatpush3.bf16.msra.mxu1 %v1029_v15  ;;  %8668 = vmatprep.mubr.msk.bf16.mxu1 %vm9860_vm2, %v9859_v37 }
 0x42f   :  { %v778_v18 = vpack.c.bf16 %v770_v16, %v770_v16  ;;  %8678 = vmatprep.subr.bf16.mxu1 %v9859_v37 }
 0x430   :  { %v9585_v20 = vpop.eup %9584 }
 0x431   :  { %8663 = vmatmul.mubr.msk.bf16.vlgmr.msra.gmra.mxu0 %vm296_vm3, %v778_v18  ;;  %v771_v22 = vmul.f32 %v9585_v20, %v10106_v34 }
 0x432   :  { %8673 = vmatpush3.bf16.msra.mxu0 %v1077_v21  ;;  %8674 = vmatprep.mubr.msk.bf16.mxu0 %vm9860_vm2, %v9859_v37 }
 0x433   :  { %v779_v23 = vpack.c.bf16 %v771_v22, %v771_v22  ;;  %8684 = vmatprep.subr.bf16.mxu0 %v9859_v37 }
 0x435   :  { %8669 = vmatmul.mubr.msk.bf16.vlgmr.msra.gmra.mxu1 %vm296_vm3, %v779_v23 }
 0x436   :  { %8679 = vmatpush3.bf16.msra.mxu1 %v1125_v24  ;;  %8680 = vmatprep.mubr.msk.bf16.mxu1 %vm9860_vm2, %v9859_v37 }
 0x437   :  { %8690 = vmatprep.subr.bf16.mxu1 %v9859_v37 }
 0x453   :  { %v754_v25 = vpop.xlane.xlu1 %753 }
 0x454   :  { %9586 = vrcp.f32 %v754_v25 }
 0x457   :  { %v1220_v26 = vpop.permute.xlu1 %1219  ;;  %v757_v27 = vpop.xlane.xlu0 %756 }
 0x458   :  { %9588 = vrcp.f32 %v757_v27 }
 0x45b   :  { %v1218_v28 = vpop.permute.xlu1 %1217  ;;  %v1170_v29 = vpop.permute.xlu0 %1169 }
 0x45c   :  { %v1175_v39 = vsel %vm296_vm3, %v1170_v29, 0 }
 0x45f   :  { %v1320_v30 = vpop.permute.xlu1 %1319  ;;  %v1168_v31 = vpop.permute.xlu0 %1167 }
 0x460   :  { %v1325_v52 = vsel %vm296_vm3, %v1320_v30, 0 }
 0x461   :  { %v9587_v32 = vpop.eup %9586 }
 0x462   :  { %v772_v33 = vmul.f32 %v9587_v32, %v10115_v44  ;;  %v1225_v44 = vsel %vm296_vm3, %v1220_v26, 0 }
 0x463   :  { %v1270_v34 = vpop.permute.xlu0 %1269  ;;  %v1318_v38 = vpop.permute.xlu1 %1317 }
 0x464   :  { %v780_v35 = vpack.c.bf16 %v772_v33, %v772_v33 }
 0x465   :  { %v9589_v36 = vpop.eup %9588 }
 0x466   :  { %8675 = vmatmul.mubr.msk.bf16.vlgmr.msra.gmra.mxu0 %vm296_vm3, %v780_v35  ;;  %v773_v40 = vmul.f32 %v9589_v36, %v10119_v47  ;;  %v1275_v47 = vsel %vm296_vm3, %v1270_v34, 0 }
 0x467   :  { %8685 = vmatpush3.bf16.xpose.msra.mxu0 %v1175_v39  ;;  %8686 = vmatprep.mubr.msk.bf16.mxu0 %vm9860_vm2, %v9859_v37  ;;  %v1268_v43 = vpop.permute.xlu0 %1267  ;;  %v1420_v46 = vpop.permute.xlu1 %1419 }
 0x468   :  { %v781_v41 = vpack.c.bf16 %v773_v40, %v773_v40  ;;  %8696 = vmatprep.subr.bf16.mxu0 %v9859_v37  ;;  %v1425_v57 = vsel %vm296_vm3, %v1420_v46, 0 }
 0x46a   :  { %8681 = vmatmul.mubr.msk.bf16.vlgmr.msra.gmra.mxu1 %vm296_vm3, %v781_v41 }
 0x46b   :  { %8691 = vmatpush3.bf16.xpose.msra.mxu1 %v1225_v44  ;;  %8692 = vmatprep.mubr.msk.bf16.mxu1 %vm9860_vm2, %v9859_v37  ;;  %v1370_v49 = vpop.permute.xlu0 %1369  ;;  %v1418_v50 = vpop.permute.xlu1 %1417 }
 0x46c   :  { %8702 = vmatprep.subr.bf16.mxu1 %v9859_v37  ;;  %v1375_v54 = vsel %vm296_vm3, %v1370_v49, 0 }
 0x46e   :  { %8687 = vmatmul.mubr.msk.bf16.vlgmr.msra.gmra.mxu0 %vm296_vm3, %v1168_v31 }
 0x46f   :  { %8697 = vmatpush3.bf16.xpose.msra.mxu0 %v1275_v47  ;;  %8698 = vmatprep.mubr.msk.bf16.mxu0 %vm9860_vm2, %v9859_v37  ;;  %v1368_v53 = vpop.permute.xlu0 %1367  ;;  %v1520_v55 = vpop.permute.xlu1 %1519 }
 0x470   :  { %8708 = vmatprep.subr.bf16.mxu0 %v9859_v37  ;;  %v1525_v1 = vsel %vm296_vm3, %v1520_v55, 0 }
 0x472   :  { %8693 = vmatmul.mubr.msk.bf16.vlgmr.msra.gmra.mxu1 %vm296_vm3, %v1218_v28 }
 0x473   :  { %8703 = vmatpush3.bf16.xpose.msra.mxu1 %v1325_v52  ;;  %8704 = vmatprep.mubr.msk.bf16.mxu1 %vm9860_vm2, %v9859_v37  ;;  %v1470_v58 = vpop.permute.xlu0 %1469  ;;  %v1518_v60 = vpop.permute.xlu1 %1517 }
 0x474   :  { %8714 = vmatprep.subr.bf16.mxu1 %v9859_v37  ;;  %v1475_v63 = vsel %vm296_vm3, %v1470_v58, 0 }
 0x476   :  { %8699 = vmatmul.mubr.msk.bf16.vlgmr.msra.gmra.mxu0 %vm296_vm3, %v1268_v43 }
 0x477   :  { %8709 = vmatpush3.bf16.xpose.msra.mxu0 %v1375_v54  ;;  %8710 = vmatprep.mubr.msk.bf16.mxu0 %vm9860_vm2, %v9859_v37  ;;  %v1468_v0 = vpop.permute.xlu0 %1467  ;;  %v1664_v2 = vpop.permute.xlu1 %1663 }
 0x478   :  { %8720 = vmatprep.subr.bf16.mxu0 %v9859_v37  ;;  %v1669_v3 = vsel %vm787_vm4, %v1664_v2, 0 }
 0x47a   :  { %8705 = vmatmul.mubr.msk.bf16.vlgmr.msra.gmra.mxu1 %vm296_vm3, %v1318_v38 }
 0x47b   :  { %8715 = vmatpush3.bf16.xpose.msra.mxu1 %v1425_v57  ;;  %8716 = vmatprep.mubr.msk.bf16.mxu1 %vm9860_vm2, %v9859_v37  ;;  %v1712_v6 = vpop.permute.xlu0 %1711 }
 0x47c   :  { %8726 = vmatprep.subr.bf16.mxu1 %v9859_v37  ;;  %v1717_v7 = vsel %vm787_vm4, %v1712_v6, 0 }
 0x47e   :  { %8711 = vmatmul.mubr.msk.bf16.vlgmr.msra.gmra.mxu0 %vm296_vm3, %v1368_v53 }
 0x47f   :  { %8721 = vmatpush3.bf16.xpose.msra.mxu0 %v1475_v63  ;;  %8722 = vmatprep.mubr.msk.bf16.mxu0 %vm9860_vm2, %v9859_v37 }
 0x480   :  { %8732 = vmatprep.subr.bf16.mxu0 %v9859_v37 }
 0x482   :  { %8717 = vmatmul.mubr.msk.bf16.vlgmr.msra.gmra.mxu1 %vm296_vm3, %v1418_v50 }
 0x483   :  { %8727 = vmatpush3.bf16.xpose.msra.mxu1 %v1525_v1  ;;  %8728 = vmatprep.mubr.msk.bf16.mxu1 %vm9860_vm2, %v9859_v37 }
 0x484   :  { %8738 = vmatprep.subr.bf16.mxu1 %v9859_v37 }
 0x486   :  { %8723 = vmatmul.mubr.msk.bf16.vlgmr.msra.gmra.mxu0 %vm296_vm3, %v1468_v0 }
 0x487   :  { %8733 = vmatpush3.bf16.msra.mxu0 %v1669_v3  ;;  %8734 = vmatprep.mubr.msk.bf16.mxu0 %vm9860_vm2, %v9859_v37 }
 0x488   :  { %8744 = vmatprep.subr.bf16.mxu0 %v9859_v37 }
 0x48a   :  { %8729 = vmatmul.mubr.msk.bf16.vlgmr.msra.gmra.mxu1 %vm296_vm3, %v1518_v60 }
 0x48b   :  { %8739 = vmatpush3.bf16.msra.mxu1 %v1717_v7  ;;  %8740 = vmatprep.mubr.msk.bf16.mxu1 %vm9860_vm2, %v9859_v37 }
 0x48c   :  { %8750 = vmatprep.subr.bf16.mxu1 %v9859_v37 }
 0x4e1   :  { %v10253_v8 = vpop.f32.mrf.mxu0 }
 0x4e3   :  { %v8640_v9 = vpop.f32.mrf.mxu0 }
 0x4e5   :  { %v828_v4 = vpop.f32.mrf.mxu0  ;;  %v10255_v10 = vpop.f32.mrf.mxu1 }
 0x4e7   :  { %v8641_v11 = vpop.f32.mrf.mxu0  ;;  %v8646_v12 = vpop.f32.mrf.mxu1 }
 0x4e9   :  { %v876_v13 = vpop.f32.mrf.mxu1  ;;  %v10257_v5 = vpop.f32.mrf.mxu0 }
 0x4eb   :  { %v8647_v14 = vpop.f32.mrf.mxu1  ;;  %v8652_v15 = vpop.f32.mrf.mxu0 }
 0x4ed   :  { %v924_v16 = vpop.f32.mrf.mxu0  ;;  %v10259_v17 = vpop.f32.mrf.mxu1 }
 0x4ef   :  { %v8653_v18 = vpop.f32.mrf.mxu0  ;;  %v8658_v20 = vpop.f32.mrf.mxu1 }
 0x4f1   :  { %v972_v21 = vpop.f32.mrf.mxu1  ;;  %v10261_v22 = vpop.f32.mrf.mxu0 }
 0x4f3   :  { %v8659_v19 = vpop.f32.mrf.mxu1  ;;  %v8664_v23 = vpop.f32.mrf.mxu0 }
 0x4f5   :  { %v1020_v24 = vpop.f32.mrf.mxu0  ;;  %v10263_v25 = vpop.f32.mrf.mxu1 }
 0x4f7   :  { %v8665_v26 = vpop.f32.mrf.mxu0  ;;  %v8670_v27 = vpop.f32.mrf.mxu1 }
 0x4f9   :  { %v1068_v28 = vpop.f32.mrf.mxu1 }
 0x4fb   :  { %v8671_v29 = vpop.f32.mrf.mxu1 }
 0x4fc   :  { %v10284_v29 = vpop.permute.xlu1 %1759 }
 0x526   :  { %v10265_v30 = vpop.f32.mrf.mxu0 }
 0x528   :  { %v8676_v31 = vpop.f32.mrf.mxu0 }
 0x529   :  { %v10286_v31 = vpop.permute.xlu1 %1807 }
 0x52a   :  { %v1116_v32 = vpop.f32.mrf.mxu0  ;;  %v10267_v33 = vpop.f32.mrf.mxu1 }
 0x52c   :  { %v8677_v34 = vpop.f32.mrf.mxu0  ;;  %v8682_v35 = vpop.f32.mrf.mxu1 }
 0x52e   :  { %v1164_v36 = vpop.f32.mrf.mxu1  ;;  %v1211_v38 = vpop.f32.mrf.mxu0 }
 0x52f   :  { %v1567_v39 = vsel %vm296_vm3, %v1211_v38, -inf }
 0x530   :  { %v8683_v40 = vpop.f32.mrf.mxu1  ;;  %1568 = vmax.xlane.f32.xlu0 %v1567_v39  ;;  %v8688_v41 = vpop.f32.mrf.mxu0 }
 0x532   :  { %v1214_v43 = vpop.f32.mrf.mxu0  ;;  %v1261_v44 = vpop.f32.mrf.mxu1 }
 0x533   :  { %v1570_v46 = vsel %vm296_vm3, %v1261_v44, -inf }
 0x534   :  { %1571 = vmax.xlane.f32.xlu1 %v1570_v46  ;;  %v8689_v47 = vpop.f32.mrf.mxu0  ;;  %v8694_v49 = vpop.f32.mrf.mxu1 }
 0x536   :  { %v1264_v50 = vpop.f32.mrf.mxu1  ;;  %v1311_v52 = vpop.f32.mrf.mxu0 }
 0x537   :  { %v1573_v53 = vsel %vm296_vm3, %v1311_v52, -inf }
 0x538   :  { %v8695_v54 = vpop.f32.mrf.mxu1  ;;  %1574 = vmax.xlane.f32.xlu0 %v1573_v53  ;;  %v8700_v55 = vpop.f32.mrf.mxu0 }
 0x53a   :  { %v1314_v57 = vpop.f32.mrf.mxu0  ;;  %v1361_v58 = vpop.f32.mrf.mxu1 }
 0x53b   :  { %v1576_v60 = vsel %vm296_vm3, %v1361_v58, -inf }
 0x53c   :  { %v8706_v63 = vpop.f32.mrf.mxu1  ;;  %1577 = vmax.xlane.f32.xlu0 %v1576_v60  ;;  %v8701_v0 = vpop.f32.mrf.mxu0 }
 0x53e   :  { %v1364_v1 = vpop.f32.mrf.mxu1  ;;  %v1411_v2 = vpop.f32.mrf.mxu0 }
 0x53f   :  { %v1579_v3 = vsel %vm296_vm3, %v1411_v2, -inf }
 0x540   :  { %v8707_v6 = vpop.f32.mrf.mxu1  ;;  %1580 = vmax.xlane.f32.xlu1 %v1579_v3  ;;  %v8712_v7 = vpop.f32.mrf.mxu0 }
 0x542   :  { %v1414_v9 = vpop.f32.mrf.mxu0  ;;  %v1461_v4 = vpop.f32.mrf.mxu1 }
 0x543   :  { %v1582_v11 = vsel %vm296_vm3, %v1461_v4, -inf }
 0x544   :  { %v8718_v12 = vpop.f32.mrf.mxu1  ;;  %1583 = vmax.xlane.f32.xlu0 %v1582_v11  ;;  %v8713_v13 = vpop.f32.mrf.mxu0 }
 0x546   :  { %v1464_v14 = vpop.f32.mrf.mxu1  ;;  %v10275_v15 = vpop.f32.mrf.mxu0 }
 0x547   :  { %v1585_v16 = vsel %vm296_vm3, %v10275_v15, -inf }
 0x548   :  { %v8719_v18 = vpop.f32.mrf.mxu1  ;;  %1586 = vmax.xlane.f32.xlu1 %v1585_v16  ;;  %v8724_v20 = vpop.f32.mrf.mxu0 }
 0x54a   :  { %v1514_v21 = vpop.f32.mrf.mxu0  ;;  %v1561_v19 = vpop.f32.mrf.mxu1 }
 0x54b   :  { %v1588_v23 = vsel %vm296_vm3, %v1561_v19, -inf }
 0x54c   :  { %v8730_v24 = vpop.f32.mrf.mxu1  ;;  %1589 = vmax.xlane.f32.xlu0 %v1588_v23  ;;  %v8725_v26 = vpop.f32.mrf.mxu0 }
 0x54e   :  { %v1564_v27 = vpop.f32.mrf.mxu1 }
 0x550   :  { %v8731_v28 = vpop.f32.mrf.mxu1 }
 0x559   :  { %1903 = vrot.lane.b32.xlu1 %v9997_v61, %s9865_s17 }
 0x562   :  { %1855 = vrot.lane.b32.xlu0 %v9991_v56, %s9865_s17 }
 0x5b9   :  { %v1569_v32 = vpop.xlane.xlu0 %1568 }
 0x5ba   :  { %v1591_v34 = vsub.f32 %v1211_v38, %v1569_v32 }
 0x5bc   :  { %v1599_v35 = vmul.f32 1.442695, %v1591_v34 }
 0x5bd   :  { %v1572_v36 = vpop.xlane.xlu1 %1571 }
 0x5be   :  { %9590 = vpow2.f32 %v1599_v35  ;;  %v1592_v39 = vsub.f32 %v1261_v44, %v1572_v36 }
 0x5c0   :  { %v1601_v40 = vmul.f32 1.442695, %v1592_v39 }
 0x5c1   :  { %v1575_v41 = vpop.xlane.xlu0 %1574 }
 0x5c2   :  { %9592 = vpow2.f32 %v1601_v40  ;;  %v1593_v43 = vsub.f32 %v1311_v52, %v1575_v41  ;;  %v1765_v41 = vsel %vm787_vm4, %v10284_v29, 0 }
 0x5c4   :  { %v1603_v46 = vmul.f32 1.442695, %v1593_v43 }
 0x5c5   :  { %v1578_v47 = vpop.xlane.xlu0 %1577 }
 0x5c6   :  { %9594 = vpow2.f32 %v1603_v46  ;;  %v1594_v49 = vsub.f32 %v1361_v58, %v1578_v47 }
 0x5c8   :  { %v1605_v50 = vmul.f32 1.442695, %v1594_v49 }
 0x5c9   :  { %v1581_v53 = vpop.xlane.xlu1 %1580 }
 0x5ca   :  { %9596 = vpow2.f32 %v1605_v50  ;;  %v1595_v54 = vsub.f32 %v1411_v2, %v1581_v53  ;;  %v1813_v50 = vsel %vm787_vm4, %v10286_v31, 0 }
 0x5cb   :  { %v10288_v55 = vpop.eup %9590 }
 0x5cc   :  { %v1607_v57 = vmul.f32 1.442695, %v1595_v54  ;;  %v1615_v38 = vsel %vm296_vm3, %v10288_v55, 0.0 }
 0x5cd   :  { %1616 = vadd.xlane.f32.xlu1 %v1615_v38  ;;  %v1584_v44 = vpop.xlane.xlu0 %1583 }
 0x5ce   :  { %9598 = vpow2.f32 %v1607_v57  ;;  %v1596_v60 = vsub.f32 %v1461_v4, %v1584_v44 }
 0x5cf   :  { %v10292_v63 = vpop.eup %9592 }
 0x5d0   :  { %v1609_v52 = vmul.f32 1.442695, %v1596_v60  ;;  %v1618_v58 = vsel %vm296_vm3, %v10292_v63, 0.0 }
 0x5d1   :  { %1619 = vadd.xlane.f32.xlu0 %v1618_v58  ;;  %v1587_v11 = vpop.xlane.xlu1 %1586 }
 0x5d2   :  { %9600 = vpow2.f32 %v1609_v52  ;;  %v1597_v12 = vsub.f32 %v10275_v15, %v1587_v11 }
 0x5d3   :  { %v10296_v0 = vpop.eup %9594 }
 0x5d4   :  { %v1621_v1 = vsel %vm296_vm3, %v10296_v0, 0.0  ;;  %v1611_v14 = vmul.f32 1.442695, %v1597_v12 }
 0x5d5   :  { %1622 = vadd.xlane.f32.xlu1 %v1621_v1  ;;  %v1590_v13 = vpop.xlane.xlu0 %1589  ;;  %v1904_v15 = vpop.permute.xlu1 %1903 }
 0x5d6   :  { %v1598_v16 = vsub.f32 %v1561_v19, %v1590_v13  ;;  %9602 = vpow2.f32 %v1611_v14  ;;  %v1909_v44 = vsel %vm787_vm4, %v1904_v15, 0 }
 0x5d7   :  { %v10300_v2 = vpop.eup %9596 }
 0x5d8   :  { %v1624_v3 = vsel %vm296_vm3, %v10300_v2, 0.0  ;;  %v1613_v18 = vmul.f32 1.442695, %v1598_v16 }
 0x5d9   :  { %1625 = vadd.xlane.f32.xlu0 %v1624_v3  ;;  %v1856_v19 = vpop.permute.xlu0 %1855 }
 0x5da   :  { %9604 = vpow2.f32 %v1613_v18 }
 0x5db   :  { %v10304_v6 = vpop.eup %9598 }
 0x5dc   :  { %v1627_v7 = vsel %vm296_vm3, %v10304_v6, 0.0 }
 0x5dd   :  { %1628 = vadd.xlane.f32.xlu1 %v1627_v7 }
 0x5df   :  { %v10308_v9 = vpop.eup %9600 }
 0x5e0   :  { %v1630_v4 = vsel %vm296_vm3, %v10308_v9, 0.0 }
 0x5e1   :  { %1631 = vadd.xlane.f32.xlu0 %v1630_v4 }
 0x5e3   :  { %v10317_v20 = vpop.eup %9602 }
 0x5e4   :  { %v1633_v21 = vsel %vm296_vm3, %v10317_v20, 0.0 }
 0x5e7   :  { %v10321_v23 = vpop.eup %9604 }
 0x5e8   :  { %v1636_v24 = vsel %vm296_vm3, %v10321_v23, 0.0 }
 0x5ee   :  { %1999 = vrot.lane.b32.xlu1 %v10003_v62, %s9865_s17 }
 0x5f7   :  { %1951 = vrot.lane.b32.xlu0 %v9995_v59, %s9865_s17 }
 0x612   :  { %1634 = vadd.xlane.f32.xlu1 %v1633_v21 }
 0x616   :  { %1637 = vadd.xlane.f32.xlu0 %v1636_v24 }
 0x623   :  { %2099 = vrot.lane.b32.xlu1 %v9985_v51, %s9866_s18 }
 0x627   :  { %2097 = vrot.lane.b32.xlu1 %v9985_v51, %s9867_s19 }
 0x62b   :  { %2199 = vrot.lane.b32.xlu1 %v9981_v48, %s9866_s18 }
 0x62c   :  { %2049 = vrot.lane.b32.xlu0 %v9977_v45, %s9866_s18 }
 0x62f   :  { %2197 = vrot.lane.b32.xlu1 %v9981_v48, %s9867_s19 }
 0x630   :  { %2047 = vrot.lane.b32.xlu0 %v9977_v45, %s9867_s19 }
 0x633   :  { %2299 = vrot.lane.b32.xlu1 %v9997_v61, %s9866_s18 }
 0x634   :  { %2149 = vrot.lane.b32.xlu0 %v9975_v42, %s9866_s18 }
 0x637   :  { %2297 = vrot.lane.b32.xlu1 %v9997_v61, %s9867_s19 }
 0x638   :  { %2147 = vrot.lane.b32.xlu0 %v9975_v42, %s9867_s19 }
 0x63b   :  { %2399 = vrot.lane.b32.xlu1 %v10003_v62, %s9866_s18 }
 0x63c   :  { %2249 = vrot.lane.b32.xlu0 %v9991_v56, %s9866_s18 }
 0x63f   :  { %2397 = vrot.lane.b32.xlu1 %v10003_v62, %s9867_s19 }
 0x640   :  { %2247 = vrot.lane.b32.xlu0 %v9991_v56, %s9867_s19 }
 0x643   :  { %2543 = vrot.lane.b32.xlu1 %v9977_v45, %s9868_s20 }
 0x644   :  { %2349 = vrot.lane.b32.xlu0 %v9995_v59, %s9866_s18 }
 0x647   :  { %2639 = vrot.lane.b32.xlu1 %v9975_v42, %s9868_s20 }
 0x648   :  { %2347 = vrot.lane.b32.xlu0 %v9995_v59, %s9867_s19 }
 0x64b   :  { %2687 = vrot.lane.b32.xlu1 %v9981_v48, %s9868_s20 }
 0x64c   :  { %2591 = vrot.lane.b32.xlu0 %v9985_v51, %s9868_s20 }
 0x656   :  { %v1617_v26 = vpop.xlane.xlu1 %1616 }
 0x657   :  { %9606 = vrcp.f32 %v1617_v26 }
 0x65a   :  { %v1620_v27 = vpop.xlane.xlu0 %1619 }
 0x65b   :  { %9608 = vrcp.f32 %v1620_v27 }
 0x65e   :  { %v1623_v28 = vpop.xlane.xlu1 %1622 }
 0x65f   :  { %9610 = vrcp.f32 %v1623_v28 }
 0x662   :  { %v1626_v32 = vpop.xlane.xlu0 %1625 }
 0x663   :  { %9612 = vrcp.f32 %v1626_v32 }
 0x664   :  { %v9607_v34 = vpop.eup %9606 }
 0x665   :  { %v1647_v35 = vmul.f32 %v9607_v34, %v10288_v55  ;;  %v1861_v55 = vsel %vm787_vm4, %v1856_v19, 0 }
 0x666   :  { %v1629_v36 = vpop.xlane.xlu1 %1628 }
 0x667   :  { %9614 = vrcp.f32 %v1629_v36  ;;  %v1655_v39 = vpack.c.bf16 %v1647_v35, %v1647_v35 }
 0x668   :  { %v9609_v40 = vpop.eup %9608 }
 0x669   :  { %8735 = vmatmul.mubr.msk.bf16.vlgmr.msra.gmra.mxu0 %vm296_vm3, %v1655_v39  ;;  %v1648_v43 = vmul.f32 %v9609_v40, %v10292_v63 }
 0x66a   :  { %8745 = vmatpush3.bf16.msra.mxu0 %v1765_v41  ;;  %v1632_v46 = vpop.xlane.xlu0 %1631  ;;  %8746 = vmatprep.mubr.msk.bf16.mxu0 %vm9860_vm2, %v9859_v37 }
 0x66b   :  { %9616 = vrcp.f32 %v1632_v46  ;;  %v1656_v47 = vpack.c.bf16 %v1648_v43, %v1648_v43  ;;  %8756 = vmatprep.subr.bf16.mxu0 %v9859_v37 }
 0x66c   :  { %v9611_v49 = vpop.eup %9610 }
 0x66d   :  { %8741 = vmatmul.mubr.msk.bf16.vlgmr.msra.gmra.mxu1 %vm296_vm3, %v1656_v47  ;;  %v1649_v29 = vmul.f32 %v9611_v49, %v10296_v0 }
 0x66e   :  { %8751 = vmatpush3.bf16.msra.mxu1 %v1813_v50  ;;  %8752 = vmatprep.mubr.msk.bf16.mxu1 %vm9860_vm2, %v9859_v37  ;;  %v1952_v63 = vpop.permute.xlu0 %1951 }
 0x66f   :  { %v1657_v53 = vpack.c.bf16 %v1649_v29, %v1649_v29  ;;  %8762 = vmatprep.subr.bf16.mxu1 %v9859_v37  ;;  %v1957_v0 = vsel %vm787_vm4, %v1952_v63, 0 }
 0x670   :  { %v9613_v54 = vpop.eup %9612 }
 0x671   :  { %8747 = vmatmul.mubr.msk.bf16.vlgmr.msra.gmra.mxu0 %vm296_vm3, %v1657_v53  ;;  %v1650_v57 = vmul.f32 %v9613_v54, %v10300_v2  ;;  %v2000_v2 = vpop.permute.xlu1 %1999 }
 0x672   :  { %8757 = vmatpush3.bf16.msra.mxu0 %v1861_v55  ;;  %8758 = vmatprep.mubr.msk.bf16.mxu0 %vm9860_vm2, %v9859_v37 }
 0x673   :  { %v1658_v31 = vpack.c.bf16 %v1650_v57, %v1650_v57  ;;  %8768 = vmatprep.subr.bf16.mxu0 %v9859_v37 }
 0x674   :  { %v9615_v38 = vpop.eup %9614 }
 0x675   :  { %8753 = vmatmul.mubr.msk.bf16.vlgmr.msra.gmra.mxu1 %vm296_vm3, %v1658_v31  ;;  %v1651_v60 = vmul.f32 %v9615_v38, %v10304_v6  ;;  %v2005_v6 = vsel %vm787_vm4, %v2000_v2, 0 }
 0x676   :  { %8763 = vmatpush3.bf16.msra.mxu1 %v1909_v44  ;;  %8764 = vmatprep.mubr.msk.bf16.mxu1 %vm9860_vm2, %v9859_v37 }
 0x677   :  { %v1659_v52 = vpack.c.bf16 %v1651_v60, %v1651_v60  ;;  %8774 = vmatprep.subr.bf16.mxu1 %v9859_v37 }
 0x678   :  { %v9617_v58 = vpop.eup %9616 }
 0x679   :  { %8759 = vmatmul.mubr.msk.bf16.vlgmr.msra.gmra.mxu0 %vm296_vm3, %v1659_v52  ;;  %v1652_v1 = vmul.f32 %v9617_v58, %v10308_v9 }
 0x67a   :  { %8769 = vmatpush3.bf16.msra.mxu0 %v1957_v0  ;;  %8770 = vmatprep.mubr.msk.bf16.mxu0 %vm9860_vm2, %v9859_v37 }
 0x67b   :  { %v1660_v3 = vpack.c.bf16 %v1652_v1, %v1652_v1  ;;  %8780 = vmatprep.subr.bf16.mxu0 %v9859_v37 }
 0x67d   :  { %8765 = vmatmul.mubr.msk.bf16.vlgmr.msra.gmra.mxu1 %vm296_vm3, %v1660_v3 }
 0x67e   :  { %8775 = vmatpush3.bf16.msra.mxu1 %v2005_v6  ;;  %8776 = vmatprep.mubr.msk.bf16.mxu1 %vm9860_vm2, %v9859_v37 }
 0x67f   :  { %8786 = vmatprep.subr.bf16.mxu1 %v9859_v37 }
 0x69b   :  { %v1635_v7 = vpop.xlane.xlu1 %1634 }
 0x69c   :  { %9618 = vrcp.f32 %v1635_v7 }
 0x69f   :  { %v2100_v9 = vpop.permute.xlu1 %2099  ;;  %v1638_v4 = vpop.xlane.xlu0 %1637 }
 0x6a0   :  { %9620 = vrcp.f32 %v1638_v4 }
 0x6a3   :  { %v2098_v11 = vpop.permute.xlu1 %2097  ;;  %v2050_v12 = vpop.permute.xlu0 %2049 }
 0x6a4   :  { %v2055_v26 = vsel %vm296_vm3, %v2050_v12, 0 }
 0x6a7   :  { %v2200_v13 = vpop.permute.xlu1 %2199  ;;  %v2048_v14 = vpop.permute.xlu0 %2047 }
 0x6a8   :  { %v2205_v39 = vsel %vm296_vm3, %v2200_v13, 0 }
 0x6a9   :  { %v9619_v16 = vpop.eup %9618 }
 0x6aa   :  { %v1653_v18 = vmul.f32 %v9619_v16, %v10317_v20  ;;  %v2105_v20 = vsel %vm296_vm3, %v2100_v9, 0 }
 0x6ab   :  { %v2150_v21 = vpop.permute.xlu0 %2149  ;;  %v2198_v19 = vpop.permute.xlu1 %2197 }
 0x6ac   :  { %v1661_v24 = vpack.c.bf16 %v1653_v18, %v1653_v18 }
 0x6ad   :  { %v9621_v15 = vpop.eup %9620 }
 0x6ae   :  { %8771 = vmatmul.mubr.msk.bf16.vlgmr.msra.gmra.mxu0 %vm296_vm3, %v1661_v24  ;;  %v1654_v27 = vmul.f32 %v9621_v15, %v10321_v23  ;;  %v2155_v23 = vsel %vm296_vm3, %v2150_v21, 0 }
 0x6af   :  { %8781 = vmatpush3.bf16.xpose.msra.mxu0 %v2055_v26  ;;  %8782 = vmatprep.mubr.msk.bf16.mxu0 %vm9860_vm2, %v9859_v37  ;;  %v2148_v32 = vpop.permute.xlu0 %2147  ;;  %v2300_v34 = vpop.permute.xlu1 %2299 }
 0x6b0   :  { %v1662_v28 = vpack.c.bf16 %v1654_v27, %v1654_v27  ;;  %8792 = vmatprep.subr.bf16.mxu0 %v9859_v37  ;;  %v2305_v46 = vsel %vm296_vm3, %v2300_v34, 0 }
 0x6b2   :  { %8777 = vmatmul.mubr.msk.bf16.vlgmr.msra.gmra.mxu1 %vm296_vm3, %v1662_v28 }
 0x6b3   :  { %8787 = vmatpush3.bf16.xpose.msra.mxu1 %v2105_v20  ;;  %8788 = vmatprep.mubr.msk.bf16.mxu1 %vm9860_vm2, %v9859_v37  ;;  %v2250_v35 = vpop.permute.xlu0 %2249  ;;  %v2298_v36 = vpop.permute.xlu1 %2297 }
 0x6b4   :  { %8798 = vmatprep.subr.bf16.mxu1 %v9859_v37  ;;  %v2255_v41 = vsel %vm296_vm3, %v2250_v35, 0 }
 0x6b6   :  { %8783 = vmatmul.mubr.msk.bf16.vlgmr.msra.gmra.mxu0 %vm296_vm3, %v2048_v14 }
 0x6b7   :  { %8793 = vmatpush3.bf16.xpose.msra.mxu0 %v2155_v23  ;;  %8794 = vmatprep.mubr.msk.bf16.mxu0 %vm9860_vm2, %v9859_v37  ;;  %v2248_v40 = vpop.permute.xlu0 %2247  ;;  %v2400_v43 = vpop.permute.xlu1 %2399 }
 0x6b8   :  { %8804 = vmatprep.subr.bf16.mxu0 %v9859_v37  ;;  %v2405_v53 = vsel %vm296_vm3, %v2400_v43, 0 }
 0x6ba   :  { %8789 = vmatmul.mubr.msk.bf16.vlgmr.msra.gmra.mxu1 %vm296_vm3, %v2098_v11 }
 0x6bb   :  { %8799 = vmatpush3.bf16.xpose.msra.mxu1 %v2205_v39  ;;  %8800 = vmatprep.mubr.msk.bf16.mxu1 %vm9860_vm2, %v9859_v37  ;;  %v2350_v47 = vpop.permute.xlu0 %2349  ;;  %v2398_v49 = vpop.permute.xlu1 %2397 }
 0x6bc   :  { %8810 = vmatprep.subr.bf16.mxu1 %v9859_v37  ;;  %v2355_v50 = vsel %vm296_vm3, %v2350_v47, 0 }
 0x6be   :  { %8795 = vmatmul.mubr.msk.bf16.vlgmr.msra.gmra.mxu0 %vm296_vm3, %v2148_v32 }
 0x6bf   :  { %8805 = vmatpush3.bf16.xpose.msra.mxu0 %v2255_v41  ;;  %8806 = vmatprep.mubr.msk.bf16.mxu0 %vm9860_vm2, %v9859_v37  ;;  %v2348_v29 = vpop.permute.xlu0 %2347  ;;  %v2544_v54 = vpop.permute.xlu1 %2543 }
 0x6c0   :  { %8816 = vmatprep.subr.bf16.mxu0 %v9859_v37  ;;  %v2549_v55 = vsel %vm787_vm4, %v2544_v54, 0 }
 0x6c2   :  { %8801 = vmatmul.mubr.msk.bf16.vlgmr.msra.gmra.mxu1 %vm296_vm3, %v2198_v19 }
 0x6c3   :  { %8811 = vmatpush3.bf16.xpose.msra.mxu1 %v2305_v46  ;;  %8812 = vmatprep.mubr.msk.bf16.mxu1 %vm9860_vm2, %v9859_v37  ;;  %v2592_v57 = vpop.permute.xlu0 %2591 }
 0x6c4   :  { %8822 = vmatprep.subr.bf16.mxu1 %v9859_v37  ;;  %v2597_v31 = vsel %vm787_vm4, %v2592_v57, 0 }
 0x6c6   :  { %8807 = vmatmul.mubr.msk.bf16.vlgmr.msra.gmra.mxu0 %vm296_vm3, %v2248_v40 }
 0x6c7   :  { %8817 = vmatpush3.bf16.xpose.msra.mxu0 %v2355_v50  ;;  %8818 = vmatprep.mubr.msk.bf16.mxu0 %vm9860_vm2, %v9859_v37 }
 0x6c8   :  { %8828 = vmatprep.subr.bf16.mxu0 %v9859_v37 }
 0x6ca   :  { %8813 = vmatmul.mubr.msk.bf16.vlgmr.msra.gmra.mxu1 %vm296_vm3, %v2298_v36 }
 0x6cb   :  { %8823 = vmatpush3.bf16.xpose.msra.mxu1 %v2405_v53  ;;  %8824 = vmatprep.mubr.msk.bf16.mxu1 %vm9860_vm2, %v9859_v37 }
 0x6cc   :  { %8834 = vmatprep.subr.bf16.mxu1 %v9859_v37 }
 0x6ce   :  { %8819 = vmatmul.mubr.msk.bf16.vlgmr.msra.gmra.mxu0 %vm296_vm3, %v2348_v29 }
 0x6cf   :  { %8829 = vmatpush3.bf16.msra.mxu0 %v2549_v55  ;;  %8830 = vmatprep.mubr.msk.bf16.mxu0 %vm9860_vm2, %v9859_v37 }
 0x6d0   :  { %8840 = vmatprep.subr.bf16.mxu0 %v9859_v37 }
 0x6d2   :  { %8825 = vmatmul.mubr.msk.bf16.vlgmr.msra.gmra.mxu1 %vm296_vm3, %v2398_v49 }
 0x6d3   :  { %8835 = vmatpush3.bf16.msra.mxu1 %v2597_v31  ;;  %8836 = vmatprep.mubr.msk.bf16.mxu1 %vm9860_vm2, %v9859_v37 }
 0x6d4   :  { %8846 = vmatprep.subr.bf16.mxu1 %v9859_v37 }
 0x729   :  { %v10455_v38 = vpop.f32.mrf.mxu0 }
 0x72b   :  { %v8736_v44 = vpop.f32.mrf.mxu0 }
 0x72d   :  { %v1708_v60 = vpop.f32.mrf.mxu0  ;;  %v10457_v63 = vpop.f32.mrf.mxu1 }
 0x72e   :  { %v9425_v52 = vpack.i.bf16 %v10457_v63, %v10455_v38 }
 0x72f   :  { %v8737_v58 = vpop.f32.mrf.mxu0  ;;  %v8742_v0 = vpop.f32.mrf.mxu1 }
 0x731   :  { %v1756_v1 = vpop.f32.mrf.mxu1  ;;  %v10461_v2 = vpop.f32.mrf.mxu0 }
 0x733   :  { %v8743_v3 = vpop.f32.mrf.mxu1  ;;  %v8748_v6 = vpop.f32.mrf.mxu0 }
 0x735   :  { %v1804_v7 = vpop.f32.mrf.mxu0  ;;  %v10463_v9 = vpop.f32.mrf.mxu1 }
 0x736   :  { %v9430_v4 = vpack.i.bf16 %v10463_v9, %v10461_v2 }
 0x737   :  { %v8749_v11 = vpop.f32.mrf.mxu0  ;;  %v8754_v12 = vpop.f32.mrf.mxu1 }
 0x739   :  { %v1852_v13 = vpop.f32.mrf.mxu1  ;;  %v10467_v14 = vpop.f32.mrf.mxu0 }
 0x73b   :  { %v8755_v16 = vpop.f32.mrf.mxu1  ;;  %v8760_v18 = vpop.f32.mrf.mxu0 }
 0x73d   :  { %v1900_v21 = vpop.f32.mrf.mxu0  ;;  %v10469_v24 = vpop.f32.mrf.mxu1 }
 0x73e   :  { %v9455_v15 = vpack.i.bf16 %v10469_v24, %v10467_v14 }
 0x73f   :  { %v8761_v19 = vpop.f32.mrf.mxu0  ;;  %v8766_v26 = vpop.f32.mrf.mxu1 }
 0x741   :  { %v1948_v27 = vpop.f32.mrf.mxu1 }
 0x743   :  { %v8767_v28 = vpop.f32.mrf.mxu1 }
 0x76e   :  { %v10473_v32 = vpop.f32.mrf.mxu0 }
 0x770   :  { %v8772_v20 = vpop.f32.mrf.mxu0 }
 0x772   :  { %v1996_v34 = vpop.f32.mrf.mxu0  ;;  %v10475_v23 = vpop.f32.mrf.mxu1 }
 0x773   :  { %v9460_v35 = vpack.i.bf16 %v10475_v23, %v10473_v32 }
 0x774   :  { %v8773_v36 = vpop.f32.mrf.mxu0  ;;  %v8778_v39 = vpop.f32.mrf.mxu1 }
 0x776   :  { %v2044_v40 = vpop.f32.mrf.mxu1  ;;  %v2091_v41 = vpop.f32.mrf.mxu0 }
 0x777   :  { %v2447_v43 = vsel %vm296_vm3, %v2091_v41, -inf }
 0x778   :  { %v8779_v46 = vpop.f32.mrf.mxu1  ;;  %2448 = vmax.xlane.f32.xlu0 %v2447_v43  ;;  %v8784_v47 = vpop.f32.mrf.mxu0 }
 0x77a   :  { %v2094_v49 = vpop.f32.mrf.mxu0  ;;  %v2141_v50 = vpop.f32.mrf.mxu1 }
 0x77b   :  { %v2450_v29 = vsel %vm296_vm3, %v2141_v50, -inf }
 0x77c   :  { %2451 = vmax.xlane.f32.xlu1 %v2450_v29  ;;  %v8785_v53 = vpop.f32.mrf.mxu0  ;;  %v8790_v54 = vpop.f32.mrf.mxu1 }
 0x77d   :  { %v10494_v54 = vpop.permute.xlu1 %2639 }
 0x77e   :  { %v2144_v55 = vpop.f32.mrf.mxu1  ;;  %v2191_v57 = vpop.f32.mrf.mxu0 }
 0x77f   :  { %v2453_v31 = vsel %vm296_vm3, %v2191_v57, -inf }
 0x780   :  { %v8791_v44 = vpop.f32.mrf.mxu1  ;;  %2454 = vmax.xlane.f32.xlu0 %v2453_v31  ;;  %v8796_v60 = vpop.f32.mrf.mxu0 }
 0x781   :  { %v10496_v55 = vpop.permute.xlu1 %2687 }
 0x782   :  { %v2194_v58 = vpop.f32.mrf.mxu0  ;;  %v2241_v0 = vpop.f32.mrf.mxu1 }
 0x783   :  { %v2456_v1 = vsel %vm296_vm3, %v2241_v0, -inf }
 0x784   :  { %v8802_v3 = vpop.f32.mrf.mxu1  ;;  %2457 = vmax.xlane.f32.xlu0 %v2456_v1  ;;  %v8797_v6 = vpop.f32.mrf.mxu0 }
 0x786   :  { %v2244_v7 = vpop.f32.mrf.mxu1  ;;  %v2291_v11 = vpop.f32.mrf.mxu0 }
 0x787   :  { %v2459_v12 = vsel %vm296_vm3, %v2291_v11, -inf }
 0x788   :  { %v8803_v13 = vpop.f32.mrf.mxu1  ;;  %2460 = vmax.xlane.f32.xlu1 %v2459_v12  ;;  %v8808_v16 = vpop.f32.mrf.mxu0 }
 0x78a   :  { %v2294_v18 = vpop.f32.mrf.mxu0  ;;  %v2341_v21 = vpop.f32.mrf.mxu1 }
 0x78b   :  { %v2462_v19 = vsel %vm296_vm3, %v2341_v21, -inf }
 0x78c   :  { %v8814_v26 = vpop.f32.mrf.mxu1  ;;  %2463 = vmax.xlane.f32.xlu0 %v2462_v19  ;;  %v8809_v27 = vpop.f32.mrf.mxu0 }
 0x78e   :  { %v2344_v28 = vpop.f32.mrf.mxu1  ;;  %v10485_v20 = vpop.f32.mrf.mxu0 }
 0x78f   :  { %v2465_v34 = vsel %vm296_vm3, %v10485_v20, -inf }
 0x790   :  { %v8815_v36 = vpop.f32.mrf.mxu1  ;;  %2466 = vmax.xlane.f32.xlu1 %v2465_v34  ;;  %v8820_v39 = vpop.f32.mrf.mxu0 }
 0x792   :  { %v2394_v40 = vpop.f32.mrf.mxu0  ;;  %v2441_v43 = vpop.f32.mrf.mxu1 }
 0x793   :  { %v2468_v46 = vsel %vm296_vm3, %v2441_v43, -inf }
 0x794   :  { %v8826_v47 = vpop.f32.mrf.mxu1  ;;  %2469 = vmax.xlane.f32.xlu0 %v2468_v46  ;;  %v8821_v49 = vpop.f32.mrf.mxu0 }
 0x796   :  { %v2444_v29 = vpop.f32.mrf.mxu1 }
 0x798   :  { %v8827_v53 = vpop.f32.mrf.mxu1 }
 0x7a1   :  { %2783 = vrot.lane.b32.xlu1 %v9997_v61, %s9868_s20 }
 0x7aa   :  { %2735 = vrot.lane.b32.xlu0 %v9991_v56, %s9868_s20 }
 0x801   :  { %v2449_v31 = vpop.xlane.xlu0 %2448 }
 0x802   :  { %v2471_v44 = vsub.f32 %v2091_v41, %v2449_v31 }
 0x804   :  { %v2479_v60 = vmul.f32 1.442695, %v2471_v44 }
 0x805   :  { %v2452_v58 = vpop.xlane.xlu1 %2451 }
 0x806   :  { %9622 = vpow2.f32 %v2479_v60  ;;  %v2472_v1 = vsub.f32 %v2141_v50, %v2452_v58 }
 0x808   :  { %v2481_v3 = vmul.f32 1.442695, %v2472_v1 }
 0x809   :  { %v2455_v6 = vpop.xlane.xlu0 %2454 }
 0x80a   :  { %9624 = vpow2.f32 %v2481_v3  ;;  %v2473_v7 = vsub.f32 %v2191_v57, %v2455_v6 }
 0x80c   :  { %v2483_v12 = vmul.f32 1.442695, %v2473_v7 }
 0x80d   :  { %v2458_v13 = vpop.xlane.xlu0 %2457 }
 0x80e   :  { %9626 = vpow2.f32 %v2483_v12  ;;  %v2474_v16 = vsub.f32 %v2241_v0, %v2458_v13 }
 0x810   :  { %v2485_v18 = vmul.f32 1.442695, %v2474_v16 }
 0x811   :  { %v2461_v19 = vpop.xlane.xlu1 %2460 }
 0x812   :  { %9628 = vpow2.f32 %v2485_v18  ;;  %v2475_v26 = vsub.f32 %v2291_v11, %v2461_v19 }
 0x813   :  { %v10498_v27 = vpop.eup %9622 }
 0x814   :  { %v2487_v28 = vmul.f32 1.442695, %v2475_v26  ;;  %v2495_v41 = vsel %vm296_vm3, %v10498_v27, 0.0 }
 0x815   :  { %2496 = vadd.xlane.f32.xlu1 %v2495_v41  ;;  %v2464_v50 = vpop.xlane.xlu0 %2463 }
 0x816   :  { %9630 = vpow2.f32 %v2487_v28  ;;  %v2476_v34 = vsub.f32 %v2341_v21, %v2464_v50 }
 0x817   :  { %v10502_v36 = vpop.eup %9624 }
 0x818   :  { %v2489_v57 = vmul.f32 1.442695, %v2476_v34  ;;  %v2498_v0 = vsel %vm296_vm3, %v10502_v36, 0.0  ;;  %v2645_v34 = vsel %vm787_vm4, %v10494_v54, 0 }
 0x819   :  { %2499 = vadd.xlane.f32.xlu0 %v2498_v0  ;;  %v2467_v53 = vpop.xlane.xlu1 %2466 }
 0x81a   :  { %9632 = vpow2.f32 %v2489_v57  ;;  %v2477_v31 = vsub.f32 %v10485_v20, %v2467_v53 }
 0x81b   :  { %v10506_v39 = vpop.eup %9626 }
 0x81c   :  { %v2501_v11 = vsel %vm296_vm3, %v10506_v39, 0.0  ;;  %v2491_v60 = vmul.f32 1.442695, %v2477_v31 }
 0x81d   :  { %2502 = vadd.xlane.f32.xlu1 %v2501_v11  ;;  %v2470_v44 = vpop.xlane.xlu0 %2469  ;;  %v2784_v20 = vpop.permute.xlu1 %2783 }
 0x81e   :  { %v2478_v58 = vsub.f32 %v2441_v43, %v2470_v44  ;;  %9634 = vpow2.f32 %v2491_v60  ;;  %v2789_v31 = vsel %vm787_vm4, %v2784_v20, 0 }
 0x81f   :  { %v10510_v40 = vpop.eup %9628 }
 0x820   :  { %v2504_v46 = vsel %vm296_vm3, %v10510_v40, 0.0  ;;  %v2493_v1 = vmul.f32 1.442695, %v2478_v58 }
 0x821   :  { %2505 = vadd.xlane.f32.xlu0 %v2504_v46  ;;  %v2736_v43 = vpop.permute.xlu0 %2735  ;;  %v2693_v46 = vsel %vm787_vm4, %v10496_v55, 0 }
 0x822   :  { %9636 = vpow2.f32 %v2493_v1 }
 0x823   :  { %v10514_v21 = vpop.eup %9630 }
 0x824   :  { %v2507_v47 = vsel %vm296_vm3, %v10514_v21, 0.0 }
 0x825   :  { %2508 = vadd.xlane.f32.xlu1 %v2507_v47 }
 0x827   :  { %v10518_v49 = vpop.eup %9632 }
 0x828   :  { %v2510_v29 = vsel %vm296_vm3, %v10518_v49, 0.0 }
 0x829   :  { %2511 = vadd.xlane.f32.xlu0 %v2510_v29  ;;  %v2741_v29 = vsel %vm787_vm4, %v2736_v43, 0 }
 0x82b   :  { %v10527_v3 = vpop.eup %9634 }
 0x82c   :  { %v2513_v6 = vsel %vm296_vm3, %v10527_v3, 0.0 }
 0x82f   :  { %v10531_v7 = vpop.eup %9636 }
 0x830   :  { %v2516_v12 = vsel %vm296_vm3, %v10531_v7, 0.0 }
 0x836   :  { %2879 = vrot.lane.b32.xlu1 %v10003_v62, %s9868_s20 }
 0x83f   :  { %2831 = vrot.lane.b32.xlu0 %v9995_v59, %s9868_s20 }
 0x85a   :  { %2514 = vadd.xlane.f32.xlu1 %v2513_v6 }
 0x85e   :  { %2517 = vadd.xlane.f32.xlu0 %v2516_v12 }
 0x86b   :  { %2979 = vrot.lane.b32.xlu1 %v9985_v51, %s9869_s9 }
 0x86f   :  { %2977 = vrot.lane.b32.xlu1 %v9985_v51, %s9870_s21 }
 0x873   :  { %3079 = vrot.lane.b32.xlu1 %v9981_v48, %s9869_s9 }
 0x874   :  { %2929 = vrot.lane.b32.xlu0 %v9977_v45, %s9869_s9 }
 0x877   :  { %3077 = vrot.lane.b32.xlu1 %v9981_v48, %s9870_s21 }
 0x878   :  { %2927 = vrot.lane.b32.xlu0 %v9977_v45, %s9870_s21 }
 0x87b   :  { %3179 = vrot.lane.b32.xlu1 %v9997_v61, %s9869_s9 }
 0x87c   :  { %3029 = vrot.lane.b32.xlu0 %v9975_v42, %s9869_s9 }
 0x87f   :  { %3177 = vrot.lane.b32.xlu1 %v9997_v61, %s9870_s21 }
 0x880   :  { %3027 = vrot.lane.b32.xlu0 %v9975_v42, %s9870_s21 }
 0x883   :  { %3279 = vrot.lane.b32.xlu1 %v10003_v62, %s9869_s9 }
 0x884   :  { %3129 = vrot.lane.b32.xlu0 %v9991_v56, %s9869_s9 }
 0x887   :  { %3277 = vrot.lane.b32.xlu1 %v10003_v62, %s9870_s21 }
 0x888   :  { %3127 = vrot.lane.b32.xlu0 %v9991_v56, %s9870_s21 }
 0x88b   :  { %3423 = vrot.lane.b32.xlu1 %v9977_v45, %s9871_s22 }
 0x88c   :  { %3229 = vrot.lane.b32.xlu0 %v9995_v59, %s9869_s9 }
 0x890   :  { %3227 = vrot.lane.b32.xlu0 %v9995_v59, %s9870_s21 }
 0x89e   :  { %v2497_v13 = vpop.xlane.xlu1 %2496 }
 0x89f   :  { %9638 = vrcp.f32 %v2497_v13 }
 0x8a2   :  { %v2500_v16 = vpop.xlane.xlu0 %2499 }
 0x8a3   :  { %9640 = vrcp.f32 %v2500_v16 }
 0x8a6   :  { %v2503_v18 = vpop.xlane.xlu1 %2502 }
 0x8a7   :  { %9642 = vrcp.f32 %v2503_v18 }
 0x8aa   :  { %v2506_v19 = vpop.xlane.xlu0 %2505 }
 0x8ab   :  { %9644 = vrcp.f32 %v2506_v19 }
 0x8ac   :  { %v9639_v26 = vpop.eup %9638 }
 0x8ad   :  { %v2527_v28 = vmul.f32 %v9639_v26, %v10498_v27 }
 0x8ae   :  { %v2509_v45 = vpop.xlane.xlu1 %2508 }
 0x8af   :  { %9646 = vrcp.f32 %v2509_v45  ;;  %v2535_v41 = vpack.c.bf16 %v2527_v28, %v2527_v28 }
 0x8b0   :  { %v9641_v50 = vpop.eup %9640 }
 0x8b1   :  { %8831 = vmatmul.mubr.msk.bf16.vlgmr.msra.gmra.mxu0 %vm296_vm3, %v2535_v41  ;;  %v2528_v57 = vmul.f32 %v9641_v50, %v10502_v36 }
 0x8b2   :  { %8841 = vmatpush3.bf16.msra.mxu0 %v2645_v34  ;;  %v2512_v0 = vpop.xlane.xlu0 %2511  ;;  %8842 = vmatprep.mubr.msk.bf16.mxu0 %vm9860_vm2, %v9859_v37  ;;  %v2880_v12 = vpop.permute.xlu1 %2879 }
 0x8b3   :  { %9648 = vrcp.f32 %v2512_v0  ;;  %v2536_v11 = vpack.c.bf16 %v2528_v57, %v2528_v57  ;;  %8852 = vmatprep.subr.bf16.mxu0 %v9859_v37  ;;  %v2885_v20 = vsel %vm787_vm4, %v2880_v12, 0 }
 0x8b4   :  { %v9643_v27 = vpop.eup %9642 }
 0x8b5   :  { %8837 = vmatmul.mubr.msk.bf16.vlgmr.msra.gmra.mxu1 %vm296_vm3, %v2536_v11  ;;  %v2529_v54 = vmul.f32 %v9643_v27, %v10506_v39 }
 0x8b6   :  { %8847 = vmatpush3.bf16.msra.mxu1 %v2693_v46  ;;  %8848 = vmatprep.mubr.msk.bf16.mxu1 %vm9860_vm2, %v9859_v37  ;;  %v2832_v60 = vpop.permute.xlu0 %2831 }
 0x8b7   :  { %v2537_v36 = vpack.c.bf16 %v2529_v54, %v2529_v54  ;;  %8858 = vmatprep.subr.bf16.mxu1 %v9859_v37  ;;  %v2837_v1 = vsel %vm787_vm4, %v2832_v60, 0 }
 0x8b8   :  { %v9645_v47 = vpop.eup %9644 }
 0x8b9   :  { %8843 = vmatmul.mubr.msk.bf16.vlgmr.msra.gmra.mxu0 %vm296_vm3, %v2537_v36  ;;  %v2530_v53 = vmul.f32 %v9645_v47, %v10510_v40 }
 0x8ba   :  { %8853 = vmatpush3.bf16.msra.mxu0 %v2741_v29  ;;  %8854 = vmatprep.mubr.msk.bf16.mxu0 %vm9860_vm2, %v9859_v37 }
 0x8bb   :  { %v2538_v55 = vpack.c.bf16 %v2530_v53, %v2530_v53  ;;  %8864 = vmatprep.subr.bf16.mxu0 %v9859_v37 }
 0x8bc   :  { %v9647_v39 = vpop.eup %9646 }
 0x8bd   :  { %8849 = vmatmul.mubr.msk.bf16.vlgmr.msra.gmra.mxu1 %vm296_vm3, %v2538_v55  ;;  %v2531_v44 = vmul.f32 %v9647_v39, %v10514_v21 }
 0x8be   :  { %8859 = vmatpush3.bf16.msra.mxu1 %v2789_v31  ;;  %8860 = vmatprep.mubr.msk.bf16.mxu1 %vm9860_vm2, %v9859_v37 }
 0x8bf   :  { %v2539_v40 = vpack.c.bf16 %v2531_v44, %v2531_v44  ;;  %8870 = vmatprep.subr.bf16.mxu1 %v9859_v37 }
 0x8c0   :  { %v9649_v58 = vpop.eup %9648 }
 0x8c1   :  { %8855 = vmatmul.mubr.msk.bf16.vlgmr.msra.gmra.mxu0 %vm296_vm3, %v2539_v40  ;;  %v2532_v6 = vmul.f32 %v9649_v58, %v10518_v49 }
 0x8c2   :  { %8865 = vmatpush3.bf16.msra.mxu0 %v2837_v1  ;;  %8866 = vmatprep.mubr.msk.bf16.mxu0 %vm9860_vm2, %v9859_v37 }
 0x8c3   :  { %v2540_v21 = vpack.c.bf16 %v2532_v6, %v2532_v6  ;;  %8876 = vmatprep.subr.bf16.mxu0 %v9859_v37 }
 0x8c5   :  { %8861 = vmatmul.mubr.msk.bf16.vlgmr.msra.gmra.mxu1 %vm296_vm3, %v2540_v21 }
 0x8c6   :  { %8871 = vmatpush3.bf16.msra.mxu1 %v2885_v20  ;;  %8872 = vmatprep.mubr.msk.bf16.mxu1 %vm9860_vm2, %v9859_v37 }
 0x8c7   :  { %8882 = vmatprep.subr.bf16.mxu1 %v9859_v37 }
 0x8e3   :  { %v2515_v43 = vpop.xlane.xlu1 %2514 }
 0x8e4   :  { %9650 = vrcp.f32 %v2515_v43 }
 0x8e7   :  { %v2980_v49 = vpop.permute.xlu1 %2979  ;;  %v2518_v13 = vpop.xlane.xlu0 %2517 }
 0x8e8   :  { %9652 = vrcp.f32 %v2518_v13 }
 0x8eb   :  { %v2978_v16 = vpop.permute.xlu1 %2977  ;;  %v2930_v18 = vpop.permute.xlu0 %2929 }
 0x8ec   :  { %v2935_v0 = vsel %vm296_vm3, %v2930_v18, 0 }
 0x8ef   :  { %v3080_v19 = vpop.permute.xlu1 %3079  ;;  %v2928_v26 = vpop.permute.xlu0 %2927 }
 0x8f0   :  { %v3085_v29 = vsel %vm296_vm3, %v3080_v19, 0 }
 0x8f1   :  { %v9651_v28 = vpop.eup %9650 }
 0x8f2   :  { %v2533_v45 = vmul.f32 %v9651_v28, %v10527_v3  ;;  %v2985_v3 = vsel %vm296_vm3, %v2980_v49, 0 }
 0x8f3   :  { %v3030_v41 = vpop.permute.xlu0 %3029  ;;  %v3078_v57 = vpop.permute.xlu1 %3077 }
 0x8f4   :  { %v2541_v50 = vpack.c.bf16 %v2533_v45, %v2533_v45 }
 0x8f5   :  { %v9653_v34 = vpop.eup %9652 }
 0x8f6   :  { %8867 = vmatmul.mubr.msk.bf16.vlgmr.msra.gmra.mxu0 %vm296_vm3, %v2541_v50  ;;  %v2534_v11 = vmul.f32 %v9653_v34, %v10531_v7  ;;  %v3035_v7 = vsel %vm296_vm3, %v3030_v41, 0 }
 0x8f7   :  { %8877 = vmatpush3.bf16.xpose.msra.mxu0 %v2935_v0  ;;  %8878 = vmatprep.mubr.msk.bf16.mxu0 %vm9860_vm2, %v9859_v37  ;;  %v3028_v46 = vpop.permute.xlu0 %3027  ;;  %v3180_v54 = vpop.permute.xlu1 %3179 }
 0x8f8   :  { %v2542_v27 = vpack.c.bf16 %v2534_v11, %v2534_v11  ;;  %8888 = vmatprep.subr.bf16.mxu0 %v9859_v37  ;;  %v3185_v31 = vsel %vm296_vm3, %v3180_v54, 0 }
 0x8fa   :  { %8873 = vmatmul.mubr.msk.bf16.vlgmr.msra.gmra.mxu1 %vm296_vm3, %v2542_v27 }
 0x8fb   :  { %8883 = vmatpush3.bf16.xpose.msra.mxu1 %v2985_v3  ;;  %8884 = vmatprep.mubr.msk.bf16.mxu1 %vm9860_vm2, %v9859_v37  ;;  %v3130_v36 = vpop.permute.xlu0 %3129  ;;  %v3178_v47 = vpop.permute.xlu1 %3177 }
 0x8fc   :  { %8894 = vmatprep.subr.bf16.mxu1 %v9859_v37  ;;  %v3135_v55 = vsel %vm296_vm3, %v3130_v36, 0 }
 0x8fe   :  { %8879 = vmatmul.mubr.msk.bf16.vlgmr.msra.gmra.mxu0 %vm296_vm3, %v2928_v26 }
 0x8ff   :  { %8889 = vmatpush3.bf16.xpose.msra.mxu0 %v3035_v7  ;;  %8890 = vmatprep.mubr.msk.bf16.mxu0 %vm9860_vm2, %v9859_v37  ;;  %v3128_v53 = vpop.permute.xlu0 %3127  ;;  %v3280_v39 = vpop.permute.xlu1 %3279 }
 0x900   :  { %8900 = vmatprep.subr.bf16.mxu0 %v9859_v37  ;;  %v3285_v58 = vsel %vm296_vm3, %v3280_v39, 0 }
 0x902   :  { %8885 = vmatmul.mubr.msk.bf16.vlgmr.msra.gmra.mxu1 %vm296_vm3, %v2978_v16 }
 0x903   :  { %8895 = vmatpush3.bf16.xpose.msra.mxu1 %v3085_v29  ;;  %8896 = vmatprep.mubr.msk.bf16.mxu1 %vm9860_vm2, %v9859_v37  ;;  %v3230_v44 = vpop.permute.xlu0 %3229  ;;  %v3278_v60 = vpop.permute.xlu1 %3277 }
 0x904   :  { %8906 = vmatprep.subr.bf16.mxu1 %v9859_v37  ;;  %v3235_v40 = vsel %vm296_vm3, %v3230_v44, 0 }
 0x906   :  { %8891 = vmatmul.mubr.msk.bf16.vlgmr.msra.gmra.mxu0 %vm296_vm3, %v3028_v46 }
 0x907   :  { %8901 = vmatpush3.bf16.xpose.msra.mxu0 %v3135_v55  ;;  %8902 = vmatprep.mubr.msk.bf16.mxu0 %vm9860_vm2, %v9859_v37  ;;  %v3424_v1 = vpop.permute.xlu1 %3423  ;;  %v3228_v6 = vpop.permute.xlu0 %3227 }
 0x908   :  { %8912 = vmatprep.subr.bf16.mxu0 %v9859_v37  ;;  %v3429_v12 = vsel %vm787_vm4, %v3424_v1, 0 }
 0x90a   :  { %8897 = vmatmul.mubr.msk.bf16.vlgmr.msra.gmra.mxu1 %vm296_vm3, %v3078_v57 }
 0x90b   :  { %8907 = vmatpush3.bf16.xpose.msra.mxu1 %v3185_v31  ;;  %8908 = vmatprep.mubr.msk.bf16.mxu1 %vm9860_vm2, %v9859_v37 }
 0x90c   :  { %8918 = vmatprep.subr.bf16.mxu1 %v9859_v37 }
 0x90e   :  { %8903 = vmatmul.mubr.msk.bf16.vlgmr.msra.gmra.mxu0 %vm296_vm3, %v3128_v53 }
 0x90f   :  { %8913 = vmatpush3.bf16.xpose.msra.mxu0 %v3235_v40  ;;  %8914 = vmatprep.mubr.msk.bf16.mxu0 %vm9860_vm2, %v9859_v37 }
 0x910   :  { %8924 = vmatprep.subr.bf16.mxu0 %v9859_v37 }
 0x912   :  { %8909 = vmatmul.mubr.msk.bf16.vlgmr.msra.gmra.mxu1 %vm296_vm3, %v3178_v47 }
 0x913   :  { %8919 = vmatpush3.bf16.xpose.msra.mxu1 %v3285_v58  ;;  %8920 = vmatprep.mubr.msk.bf16.mxu1 %vm9860_vm2, %v9859_v37 }
 0x914   :  { %8930 = vmatprep.subr.bf16.mxu1 %v9859_v37 }
 0x916   :  { %8915 = vmatmul.mubr.msk.bf16.vlgmr.msra.gmra.mxu0 %vm296_vm3, %v3228_v6 }
 0x917   :  { %8925 = vmatpush3.bf16.msra.mxu0 %v3429_v12  ;;  %8926 = vmatprep.mubr.msk.bf16.mxu0 %vm9860_vm2, %v9859_v37 }
 0x918   :  { %8936 = vmatprep.subr.bf16.mxu0 %v9859_v37 }
 0x91a   :  { %8921 = vmatmul.mubr.msk.bf16.vlgmr.msra.gmra.mxu1 %vm296_vm3, %v3278_v60 }
 0x91b   :  { %8932 = vmatprep.mubr.msk.bf16.mxu1 %vm9860_vm2, %v9859_v37 }
 0x971   :  { %v10657_v21 = vpop.f32.mrf.mxu0 }
 0x973   :  { %v8832_v20 = vpop.f32.mrf.mxu0 }
 0x975   :  { %v2588_v43 = vpop.f32.mrf.mxu0  ;;  %v10659_v49 = vpop.f32.mrf.mxu1 }
 0x976   :  { %v9435_v13 = vpack.i.bf16 %v10659_v49, %v10657_v21 }
 0x977   :  { %v8833_v16 = vpop.f32.mrf.mxu0  ;;  %v8838_v18 = vpop.f32.mrf.mxu1 }
 0x979   :  { %v2636_v19 = vpop.f32.mrf.mxu1  ;;  %v10663_v26 = vpop.f32.mrf.mxu0 }
 0x97b   :  { %v8839_v28 = vpop.f32.mrf.mxu1  ;;  %v8844_v45 = vpop.f32.mrf.mxu0 }
 0x97d   :  { %v2684_v41 = vpop.f32.mrf.mxu0  ;;  %v10665_v50 = vpop.f32.mrf.mxu1 }
 0x97e   :  { %v9440_v34 = vpack.i.bf16 %v10665_v50, %v10663_v26 }
 0x97f   :  { %v8845_v57 = vpop.f32.mrf.mxu0  ;;  %v8850_v0 = vpop.f32.mrf.mxu1 }
 0x981   :  { %v2732_v11 = vpop.f32.mrf.mxu1  ;;  %v10669_v27 = vpop.f32.mrf.mxu0 }
 0x983   :  { %v8851_v46 = vpop.f32.mrf.mxu1  ;;  %v8856_v3 = vpop.f32.mrf.mxu0 }
 0x985   :  { %v2780_v54 = vpop.f32.mrf.mxu0  ;;  %v10671_v7 = vpop.f32.mrf.mxu1 }
 0x986   :  { %v9465_v36 = vpack.i.bf16 %v10671_v7, %v10669_v27 }
 0x987   :  { %v8857_v47 = vpop.f32.mrf.mxu0  ;;  %v8862_v29 = vpop.f32.mrf.mxu1 }
 0x989   :  { %v2828_v53 = vpop.f32.mrf.mxu1 }
 0x98b   :  { %v8863_v55 = vpop.f32.mrf.mxu1 }
 0x9b6   :  { %v10675_v39 = vpop.f32.mrf.mxu0 }
 0x9b8   :  { %v8868_v31 = vpop.f32.mrf.mxu0 }
 0x9ba   :  { %v2876_v44 = vpop.f32.mrf.mxu0  ;;  %v10677_v60 = vpop.f32.mrf.mxu1 }
 0x9bb   :  { %v9470_v40 = vpack.i.bf16 %v10677_v60, %v10675_v39 }
 0x9bc   :  { %v8869_v58 = vpop.f32.mrf.mxu0  ;;  %v8874_v1 = vpop.f32.mrf.mxu1 }
 0x9be   :  { %v2924_v6 = vpop.f32.mrf.mxu1  ;;  %v2971_v12 = vpop.f32.mrf.mxu0 }
 0x9bf   :  { %v3327_v20 = vsel %vm296_vm3, %v2971_v12, -inf }
 0x9c0   :  { %v8875_v43 = vpop.f32.mrf.mxu1  ;;  %3328 = vmax.xlane.f32.xlu0 %v3327_v20  ;;  %v8880_v16 = vpop.f32.mrf.mxu0 }
 0x9c2   :  { %v2974_v18 = vpop.f32.mrf.mxu0  ;;  %v3021_v19 = vpop.f32.mrf.mxu1 }
 0x9c3   :  { %v3330_v28 = vsel %vm296_vm3, %v3021_v19, -inf }
 0x9c4   :  { %3331 = vmax.xlane.f32.xlu1 %v3330_v28  ;;  %v8881_v45 = vpop.f32.mrf.mxu0  ;;  %v8886_v41 = vpop.f32.mrf.mxu1 }
 0x9c6   :  { %v3024_v57 = vpop.f32.mrf.mxu1  ;;  %v3071_v0 = vpop.f32.mrf.mxu0 }
 0x9c7   :  { %v3333_v11 = vsel %vm296_vm3, %v3071_v0, -inf }
 0x9c8   :  { %v8887_v46 = vpop.f32.mrf.mxu1  ;;  %3334 = vmax.xlane.f32.xlu0 %v3333_v11  ;;  %v8892_v3 = vpop.f32.mrf.mxu0 }
 0x9ca   :  { %v3074_v54 = vpop.f32.mrf.mxu0  ;;  %v3121_v47 = vpop.f32.mrf.mxu1 }
 0x9cb   :  { %v3336_v29 = vsel %vm296_vm3, %v3121_v47, -inf }
 0x9cc   :  { %v8898_v53 = vpop.f32.mrf.mxu1  ;;  %3337 = vmax.xlane.f32.xlu0 %v3336_v29  ;;  %v8893_v55 = vpop.f32.mrf.mxu0 }
 0x9ce   :  { %v3124_v31 = vpop.f32.mrf.mxu1  ;;  %v10685_v44 = vpop.f32.mrf.mxu0 }
 0x9cf   :  { %v3339_v58 = vsel %vm296_vm3, %v10685_v44, -inf }
 0x9d0   :  { %v8899_v1 = vpop.f32.mrf.mxu1  ;;  %3340 = vmax.xlane.f32.xlu1 %v3339_v58  ;;  %v8904_v6 = vpop.f32.mrf.mxu0 }
 0x9d2   :  { %v3174_v20 = vpop.f32.mrf.mxu0  ;;  %v10689_v43 = vpop.f32.mrf.mxu1 }
 0x9d3   :  { %v3342_v16 = vsel %vm296_vm3, %v10689_v43, -inf }
 0x9d4   :  { %v8910_v18 = vpop.f32.mrf.mxu1  ;;  %3343 = vmax.xlane.f32.xlu0 %v3342_v16  ;;  %v8905_v28 = vpop.f32.mrf.mxu0 }
 0x9d6   :  { %v3224_v45 = vpop.f32.mrf.mxu1  ;;  %v3271_v41 = vpop.f32.mrf.mxu0 }
 0x9d7   :  { %v3345_v57 = vsel %vm296_vm3, %v3271_v41, -inf }
 0x9d8   :  { %v8911_v11 = vpop.f32.mrf.mxu1  ;;  %3346 = vmax.xlane.f32.xlu1 %v3345_v57  ;;  %v8916_v46 = vpop.f32.mrf.mxu0 }
 0x9da   :  { %v3274_v3 = vpop.f32.mrf.mxu0  ;;  %v3321_v54 = vpop.f32.mrf.mxu1 }
 0x9db   :  { %v3348_v29 = vsel %vm296_vm3, %v3321_v54, -inf }
 0x9dc   :  { %v8922_v53 = vpop.f32.mrf.mxu1  ;;  %3349 = vmax.xlane.f32.xlu0 %v3348_v29  ;;  %v8917_v55 = vpop.f32.mrf.mxu0 }
 0x9de   :  { %v3324_v31 = vpop.f32.mrf.mxu1 }
 0x9e0   :  { %v8923_v58 = vpop.f32.mrf.mxu1 }
 0x9e9   :  { %3519 = vrot.lane.b32.xlu1 %v9975_v42, %s9871_s22 }
 0x9ed   :  { %3567 = vrot.lane.b32.xlu1 %v9981_v48, %s9871_s22 }
 0x9f2   :  { %3471 = vrot.lane.b32.xlu0 %v9985_v51, %s9871_s22 }
 0xa49   :  { %v3329_v1 = vpop.xlane.xlu0 %3328 }
 0xa4a   :  { %v3351_v6 = vsub.f32 %v2971_v12, %v3329_v1 }
 0xa4c   :  { %v3359_v20 = vmul.f32 1.442695, %v3351_v6 }
 0xa4d   :  { %v3332_v16 = vpop.xlane.xlu1 %3331 }
 0xa4e   :  { %9654 = vpow2.f32 %v3359_v20  ;;  %v3352_v18 = vsub.f32 %v3021_v19, %v3332_v16 }
 0xa50   :  { %v3361_v28 = vmul.f32 1.442695, %v3352_v18 }
 0xa51   :  { %v3335_v45 = vpop.xlane.xlu0 %3334 }
 0xa52   :  { %9656 = vpow2.f32 %v3361_v28  ;;  %v3353_v57 = vsub.f32 %v3071_v0, %v3335_v45 }
 0xa54   :  { %v3363_v11 = vmul.f32 1.442695, %v3353_v57 }
 0xa55   :  { %v3338_v46 = vpop.xlane.xlu0 %3337 }
 0xa56   :  { %9658 = vpow2.f32 %v3363_v11  ;;  %v3354_v42 = vsub.f32 %v3121_v47, %v3338_v46 }
 0xa58   :  { %v3365_v3 = vmul.f32 1.442695, %v3354_v42 }
 0xa59   :  { %v3341_v6 = vpop.xlane.xlu1 %3340 }
 0xa5a   :  { %9660 = vpow2.f32 %v3365_v3  ;;  %v3355_v20 = vsub.f32 %v10685_v44, %v3341_v6 }
 0xa5b   :  { %v10701_v48 = vpop.eup %9654 }
 0xa5c   :  { %v3375_v51 = vsel %vm296_vm3, %v10701_v48, 0.0  ;;  %v3367_v28 = vmul.f32 1.442695, %v3355_v20 }
 0xa5d   :  { %3376 = vadd.xlane.f32.xlu1 %v3375_v51  ;;  %v3344_v29 = vpop.xlane.xlu0 %3343 }
 0xa5e   :  { %v3356_v18 = vsub.f32 %v10689_v43, %v3344_v29  ;;  %9662 = vpow2.f32 %v3367_v28 }
 0xa5f   :  { %v10705_v12 = vpop.eup %9656 }
 0xa60   :  { %v3378_v19 = vsel %vm296_vm3, %v10705_v12, 0.0  ;;  %v3369_v57 = vmul.f32 1.442695, %v3356_v18 }
 0xa61   :  { %3379 = vadd.xlane.f32.xlu0 %v3378_v19  ;;  %v3347_v16 = vpop.xlane.xlu1 %3346 }
 0xa62   :  { %v3357_v45 = vsub.f32 %v3271_v41, %v3347_v16  ;;  %9664 = vpow2.f32 %v3369_v57 }
 0xa63   :  { %v10709_v0 = vpop.eup %9658 }
 0xa64   :  { %v3381_v47 = vsel %vm296_vm3, %v10709_v0, 0.0  ;;  %v3371_v11 = vmul.f32 1.442695, %v3357_v45 }
 0xa65   :  { %3382 = vadd.xlane.f32.xlu1 %v3381_v47  ;;  %v3350_v53 = vpop.xlane.xlu0 %3349 }
 0xa66   :  { %v3358_v46 = vsub.f32 %v3321_v54, %v3350_v53  ;;  %9666 = vpow2.f32 %v3371_v11 }
 0xa67   :  { %v10713_v55 = vpop.eup %9660 }
 0xa68   :  { %v3384_v31 = vsel %vm296_vm3, %v10713_v55, 0.0  ;;  %v3373_v42 = vmul.f32 1.442695, %v3358_v46 }
 0xa69   :  { %3385 = vadd.xlane.f32.xlu0 %v3384_v31  ;;  %v3472_v58 = vpop.permute.xlu0 %3471 }
 0xa6a   :  { %v3477_v1 = vsel %vm787_vm4, %v3472_v58, 0  ;;  %9668 = vpow2.f32 %v3373_v42 }
 0xa6b   :  { %8931 = vmatpush3.bf16.msra.mxu1 %v3477_v1 }
 0xa6c   :  { %8942 = vmatprep.subr.bf16.mxu1 %v9859_v37 }
 0xa76   :  { %3663 = vrot.lane.b32.xlu1 %v9997_v61, %s9871_s22  ;;  %v10725_v61 = vpop.eup %9662 }
 0xa77   :  { %v10727_v3 = vpop.eup %9664 }
 0xa78   :  { %v10731_v44 = vpop.eup %9666  ;;  %v3390_v41 = vsel %vm296_vm3, %v10727_v3, 0.0 }
 0xa79   :  { %v3393_v43 = vsel %vm296_vm3, %v10731_v44, 0.0  ;;  %v10737_v54 = vpop.eup %9668 }
 0xa7a   :  { %v3396_v51 = vsel %vm296_vm3, %v10737_v54, 0.0 }
 0xa7f   :  { %3615 = vrot.lane.b32.xlu0 %v9991_v56, %s9871_s22  ;;  %v3387_v56 = vsel %vm296_vm3, %v10725_v61, 0.0 }
 0xa9a   :  { %3388 = vadd.xlane.f32.xlu1 %v3387_v56 }
 0xa9e   :  { %3394 = vadd.xlane.f32.xlu1 %v3393_v43  ;;  %3391 = vadd.xlane.f32.xlu0 %v3390_v41 }
 0xaa2   :  { %3397 = vadd.xlane.f32.xlu0 %v3396_v51 }
 0xaaf   :  { %3759 = vrot.lane.b32.xlu1 %v10003_v62, %s9871_s22  ;;  %v3520_v62 = vpop.permute.xlu1 %3519 }
 0xab3   :  { %9431 = vrot.lane.b32.xlu1 %v9430_v4, %s9872_s23  ;;  %v3568_v2 = vpop.permute.xlu1 %3567 }
 0xab4   :  { %v3573_v19 = vsel %vm787_vm4, %v3568_v2, 0 }
 0xab7   :  { %9441 = vrot.lane.b32.xlu1 %v9440_v34, %s9873_s24 }
 0xab8   :  { %3711 = vrot.lane.b32.xlu0 %v9995_v59, %s9871_s22 }
 0xabc   :  { %9426 = vrot.lane.b32.xlu0 %v9425_v52, %s9872_s23  ;;  %v3525_v52 = vsel %vm787_vm4, %v3520_v62, 0 }
 0xac0   :  { %9436 = vrot.lane.b32.xlu0 %v9435_v13, %s9873_s24 }
 0xae6   :  { %v3377_v9 = vpop.xlane.xlu1 %3376 }
 0xae7   :  { %9670 = vrcp.f32 %v3377_v9 }
 0xaea   :  { %v3380_v4 = vpop.xlane.xlu0 %3379 }
 0xaeb   :  { %9672 = vrcp.f32 %v3380_v4 }
 0xaee   :  { %v3383_v26 = vpop.xlane.xlu1 %3382 }
 0xaef   :  { %9674 = vrcp.f32 %v3383_v26 }
 0xaf2   :  { %v3386_v50 = vpop.xlane.xlu0 %3385  ;;  %v3664_v58 = vpop.permute.xlu1 %3663 }
 0xaf3   :  { %9676 = vrcp.f32 %v3386_v50  ;;  %v3669_v1 = vsel %vm787_vm4, %v3664_v58, 0  ;;  %v9553_v50 = vld [vmem:[%s11806_s5] sm:$0xff]  }
 0xaf4   :  { %v9671_v59 = vpop.eup %9670 }
 0xaf5   :  { %v3407_v34 = vmul.f32 %v9671_v59, %v10701_v48 }
 0xaf6   :  { %v3616_v29 = vpop.permute.xlu0 %3615 }
 0xaf7   :  { %v3415_v38 = vpack.c.bf16 %v3407_v34, %v3407_v34  ;;  %v3621_v31 = vsel %vm787_vm4, %v3616_v29, 0 }
 0xaf8   :  { %v9673_v63 = vpop.eup %9672 }
 0xaf9   :  { %v3408_v21 = vmul.f32 %v9673_v63, %v10705_v12  ;;  %8927 = vmatmul.mubr.msk.bf16.vlgmr.msra.gmra.mxu0 %vm296_vm3, %v3415_v38 }
 0xafa   :  { %8937 = vmatpush3.bf16.msra.mxu0 %v3525_v52  ;;  %8938 = vmatprep.mubr.msk.bf16.mxu0 %vm9860_vm2, %v9859_v37 }
 0xafb   :  { %v3416_v49 = vpack.c.bf16 %v3408_v21, %v3408_v21  ;;  %8948 = vmatprep.subr.bf16.mxu0 %v9859_v37 }
 0xafc   :  { %v9675_v13 = vpop.eup %9674 }
 0xafd   :  { %v3409_v48 = vmul.f32 %v9675_v13, %v10709_v0  ;;  %8933 = vmatmul.mubr.msk.bf16.vlgmr.msra.gmra.mxu1 %vm296_vm3, %v3416_v49 }
 0xafe   :  { %8943 = vmatpush3.bf16.msra.mxu1 %v3573_v19  ;;  %8944 = vmatprep.mubr.msk.bf16.mxu1 %vm9860_vm2, %v9859_v37 }
 0xaff   :  { %v3417_v12 = vpack.c.bf16 %v3409_v48, %v3409_v48  ;;  %8954 = vmatprep.subr.bf16.mxu1 %v9859_v37 }
 0xb00   :  { %v9677_v47 = vpop.eup %9676 }
 0xb01   :  { %v3410_v53 = vmul.f32 %v9677_v47, %v10713_v55  ;;  %8939 = vmatmul.mubr.msk.bf16.vlgmr.msra.gmra.mxu0 %vm296_vm3, %v3417_v12 }
 0xb02   :  { %8949 = vmatpush3.bf16.msra.mxu0 %v3621_v31  ;;  %8950 = vmatprep.mubr.msk.bf16.mxu0 %vm9860_vm2, %v9859_v37 }
 0xb03   :  { %v3418_v0 = vpack.c.bf16 %v3410_v53, %v3410_v53  ;;  %8960 = vmatprep.subr.bf16.mxu0 %v9859_v37 }
 0xb05   :  { %8945 = vmatmul.mubr.msk.bf16.vlgmr.msra.gmra.mxu1 %vm296_vm3, %v3418_v0 }
 0xb06   :  { %8955 = vmatpush3.bf16.msra.mxu1 %v3669_v1  ;;  %8956 = vmatprep.mubr.msk.bf16.mxu1 %vm9860_vm2, %v9859_v37 }
 0xb07   :  { %8966 = vmatprep.subr.bf16.mxu1 %v9859_v37 }
 0xb23   :  { %v3389_v55 = vpop.xlane.xlu1 %3388 }
 0xb24   :  { %9678 = vrcp.f32 %v3389_v55 }
 0xb27   :  { %v3395_v6 = vpop.xlane.xlu1 %3394  ;;  %v3392_v20 = vpop.xlane.xlu0 %3391 }
 0xb28   :  { %9680 = vrcp.f32 %v3395_v6 }
 0xb29   :  { %9682 = vrcp.f32 %v3392_v20 }
 0xb2b   :  { %v3398_v16 = vpop.xlane.xlu0 %3397  ;;  %v3760_v41 = vpop.permute.xlu1 %3759 }
 0xb2c   :  { %9684 = vrcp.f32 %v3398_v16 }
 0xb2f   :  { %v3712_v45 = vpop.permute.xlu0 %3711 }
 0xb30   :  { %v3717_v42 = vsel %vm787_vm4, %v3712_v45, 0 }
 0xb31   :  { %v9679_v18 = vpop.eup %9678 }
 0xb32   :  { %v3411_v28 = vmul.f32 %v9679_v18, %v10725_v61  ;;  %v3765_v61 = vsel %vm787_vm4, %v3760_v41, 0 }
 0xb34   :  { %v3419_v57 = vpack.c.bf16 %v3411_v28, %v3411_v28  ;;  %v9432_v28 = vpop.permute.xlu1 %9431 }
 0xb35   :  { %v9681_v11 = vpop.eup %9680 }
 0xb36   :  { %v9683_v46 = vpop.eup %9682  ;;  %8951 = vmatmul.mubr.msk.bf16.vlgmr.msra.gmra.mxu0 %vm296_vm3, %v3419_v57  ;;  %v3413_v43 = vmul.f32 %v9681_v11, %v10731_v44  ;;  %v9552_v44 = vld [vmem:[%s11806_s5 + $0x8] sm:$0xff]  }
 0xb37   :  { %v3412_v56 = vmul.f32 %v9683_v46, %v10727_v3  ;;  %8961 = vmatpush3.bf16.msra.mxu0 %v3717_v42  ;;  %8962 = vmatprep.mubr.msk.bf16.mxu0 %vm9860_vm2, %v9859_v37 }
 0xb38   :  { %v3421_v2 = vpack.c.bf16 %v3413_v43, %v3413_v43  ;;  %8972 = vmatprep.subr.bf16.mxu0 %v9552_v44 }
 0xb39   :  { %v3420_v51 = vpack.c.bf16 %v3412_v56, %v3412_v56  ;;  %v9685_v62 = vpop.eup %9684 }
 0xb3a   :  { %v3414_v3 = vmul.f32 %v9685_v62, %v10737_v54 }
 0xb3b   :  { %8957 = vmatmul.mubr.msk.bf16.vlgmr.msra.gmra.mxu1 %vm296_vm3, %v3420_v51 }
 0xb3c   :  { %8967 = vmatpush3.bf16.msra.mxu1 %v3765_v61  ;;  %8968 = vmatprep.mubr.msk.bf16.mxu1 %vm9860_vm2, %v9859_v37  ;;  %v3422_v9 = vpack.c.bf16 %v3414_v3, %v3414_v3 }
 0xb3e   :  { %8963 = vmatmul.mubr.msk.bf16.vlgmr.msra.gmra.mxu0 %vm296_vm3, %v3421_v2  ;;  %v9442_v2 = vpop.permute.xlu1 %9441 }
 0xb3f   :  { %8973 = vmatpush3.bf16.msra.mxu0 %v9552_v44 }
 0xb40   :  { %8974 = vmatprep.subr.bf16.mxu0 %v9553_v50 }
 0xb43   :  { %8969 = vmatmul.mubr.msk.bf16.vlgmr.msra.gmra.mxu1 %vm296_vm3, %v3422_v9  ;;  %8975 = vmatpush3.bf16.msra.mxu0 %v9553_v50  ;;  %v9444_v50 = vunpack.i.h.bf16 %v9442_v2 }
 0xb44   :  { %8996 = vmatprep.subr.bf16.mxu0 %v9859_v37 }
 0xbb9   :  { %v3465_v4 = vpop.f32.mrf.mxu0 }
 0xbbb   :  { %v8928_v26 = vpop.f32.mrf.mxu0 }
 0xbbc   :  { %v9433_v26 = vunpack.i.l.bf16 %v9432_v28 }
 0xbbd   :  { %v3468_v59 = vpop.f32.mrf.mxu0  ;;  %v3513_v34 = vpop.f32.mrf.mxu1 }
 0xbbe   :  { %v9445_v54 = vpack.i.bf16 %v3513_v34, %v3465_v4  ;;  %v9434_v4 = vunpack.i.h.bf16 %v9432_v28  ;;  %v9443_v59 = vunpack.i.l.bf16 %v9442_v2  ;;  %v3905_v34 = vsel %vm296_vm3, %v10257_v5, %v9433_v26 }
 0xbbf   :  { %v8929_v38 = vpop.f32.mrf.mxu0  ;;  %v8934_v63 = vpop.f32.mrf.mxu1 }
 0xbc0   :  { %9446 = vrot.lane.b32.xlu0 %v9445_v54, %s9874_s27  ;;  %v3913_v63 = vsel %vm94_vm0, %v3905_v34, %v9443_v59 }
 0xbc1   :  { %v3516_v52 = vpop.f32.mrf.mxu1  ;;  %v3561_v21 = vpop.f32.mrf.mxu0 }
 0xbc3   :  { %v8935_v49 = vpop.f32.mrf.mxu1  ;;  %v8940_v13 = vpop.f32.mrf.mxu0 }
 0xbc4   :  { %9456 = vrot.lane.b32.xlu0 %v9455_v15, %s9872_s23 }
 0xbc5   :  { %v3564_v19 = vpop.f32.mrf.mxu0  ;;  %v3609_v48 = vpop.f32.mrf.mxu1 }
 0xbc6   :  { %v9450_v29 = vpack.i.bf16 %v3609_v48, %v3561_v21 }
 0xbc7   :  { %v8941_v12 = vpop.f32.mrf.mxu0  ;;  %v8946_v47 = vpop.f32.mrf.mxu1 }
 0xbc8   :  { %9466 = vrot.lane.b32.xlu0 %v9465_v36, %s9873_s24  ;;  %9451 = vrot.lane.b32.xlu1 %v9450_v29, %s9874_s27 }
 0xbc9   :  { %v3612_v53 = vpop.f32.mrf.mxu1 }
 0xbcb   :  { %v8947_v31 = vpop.f32.mrf.mxu1 }
 0xbcc   :  { %9461 = vrot.lane.b32.xlu1 %v9460_v35, %s9872_s23 }
 0xbd0   :  { %9471 = vrot.lane.b32.xlu1 %v9470_v40, %s9873_s24  ;;  %v9427_v40 = vpop.permute.xlu0 %9426 }
 0xbd1   :  { %v9429_v45 = vunpack.i.h.bf16 %v9427_v40  ;;  %v9428_v57 = vunpack.i.l.bf16 %v9427_v40 }
 0xbd3   :  { %v3904_v56 = vsel %vm296_vm3, %v10255_v10, %v9429_v45  ;;  %v3903_v43 = vsel %vm296_vm3, %v10253_v8, %v9428_v57  ;;  %v3906_v8 = vsel %vm296_vm3, %v10259_v17, %v9434_v4 }
 0xbd4   :  { %v9437_v18 = vpop.permute.xlu0 %9436  ;;  %v3914_v52 = vsel %vm94_vm0, %v3906_v8, %v9444_v50 }
 0xbd5   :  { %v9439_v11 = vunpack.i.h.bf16 %v9437_v18  ;;  %v9438_v46 = vunpack.i.l.bf16 %v9437_v18 }
 0xbd7   :  { %v3911_v62 = vsel %vm94_vm0, %v3903_v43, %v9438_v46  ;;  %v3912_v61 = vsel %vm94_vm0, %v3904_v56, %v9439_v11  ;;  %v8180_v46 = vld [vmem:[%s11807_s6] ss:$0 sm:$0xff] }
 0xbf6   :  { %v3657_v14 = vpop.f32.mrf.mxu0 }
 0xbf8   :  { %v8952_v24 = vpop.f32.mrf.mxu0 }
 0xbfa   :  { %v3660_v15 = vpop.f32.mrf.mxu0 }
 0xbfb   :  { %v3705_v58 = vpop.f32.mrf.mxu1 }
 0xbfc   :  { %v9475_v27 = vpack.i.bf16 %v3705_v58, %v3657_v14  ;;  %v8953_v7 = vpop.f32.mrf.mxu0 }
 0xbfd   :  { %v8958_v36 = vpop.f32.mrf.mxu1 }
 0xbfe   :  { %9476 = vrot.lane.b32.xlu0 %v9475_v27, %s9874_s27  ;;  %v3753_v0 = vpop.f32.mrf.mxu0 }
 0xbff   :  { %v3708_v1 = vpop.f32.mrf.mxu1 }
 0xc00   :  { %v8964_v55 = vpop.f32.mrf.mxu0 }
 0xc01   :  { %v8959_v6 = vpop.f32.mrf.mxu1 }
 0xc02   :  { %v3756_v32 = vpop.f32.mrf.mxu0 }
 0xc03   :  { %v3801_v23 = vpop.f32.mrf.mxu1 }
 0xc04   :  { %v9480_v35 = vpack.i.bf16 %v3801_v23, %v3753_v0  ;;  %v8965_v20 = vpop.f32.mrf.mxu0 }
 0xc05   :  { %v8970_v16 = vpop.f32.mrf.mxu1 }
 0xc06   :  { %9481 = vrot.lane.b32.xlu1 %v9480_v35, %s9874_s27 }
 0xc07   :  { %v3804_v39 = vpop.f32.mrf.mxu1 }
 0xc09   :  { %v8971_v60 = vpop.f32.mrf.mxu1 }
 0xc32   :  { %v9447_v42 = vpop.permute.xlu0 %9446 }
 0xc33   :  { %v9449_v41 = vunpack.i.h.bf16 %v9447_v42  ;;  %v9448_v51 = vunpack.i.l.bf16 %v9447_v42 }
 0xc35   :  { %v3920_v3 = vsel %vm3919_vm5, %v3911_v62, %v9448_v51  ;;  %v3921_v9 = vsel %vm3919_vm5, %v3912_v61, %v9449_v41 }
 0xc36   :  { %v3928_v44 = vpack.c.bf16 %v3921_v9, %v3920_v3  ;;  %v9457_v19 = vpop.permute.xlu0 %9456 }
 0xc37   :  { %v9459_v29 = vunpack.i.h.bf16 %v9457_v19  ;;  %v9458_v17 = vunpack.i.l.bf16 %v9457_v19 }
 0xc38   :  { %8976 = vmatprep.mubr.msk.bf16.mxu0 %vm207_vm1, %v3928_v44 }
 0xc39   :  { %v3908_v31 = vsel %vm296_vm3, %v10263_v25, %v9459_v29  ;;  %v3907_v14 = vsel %vm296_vm3, %v10261_v22, %v9458_v17 }
 0xc3a   :  { %v9452_v10 = vpop.permute.xlu1 %9451  ;;  %v9467_v48 = vpop.permute.xlu0 %9466 }
 0xc3b   :  { %v9454_v54 = vunpack.i.h.bf16 %v9452_v10  ;;  %v9453_v38 = vunpack.i.l.bf16 %v9452_v10  ;;  %v9469_v47 = vunpack.i.h.bf16 %v9467_v48  ;;  %v9468_v5 = vunpack.i.l.bf16 %v9467_v48 }
 0xc3d   :  { %v3923_v21 = vsel %vm3919_vm5, %v3914_v52, %v9454_v54  ;;  %v3922_v49 = vsel %vm3919_vm5, %v3913_v63, %v9453_v38  ;;  %v3915_v58 = vsel %vm94_vm0, %v3907_v14, %v9468_v5  ;;  %v3916_v27 = vsel %vm94_vm0, %v3908_v31, %v9469_v47  ;;  %v8192_v54 = vld [vmem:[%s11805_s4 + $0x1] ss:$0 sm:$0xff] }
 0xc3e   :  { %v3929_v13 = vpack.c.bf16 %v3923_v21, %v3922_v49  ;;  %v9462_v12 = vpop.permute.xlu1 %9461 }
 0xc3f   :  { %v9464_v55 = vunpack.i.h.bf16 %v9462_v12  ;;  %v9463_v6 = vunpack.i.l.bf16 %v9462_v12 }
 0xc40   :  { %8977 = vmatmul.mubr.msk.bf16.vlgmr.msra.gmra.mxu0 %vm207_vm1, %v3929_v13 }
 0xc41   :  { %v3910_v22 = vsel %vm296_vm3, %v10267_v33, %v9464_v55  ;;  %v3909_v35 = vsel %vm296_vm3, %v10265_v30, %v9463_v6  ;;  %v9554_v30 = vld [vmem:[%s11804_s3 + $0x18] sm:$0xff]   ;;  %v9555_v33 = vld [vmem:[%s11804_s3 + $0x10] sm:$0xff]  }
 0xc42   :  { %v9472_v7 = vpop.permute.xlu1 %9471  ;;  %8984 = vmatprep.subr.bf16.mxu1 %v9554_v30 }
 0xc43   :  { %v9474_v32 = vunpack.i.h.bf16 %v9472_v7  ;;  %v9473_v23 = vunpack.i.l.bf16 %v9472_v7  ;;  %8985 = vmatpush3.bf16.msra.mxu1 %v9554_v30 }
 0xc44   :  { %8986 = vmatprep.subr.bf16.mxu1 %v9555_v33 }
 0xc45   :  { %v3917_v39 = vsel %vm94_vm0, %v3909_v35, %v9473_v23  ;;  %v3918_v60 = vsel %vm94_vm0, %v3910_v22, %v9474_v32 }
 0xc47   :  { %8987 = vmatpush3.bf16.msra.mxu1 %v9555_v33 }
 0xc48   :  { %9002 = vmatprep.subr.bf16.mxu1 %v9859_v37 }
 0xc70   :  { %v9477_v53 = vpop.permute.xlu0 %9476 }
 0xc71   :  { %v9479_v24 = vunpack.i.h.bf16 %v9477_v53  ;;  %v9478_v15 = vunpack.i.l.bf16 %v9477_v53 }
 0xc73   :  { %v3924_v36 = vsel %vm3919_vm5, %v3915_v58, %v9478_v15  ;;  %v3925_v0 = vsel %vm3919_vm5, %v3916_v27, %v9479_v24 }
 0xc74   :  { %v3930_v1 = vpack.c.bf16 %v3925_v0, %v3924_v36 }
 0xc76   :  { %8980 = vmatprep.mubr.msk.bf16.mxu0 %vm207_vm1, %v3930_v1 }
 0xc78   :  { %v9482_v25 = vpop.permute.xlu1 %9481 }
 0xc79   :  { %v9484_v20 = vunpack.i.h.bf16 %v9482_v25  ;;  %v9483_v16 = vunpack.i.l.bf16 %v9482_v25 }
 0xc7b   :  { %v3927_v40 = vsel %vm3919_vm5, %v3918_v60, %v9484_v20  ;;  %v3926_v18 = vsel %vm3919_vm5, %v3917_v39, %v9483_v16 }
 0xc7c   :  { %v3931_v28 = vpack.c.bf16 %v3927_v40, %v3926_v18 }
 0xc7e   :  { %8981 = vmatmul.mubr.msk.bf16.gmra.mxu0 %vm207_vm1, %v3931_v28 }
 0xc7f   :  { %8998 = vmatprep.mubr.msk.bf16.mxu0 %vm9860_vm2, %v9859_v37 }
 0xd00   :  { %v8978_v45 = vpop.f32.mrf.mxu0 }
 0xd01   :  { %v4010_v51 = vadd.f32 %v8978_v45, %v8180_v46 }
 0xd02   :  { %v4001_v57 = vpop.f32.mrf.mxu0 }
 0xd03   :  { %v4002_v43 = vadd.f32 %v8180_v46, %v4001_v57 }
 0xd04   :  { %v8979_v11 = vpop.f32.mrf.mxu0 }
 0xd05   :  { %v4013_v42 = vadd.f32 %v8979_v11, %v8180_v46 }
 0xd06   :  { %v4004_v56 = vpop.f32.mrf.mxu0 }
 0xd07   :  { %v4005_v41 = vadd.f32 %v8180_v46, %v4004_v56  ;;  %v4033_v61 = vpack.c.bf16 %v4013_v42, %v4010_v51 }
 0xd09   :  { %v4032_v62 = vpack.c.bf16 %v4005_v41, %v4002_v43 }
 0xd0b   :  { %8988 = vmatprep.mubr.msk.bf16.mxu1 %vm207_vm1, %v4032_v62 }
 0xd0c   :  { %8989 = vmatmul.mubr.msk.bf16.vlgmr.msra.gmra.mxu1 %vm207_vm1, %v4033_v61 }
 0xd3e   :  { %v8982_v2 = vpop.f32.mrf.mxu0 }
 0xd3f   :  { %v4026_v59 = vadd.f32 %v8982_v2, %v8180_v46 }
 0xd40   :  { %v4017_v3 = vpop.f32.mrf.mxu0 }
 0xd41   :  { %v4018_v26 = vadd.f32 %v8180_v46, %v4017_v3 }
 0xd42   :  { %v8983_v9 = vpop.f32.mrf.mxu0 }
 0xd43   :  { %v4029_v44 = vadd.f32 %v8983_v9, %v8180_v46 }
 0xd44   :  { %v4020_v4 = vpop.f32.mrf.mxu0 }
 0xd45   :  { %v4021_v50 = vadd.f32 %v8180_v46, %v4020_v4  ;;  %v4035_v8 = vpack.c.bf16 %v4029_v44, %v4026_v59 }
 0xd47   :  { %v4034_v10 = vpack.c.bf16 %v4021_v50, %v4018_v26 }
 0xd49   :  { %8992 = vmatprep.mubr.msk.bf16.mxu1 %vm207_vm1, %v4034_v10 }
 0xd4a   :  { %8993 = vmatmul.mubr.msk.bf16.gmra.mxu1 %vm207_vm1, %v4035_v8 }
 0xd4b   :  { %9004 = vmatprep.mubr.msk.bf16.mxu1 %vm9860_vm2, %v9859_v37 }
 0xdcc   :  { %v8990_v34 = vpop.f32.mrf.mxu1 }
 0xdcd   :  { %v4116_v21 = vadd.f32 %v8990_v34, %v8192_v54 }
 0xdce   :  { %v4107_v38 = vpop.f32.mrf.mxu1 }
 0xdcf   :  { %v4108_v63 = vadd.f32 %v8192_v54, %v4107_v38  ;;  %v10887_v48 = vpack.c.bf16 %v4116_v21, %v4116_v21 }
 0xdd0   :  { %v8991_v52 = vpop.f32.mrf.mxu1 }
 0xdd1   :  { %v10883_v49 = vpack.c.bf16 %v4108_v63, %v4108_v63  ;;  %v4119_v29 = vadd.f32 %v8991_v52, %v8192_v54 }
 0xdd2   :  { %v4110_v13 = vpop.f32.mrf.mxu1 }
 0xdd3   :  { %v4111_v19 = vadd.f32 %v8192_v54, %v4110_v13  ;;  %4147 = vrot.lane.b32.xlu0 %v10883_v49, %s9861_s13  ;;  %v10895_v12 = vpack.c.bf16 %v4119_v29, %v4119_v29 }
 0xdd5   :  { %v10889_v17 = vpack.c.bf16 %v4111_v19, %v4111_v19 }
 0xdd7   :  { %4196 = vrot.lane.b32.xlu1 %v10889_v17, %s9861_s13  ;;  %4245 = vrot.lane.b32.xlu0 %v10887_v48, %s9861_s13 }
 0xddb   :  { %4294 = vrot.lane.b32.xlu1 %v10895_v12, %s9861_s13 }
 0xe0a   :  { %v8994_v47 = vpop.f32.mrf.mxu1 }
 0xe0b   :  { %v4132_v14 = vadd.f32 %v8994_v47, %v8192_v54 }
 0xe0c   :  { %v4123_v5 = vpop.f32.mrf.mxu1 }
 0xe0d   :  { %v4124_v53 = vadd.f32 %v8192_v54, %v4123_v5  ;;  %v10903_v27 = vpack.c.bf16 %v4132_v14, %v4132_v14 }
 0xe0e   :  { %v8995_v31 = vpop.f32.mrf.mxu1 }
 0xe0f   :  { %v10899_v24 = vpack.c.bf16 %v4124_v53, %v4124_v53  ;;  %v4135_v7 = vadd.f32 %v8995_v31, %v8192_v54 }
 0xe10   :  { %v4126_v15 = vpop.f32.mrf.mxu1 }
 0xe11   :  { %v4127_v58 = vadd.f32 %v8192_v54, %v4126_v15  ;;  %4343 = vrot.lane.b32.xlu0 %v10899_v24, %s9861_s13  ;;  %v10911_v0 = vpack.c.bf16 %v4135_v7, %v4135_v7 }
 0xe13   :  { %v10905_v36 = vpack.c.bf16 %v4127_v58, %v4127_v58 }
 0xe15   :  { %4392 = vrot.lane.b32.xlu1 %v10905_v36, %s9861_s13  ;;  %4441 = vrot.lane.b32.xlu0 %v10903_v27, %s9861_s13 }
 0xe19   :  { %4490 = vrot.lane.b32.xlu1 %v10911_v0, %s9861_s13  ;;  %4682 = vrot.lane.b32.xlu0 %v10889_v17, %s9862_s14 }
 0xe1d   :  { %4634 = vrot.lane.b32.xlu1 %v10883_v49, %s9862_s14 }
 0xe21   :  { %4730 = vrot.lane.b32.xlu1 %v10887_v48, %s9862_s14 }
 0xe25   :  { %4778 = vrot.lane.b32.xlu1 %v10895_v12, %s9862_s14 }
 0xe45   :  { %v4148_v1 = vpop.permute.xlu0 %4147 }
 0xe46   :  { %v4153_v55 = vsel %vm296_vm3, %v4148_v1, 0 }
 0xe47   :  { %8997 = vmatpush3.bf16.xpose.msra.mxu0 %v4153_v55 }
 0xe48   :  { %9008 = vmatprep.subr.bf16.mxu0 %v9859_v37 }
 0xe49   :  { %v4197_v6 = vpop.permute.xlu1 %4196  ;;  %v4246_v23 = vpop.permute.xlu0 %4245 }
 0xe4a   :  { %v4202_v32 = vsel %vm296_vm3, %v4197_v6, 0  ;;  %v4251_v25 = vsel %vm296_vm3, %v4246_v23, 0 }
 0xe4b   :  { %9003 = vmatpush3.bf16.xpose.msra.mxu1 %v4202_v32 }
 0xe4c   :  { %9014 = vmatprep.subr.bf16.mxu1 %v9859_v37 }
 0xe4d   :  { %v4295_v22 = vpop.permute.xlu1 %4294 }
 0xe4e   :  { %8999 = vmatmul.mubr.msk.bf16.vlgmr.msra.gmra.mxu0 %vm296_vm3, %v10883_v49  ;;  %v4300_v35 = vsel %vm296_vm3, %v4295_v22, 0 }
 0xe4f   :  { %9009 = vmatpush3.bf16.xpose.msra.mxu0 %v4251_v25  ;;  %9010 = vmatprep.mubr.msk.bf16.mxu0 %vm9860_vm2, %v9859_v37 }
 0xe50   :  { %9020 = vmatprep.subr.bf16.mxu0 %v9859_v37 }
 0xe52   :  { %9005 = vmatmul.mubr.msk.bf16.vlgmr.msra.gmra.mxu1 %vm296_vm3, %v10889_v17 }
 0xe53   :  { %9015 = vmatpush3.bf16.xpose.msra.mxu1 %v4300_v35  ;;  %9016 = vmatprep.mubr.msk.bf16.mxu1 %vm9860_vm2, %v9859_v37 }
 0xe54   :  { %9026 = vmatprep.subr.bf16.mxu1 %v9859_v37 }
 0xe56   :  { %9011 = vmatmul.mubr.msk.bf16.vlgmr.msra.gmra.mxu0 %vm296_vm3, %v10887_v48 }
 0xe57   :  { %9022 = vmatprep.mubr.msk.bf16.mxu0 %vm9860_vm2, %v9859_v37 }
 0xe5a   :  { %9017 = vmatmul.mubr.msk.bf16.vlgmr.msra.gmra.mxu1 %vm296_vm3, %v10895_v12 }
 0xe5b   :  { %9028 = vmatprep.mubr.msk.bf16.mxu1 %vm9860_vm2, %v9859_v37 }
 0xe83   :  { %v4344_v20 = vpop.permute.xlu0 %4343 }
 0xe84   :  { %v4349_v16 = vsel %vm296_vm3, %v4344_v20, 0 }
 0xe85   :  { %9021 = vmatpush3.bf16.xpose.msra.mxu0 %v4349_v16 }
 0xe86   :  { %9032 = vmatprep.subr.bf16.mxu0 %v9859_v37 }
 0xe87   :  { %v4393_v39 = vpop.permute.xlu1 %4392  ;;  %v4442_v40 = vpop.permute.xlu0 %4441 }
 0xe88   :  { %v4398_v60 = vsel %vm296_vm3, %v4393_v39, 0  ;;  %v4447_v28 = vsel %vm296_vm3, %v4442_v40, 0 }
 0xe89   :  { %9027 = vmatpush3.bf16.xpose.msra.mxu1 %v4398_v60 }
 0xe8a   :  { %9038 = vmatprep.subr.bf16.mxu1 %v9859_v37 }
 0xe8b   :  { %v4491_v18 = vpop.permute.xlu1 %4490  ;;  %v4683_v57 = vpop.permute.xlu0 %4682 }
 0xe8c   :  { %9023 = vmatmul.mubr.msk.bf16.vlgmr.msra.gmra.mxu0 %vm296_vm3, %v10899_v24  ;;  %v4496_v30 = vsel %vm296_vm3, %v4491_v18, 0  ;;  %v4688_v11 = vsel %vm787_vm4, %v4683_v57, 0 }
 0xe8d   :  { %9033 = vmatpush3.bf16.xpose.msra.mxu0 %v4447_v28  ;;  %9034 = vmatprep.mubr.msk.bf16.mxu0 %vm9860_vm2, %v9859_v37 }
 0xe8e   :  { %9044 = vmatprep.subr.bf16.mxu0 %v9859_v37 }
 0xe8f   :  { %v4635_v33 = vpop.permute.xlu1 %4634 }
 0xe90   :  { %9029 = vmatmul.mubr.msk.bf16.vlgmr.msra.gmra.mxu1 %vm296_vm3, %v10905_v36  ;;  %v4640_v45 = vsel %vm787_vm4, %v4635_v33, 0 }
 0xe91   :  { %9039 = vmatpush3.bf16.xpose.msra.mxu1 %v4496_v30  ;;  %9040 = vmatprep.mubr.msk.bf16.mxu1 %vm9860_vm2, %v9859_v37 }
 0xe92   :  { %9050 = vmatprep.subr.bf16.mxu1 %v9859_v37 }
 0xe93   :  { %v10990_v25 = vpop.permute.xlu1 %4730 }
 0xe94   :  { %9035 = vmatmul.mubr.msk.bf16.vlgmr.msra.gmra.mxu0 %vm296_vm3, %v10903_v27 }
 0xe95   :  { %9045 = vmatpush3.bf16.msra.mxu0 %v4640_v45  ;;  %9046 = vmatprep.mubr.msk.bf16.mxu0 %vm9860_vm2, %v9859_v37 }
 0xe96   :  { %9056 = vmatprep.subr.bf16.mxu0 %v9859_v37 }
 0xe97   :  { %v10992_v22 = vpop.permute.xlu1 %4778 }
 0xe98   :  { %9041 = vmatmul.mubr.msk.bf16.vlgmr.msra.gmra.mxu1 %vm296_vm3, %v10911_v0 }
 0xe99   :  { %9051 = vmatpush3.bf16.msra.mxu1 %v4688_v11  ;;  %9052 = vmatprep.mubr.msk.bf16.mxu1 %vm9860_vm2, %v9859_v37 }
 0xe9a   :  { %9062 = vmatprep.subr.bf16.mxu1 %v9859_v37 }
 0xf0e   :  { %v4189_v46 = vpop.f32.mrf.mxu0 }
 0xf0f   :  { %v4538_v42 = vsel %vm296_vm3, %v4189_v46, -inf }
 0xf10   :  { %4539 = vmax.xlane.f32.xlu0 %v4538_v42  ;;  %v9000_v56 = vpop.f32.mrf.mxu0 }
 0xf12   :  { %v4192_v43 = vpop.f32.mrf.mxu0  ;;  %v4238_v41 = vpop.f32.mrf.mxu1 }
 0xf13   :  { %v4541_v51 = vsel %vm296_vm3, %v4238_v41, -inf }
 0xf14   :  { %v9006_v62 = vpop.f32.mrf.mxu1  ;;  %4542 = vmax.xlane.f32.xlu1 %v4541_v51  ;;  %v9001_v61 = vpop.f32.mrf.mxu0 }
 0xf16   :  { %v4241_v2 = vpop.f32.mrf.mxu1  ;;  %v4287_v3 = vpop.f32.mrf.mxu0 }
 0xf17   :  { %v4544_v9 = vsel %vm296_vm3, %v4287_v3, -inf }
 0xf18   :  { %v9007_v44 = vpop.f32.mrf.mxu1  ;;  %4545 = vmax.xlane.f32.xlu0 %v4544_v9  ;;  %v9012_v4 = vpop.f32.mrf.mxu0 }
 0xf1a   :  { %v4290_v26 = vpop.f32.mrf.mxu0  ;;  %v4336_v50 = vpop.f32.mrf.mxu1 }
 0xf1b   :  { %v4547_v59 = vsel %vm296_vm3, %v4336_v50, -inf }
 0xf1c   :  { %v9018_v10 = vpop.f32.mrf.mxu1  ;;  %4548 = vmax.xlane.f32.xlu0 %v4547_v59  ;;  %v9013_v8 = vpop.f32.mrf.mxu0 }
 0xf1e   :  { %v4339_v34 = vpop.f32.mrf.mxu1 }
 0xf20   :  { %v9019_v54 = vpop.f32.mrf.mxu1 }
 0xf4c   :  { %v4385_v38 = vpop.f32.mrf.mxu0 }
 0xf4d   :  { %v4550_v63 = vsel %vm296_vm3, %v4385_v38, -inf }
 0xf4e   :  { %4551 = vmax.xlane.f32.xlu1 %v4550_v63  ;;  %v9024_v52 = vpop.f32.mrf.mxu0 }
 0xf50   :  { %v4388_v21 = vpop.f32.mrf.mxu0  ;;  %v4434_v13 = vpop.f32.mrf.mxu1 }
 0xf51   :  { %v4553_v19 = vsel %vm296_vm3, %v4434_v13, -inf }
 0xf52   :  { %v9030_v29 = vpop.f32.mrf.mxu1  ;;  %4554 = vmax.xlane.f32.xlu0 %v4553_v19  ;;  %v9025_v47 = vpop.f32.mrf.mxu0 }
 0xf54   :  { %v4437_v5 = vpop.f32.mrf.mxu1  ;;  %v10981_v53 = vpop.f32.mrf.mxu0 }
 0xf55   :  { %v4556_v31 = vsel %vm296_vm3, %v10981_v53, -inf }
 0xf56   :  { %v9031_v14 = vpop.f32.mrf.mxu1  ;;  %4557 = vmax.xlane.f32.xlu1 %v4556_v31  ;;  %v9036_v15 = vpop.f32.mrf.mxu0 }
 0xf58   :  { %v4486_v58 = vpop.f32.mrf.mxu0  ;;  %v4532_v7 = vpop.f32.mrf.mxu1 }
 0xf59   :  { %v4559_v1 = vsel %vm296_vm3, %v4532_v7, -inf }
 0xf5a   :  { %v9042_v55 = vpop.f32.mrf.mxu1  ;;  %4560 = vmax.xlane.f32.xlu0 %v4559_v1  ;;  %v9037_v6 = vpop.f32.mrf.mxu0 }
 0xf5b   :  { %v4736_v6 = vsel %vm787_vm4, %v10990_v25, 0  ;;  %v4784_v25 = vsel %vm787_vm4, %v10992_v22, 0 }
 0xf5c   :  { %v4535_v32 = vpop.f32.mrf.mxu1 }
 0xf5e   :  { %v9043_v23 = vpop.f32.mrf.mxu1 }
 0xf67   :  { %4874 = vrot.lane.b32.xlu1 %v10905_v36, %s9862_s14 }
 0xf70   :  { %4826 = vrot.lane.b32.xlu0 %v10899_v24, %s9862_s14 }
 0xf99   :  { %v4540_v35 = vpop.xlane.xlu0 %4539 }
 0xf9a   :  { %v4562_v20 = vsub.f32 %v4189_v46, %v4540_v35 }
 0xf9c   :  { %v4570_v16 = vmul.f32 1.442695, %v4562_v20 }
 0xf9d   :  { %v4543_v39 = vpop.xlane.xlu1 %4542 }
 0xf9e   :  { %9686 = vpow2.f32 %v4570_v16  ;;  %v4563_v60 = vsub.f32 %v4238_v41, %v4543_v39 }
 0xfa0   :  { %v4572_v40 = vmul.f32 1.442695, %v4563_v60 }
 0xfa1   :  { %v4546_v18 = vpop.xlane.xlu0 %4545 }
 0xfa2   :  { %9688 = vpow2.f32 %v4572_v40  ;;  %v4564_v28 = vsub.f32 %v4287_v3, %v4546_v18 }
 0xfa4   :  { %v4574_v30 = vmul.f32 1.442695, %v4564_v28 }
 0xfa5   :  { %v4549_v33 = vpop.xlane.xlu0 %4548 }
 0xfa6   :  { %9690 = vpow2.f32 %v4574_v30  ;;  %v4565_v45 = vsub.f32 %v4336_v50, %v4549_v33 }
 0xfa8   :  { %v4576_v57 = vmul.f32 1.442695, %v4565_v45 }
 0xfaa   :  { %9692 = vpow2.f32 %v4576_v57 }
 0xfab   :  { %v9687_v11 = vpop.eup %9686 }
 0xfac   :  { %v4586_v42 = vsel %vm296_vm3, %v9687_v11, 0.0 }
 0xfad   :  { %4587 = vadd.xlane.f32.xlu1 %v4586_v42 }
 0xfaf   :  { %v10995_v56 = vpop.eup %9688 }
 0xfb0   :  { %v4589_v46 = vsel %vm296_vm3, %v10995_v56, 0.0 }
 0xfb1   :  { %4590 = vadd.xlane.f32.xlu0 %v4589_v46 }
 0xfb3   :  { %v10999_v43 = vpop.eup %9690 }
 0xfb4   :  { %v4592_v41 = vsel %vm296_vm3, %v10999_v43, 0.0 }
 0xfb5   :  { %4593 = vadd.xlane.f32.xlu1 %v4592_v41 }
 0xfb7   :  { %v11003_v51 = vpop.eup %9692 }
 0xfb8   :  { %v4595_v62 = vsel %vm296_vm3, %v11003_v51, 0.0 }
 0xfb9   :  { %4596 = vadd.xlane.f32.xlu0 %v4595_v62 }
 0xfd7   :  { %v4552_v61 = vpop.xlane.xlu1 %4551 }
 0xfd8   :  { %v4566_v2 = vsub.f32 %v4385_v38, %v4552_v61 }
 0xfda   :  { %v4578_v3 = vmul.f32 1.442695, %v4566_v2 }
 0xfdb   :  { %v4555_v9 = vpop.xlane.xlu0 %4554 }
 0xfdc   :  { %9694 = vpow2.f32 %v4578_v3  ;;  %v4567_v44 = vsub.f32 %v4434_v13, %v4555_v9 }
 0xfde   :  { %v4580_v4 = vmul.f32 1.442695, %v4567_v44 }
 0xfdf   :  { %v4558_v8 = vpop.xlane.xlu1 %4557 }
 0xfe0   :  { %9696 = vpow2.f32 %v4580_v4  ;;  %v4568_v34 = vsub.f32 %v10981_v53, %v4558_v8 }
 0xfe2   :  { %v4582_v38 = vmul.f32 1.442695, %v4568_v34 }
 0xfe3   :  { %v4561_v54 = vpop.xlane.xlu0 %4560  ;;  %v4875_v47 = vpop.permute.xlu1 %4874 }
 0xfe4   :  { %v4569_v63 = vsub.f32 %v4532_v7, %v4561_v54  ;;  %9698 = vpow2.f32 %v4582_v38  ;;  %v4880_v18 = vsel %vm787_vm4, %v4875_v47, 0 }
 0xfe6   :  { %v4584_v52 = vmul.f32 1.442695, %v4569_v63 }
 0xfe7   :  { %v4827_v5 = vpop.permute.xlu0 %4826 }
 0xfe8   :  { %9700 = vpow2.f32 %v4584_v52  ;;  %v4832_v22 = vsel %vm787_vm4, %v4827_v5, 0 }
 0xfe9   :  { %v11007_v26 = vpop.eup %9694 }
 0xfea   :  { %v4598_v50 = vsel %vm296_vm3, %v11007_v26, 0.0 }
 0xfeb   :  { %4599 = vadd.xlane.f32.xlu1 %v4598_v50 }
 0xfed   :  { %v11011_v59 = vpop.eup %9696 }
 0xfee   :  { %v4601_v10 = vsel %vm296_vm3, %v11011_v59, 0.0 }
 0xfef   :  { %4602 = vadd.xlane.f32.xlu0 %v4601_v10 }
 0xff1   :  { %v11020_v21 = vpop.eup %9698 }
 0xff2   :  { %v4604_v13 = vsel %vm296_vm3, %v11020_v21, 0.0 }
 0xff5   :  { %v11024_v19 = vpop.eup %9700 }
 0xff6   :  { %v4607_v29 = vsel %vm296_vm3, %v11024_v19, 0.0 }
 0xffc   :  { %4970 = vrot.lane.b32.xlu1 %v10911_v0, %s9862_s14 }
0x1005   :  { %4922 = vrot.lane.b32.xlu0 %v10903_v27, %s9862_s14 }
0x1020   :  { %4605 = vadd.xlane.f32.xlu1 %v4604_v13 }
0x1024   :  { %4608 = vadd.xlane.f32.xlu0 %v4607_v29 }
0x1031   :  { %5070 = vrot.lane.b32.xlu1 %v10889_v17, %s9863_s15 }
0x1035   :  { %5068 = vrot.lane.b32.xlu1 %v10889_v17, %s9864_s16 }
0x1036   :  { %v4588_v53 = vpop.xlane.xlu1 %4587 }
0x1037   :  { %9702 = vrcp.f32 %v4588_v53 }
0x1039   :  { %5170 = vrot.lane.b32.xlu1 %v10895_v12, %s9863_s15 }
0x103a   :  { %5020 = vrot.lane.b32.xlu0 %v10883_v49, %s9863_s15  ;;  %v4591_v31 = vpop.xlane.xlu0 %4590 }
0x103b   :  { %9704 = vrcp.f32 %v4591_v31 }
0x103d   :  { %5168 = vrot.lane.b32.xlu1 %v10895_v12, %s9864_s16 }
0x103e   :  { %5018 = vrot.lane.b32.xlu0 %v10883_v49, %s9864_s16  ;;  %v4594_v14 = vpop.xlane.xlu1 %4593 }
0x103f   :  { %9706 = vrcp.f32 %v4594_v14 }
0x1041   :  { %5270 = vrot.lane.b32.xlu1 %v10905_v36, %s9863_s15 }
0x1042   :  { %5120 = vrot.lane.b32.xlu0 %v10887_v48, %s9863_s15  ;;  %v4597_v15 = vpop.xlane.xlu0 %4596 }
0x1043   :  { %9708 = vrcp.f32 %v4597_v15 }
0x1044   :  { %v9703_v58 = vpop.eup %9702 }
0x1045   :  { %v4618_v7 = vmul.f32 %v9703_v58, %v9687_v11  ;;  %5268 = vrot.lane.b32.xlu1 %v10905_v36, %s9864_s16 }
0x1046   :  { %5118 = vrot.lane.b32.xlu0 %v10887_v48, %s9864_s16 }
0x1047   :  { %v4626_v1 = vpack.c.bf16 %v4618_v7, %v4618_v7 }
0x1048   :  { %v9705_v55 = vpop.eup %9704 }
0x1049   :  { %v4619_v32 = vmul.f32 %v9705_v55, %v10995_v56  ;;  %5370 = vrot.lane.b32.xlu1 %v10911_v0, %s9863_s15  ;;  %9047 = vmatmul.mubr.msk.bf16.vlgmr.msra.gmra.mxu0 %vm296_vm3, %v4626_v1 }
0x104a   :  { %9057 = vmatpush3.bf16.msra.mxu0 %v4736_v6  ;;  %5220 = vrot.lane.b32.xlu0 %v10899_v24, %s9863_s15 }
0x104b   :  { %v4627_v23 = vpack.c.bf16 %v4619_v32, %v4619_v32  ;;  %9058 = vmatprep.mubr.msk.bf16.mxu0 %vm9860_vm2, %v9859_v37  ;;  %9068 = vmatprep.subr.bf16.mxu0 %v9859_v37 }
0x104c   :  { %v9707_v35 = vpop.eup %9706 }
0x104d   :  { %v4620_v20 = vmul.f32 %v9707_v35, %v10999_v43  ;;  %5368 = vrot.lane.b32.xlu1 %v10911_v0, %s9864_s16  ;;  %9053 = vmatmul.mubr.msk.bf16.vlgmr.msra.gmra.mxu1 %vm296_vm3, %v4627_v23 }
0x104e   :  { %5218 = vrot.lane.b32.xlu0 %v10899_v24, %s9864_s16  ;;  %9063 = vmatpush3.bf16.msra.mxu1 %v4784_v25 }
0x104f   :  { %v4628_v16 = vpack.c.bf16 %v4620_v20, %v4620_v20  ;;  %9064 = vmatprep.mubr.msk.bf16.mxu1 %vm9860_vm2, %v9859_v37  ;;  %9074 = vmatprep.subr.bf16.mxu1 %v9859_v37 }
0x1050   :  { %v9709_v39 = vpop.eup %9708 }
0x1051   :  { %v4621_v60 = vmul.f32 %v9709_v39, %v11003_v51  ;;  %5514 = vrot.lane.b32.xlu1 %v10883_v49, %s9865_s17  ;;  %9059 = vmatmul.mubr.msk.bf16.vlgmr.msra.gmra.mxu0 %vm296_vm3, %v4628_v16 }
0x1052   :  { %5320 = vrot.lane.b32.xlu0 %v10903_v27, %s9863_s15  ;;  %9069 = vmatpush3.bf16.msra.mxu0 %v4832_v22 }
0x1053   :  { %v4629_v40 = vpack.c.bf16 %v4621_v60, %v4621_v60  ;;  %9070 = vmatprep.mubr.msk.bf16.mxu0 %vm9860_vm2, %v9859_v37  ;;  %9080 = vmatprep.subr.bf16.mxu0 %v9859_v37 }
0x1055   :  { %5610 = vrot.lane.b32.xlu1 %v10887_v48, %s9865_s17  ;;  %9065 = vmatmul.mubr.msk.bf16.vlgmr.msra.gmra.mxu1 %vm296_vm3, %v4629_v40 }
0x1056   :  { %5318 = vrot.lane.b32.xlu0 %v10903_v27, %s9864_s16  ;;  %9075 = vmatpush3.bf16.msra.mxu1 %v4880_v18 }
0x1057   :  { %9076 = vmatprep.mubr.msk.bf16.mxu1 %vm9860_vm2, %v9859_v37  ;;  %9086 = vmatprep.subr.bf16.mxu1 %v9859_v37 }
0x1059   :  { %5658 = vrot.lane.b32.xlu1 %v10895_v12, %s9865_s17 }
0x105a   :  { %5562 = vrot.lane.b32.xlu0 %v10889_v17, %s9865_s17 }
0x1074   :  { %v4600_v28 = vpop.xlane.xlu1 %4599 }
0x1075   :  { %9710 = vrcp.f32 %v4600_v28 }
0x1078   :  { %v4603_v30 = vpop.xlane.xlu0 %4602  ;;  %v4971_v43 = vpop.permute.xlu1 %4970 }
0x1079   :  { %9712 = vrcp.f32 %v4603_v30  ;;  %v4976_v51 = vsel %vm787_vm4, %v4971_v43, 0 }
0x107c   :  { %v4923_v57 = vpop.permute.xlu0 %4922 }
0x107d   :  { %v4928_v46 = vsel %vm787_vm4, %v4923_v57, 0 }
0x1082   :  { %v9711_v33 = vpop.eup %9710 }
0x1083   :  { %v4622_v45 = vmul.f32 %v9711_v33, %v11007_v26 }
0x1085   :  { %v4630_v11 = vpack.c.bf16 %v4622_v45, %v4622_v45 }
0x1086   :  { %v9713_v42 = vpop.eup %9712 }
0x1087   :  { %v4623_v56 = vmul.f32 %v9713_v42, %v11011_v59  ;;  %9071 = vmatmul.mubr.msk.bf16.vlgmr.msra.gmra.mxu0 %vm296_vm3, %v4630_v11 }
0x1088   :  { %9081 = vmatpush3.bf16.msra.mxu0 %v4928_v46  ;;  %9082 = vmatprep.mubr.msk.bf16.mxu0 %vm9860_vm2, %v9859_v37 }
0x1089   :  { %v4631_v41 = vpack.c.bf16 %v4623_v56, %v4623_v56  ;;  %9092 = vmatprep.subr.bf16.mxu0 %v9859_v37 }
0x108b   :  { %9077 = vmatmul.mubr.msk.bf16.vlgmr.msra.gmra.mxu1 %vm296_vm3, %v4631_v41 }
0x108c   :  { %9087 = vmatpush3.bf16.msra.mxu1 %v4976_v51  ;;  %9088 = vmatprep.mubr.msk.bf16.mxu1 %vm9860_vm2, %v9859_v37 }
0x108d   :  { %9098 = vmatprep.subr.bf16.mxu1 %v9859_v37 }
0x10a9   :  { %v4606_v62 = vpop.xlane.xlu1 %4605 }
0x10aa   :  { %9714 = vrcp.f32 %v4606_v62 }
0x10ad   :  { %v5071_v61 = vpop.permute.xlu1 %5070  ;;  %v4609_v2 = vpop.xlane.xlu0 %4608 }
0x10ae   :  { %9716 = vrcp.f32 %v4609_v2 }
0x10b1   :  { %v5069_v3 = vpop.permute.xlu1 %5068  ;;  %v5021_v9 = vpop.permute.xlu0 %5020 }
0x10b2   :  { %v5026_v38 = vsel %vm296_vm3, %v5021_v9, 0 }
0x10b5   :  { %v5171_v44 = vpop.permute.xlu1 %5170  ;;  %v5019_v4 = vpop.permute.xlu0 %5018 }
0x10b6   :  { %v5176_v5 = vsel %vm296_vm3, %v5171_v44, 0 }
0x10b7   :  { %v9715_v26 = vpop.eup %9714 }
0x10b8   :  { %v4624_v50 = vmul.f32 %v9715_v26, %v11020_v21  ;;  %v5076_v21 = vsel %vm296_vm3, %v5071_v61, 0 }
0x10b9   :  { %v5121_v59 = vpop.permute.xlu0 %5120  ;;  %v5169_v34 = vpop.permute.xlu1 %5168 }
0x10ba   :  { %v4632_v10 = vpack.c.bf16 %v4624_v50, %v4624_v50 }
0x10bb   :  { %v9717_v8 = vpop.eup %9716 }
0x10bc   :  { %v4625_v54 = vmul.f32 %v9717_v8, %v11024_v19  ;;  %9083 = vmatmul.mubr.msk.bf16.vlgmr.msra.gmra.mxu0 %vm296_vm3, %v4632_v10  ;;  %v5126_v19 = vsel %vm296_vm3, %v5121_v59, 0 }
0x10bd   :  { %9093 = vmatpush3.bf16.xpose.msra.mxu0 %v5026_v38  ;;  %9094 = vmatprep.mubr.msk.bf16.mxu0 %vm9860_vm2, %v9859_v37  ;;  %v5119_v52 = vpop.permute.xlu0 %5118  ;;  %v5271_v13 = vpop.permute.xlu1 %5270 }
0x10be   :  { %v4633_v63 = vpack.c.bf16 %v4625_v54, %v4625_v54  ;;  %9104 = vmatprep.subr.bf16.mxu0 %v9859_v37  ;;  %v5276_v15 = vsel %vm296_vm3, %v5271_v13, 0 }
0x10c0   :  { %9089 = vmatmul.mubr.msk.bf16.vlgmr.msra.gmra.mxu1 %vm296_vm3, %v4633_v63 }
0x10c1   :  { %9099 = vmatpush3.bf16.xpose.msra.mxu1 %v5076_v21  ;;  %9100 = vmatprep.mubr.msk.bf16.mxu1 %vm9860_vm2, %v9859_v37  ;;  %v5221_v29 = vpop.permute.xlu0 %5220  ;;  %v5269_v47 = vpop.permute.xlu1 %5268 }
0x10c2   :  { %9110 = vmatprep.subr.bf16.mxu1 %v9859_v37  ;;  %v5226_v31 = vsel %vm296_vm3, %v5221_v29, 0 }
0x10c4   :  { %9095 = vmatmul.mubr.msk.bf16.vlgmr.msra.gmra.mxu0 %vm296_vm3, %v5019_v4 }
0x10c5   :  { %9105 = vmatpush3.bf16.xpose.msra.mxu0 %v5126_v19  ;;  %9106 = vmatprep.mubr.msk.bf16.mxu0 %vm9860_vm2, %v9859_v37  ;;  %v5219_v53 = vpop.permute.xlu0 %5218  ;;  %v5371_v14 = vpop.permute.xlu1 %5370 }
0x10c6   :  { %9116 = vmatprep.subr.bf16.mxu0 %v9859_v37  ;;  %v5376_v6 = vsel %vm296_vm3, %v5371_v14, 0 }
0x10c8   :  { %9101 = vmatmul.mubr.msk.bf16.vlgmr.msra.gmra.mxu1 %vm296_vm3, %v5069_v3 }
0x10c9   :  { %9111 = vmatpush3.bf16.xpose.msra.mxu1 %v5176_v5  ;;  %9112 = vmatprep.mubr.msk.bf16.mxu1 %vm9860_vm2, %v9859_v37  ;;  %v5321_v58 = vpop.permute.xlu0 %5320  ;;  %v5369_v7 = vpop.permute.xlu1 %5368 }
0x10ca   :  { %9122 = vmatprep.subr.bf16.mxu1 %v9859_v37  ;;  %v5326_v1 = vsel %vm296_vm3, %v5321_v58, 0 }
0x10cc   :  { %9107 = vmatmul.mubr.msk.bf16.vlgmr.msra.gmra.mxu0 %vm296_vm3, %v5119_v52 }
0x10cd   :  { %9117 = vmatpush3.bf16.xpose.msra.mxu0 %v5226_v31  ;;  %9118 = vmatprep.mubr.msk.bf16.mxu0 %vm9860_vm2, %v9859_v37  ;;  %v5319_v55 = vpop.permute.xlu0 %5318  ;;  %v5515_v32 = vpop.permute.xlu1 %5514 }
0x10ce   :  { %9128 = vmatprep.subr.bf16.mxu0 %v9859_v37  ;;  %v5520_v23 = vsel %vm787_vm4, %v5515_v32, 0 }
0x10d0   :  { %9113 = vmatmul.mubr.msk.bf16.vlgmr.msra.gmra.mxu1 %vm296_vm3, %v5169_v34 }
0x10d1   :  { %9123 = vmatpush3.bf16.xpose.msra.mxu1 %v5276_v15  ;;  %9124 = vmatprep.mubr.msk.bf16.mxu1 %vm9860_vm2, %v9859_v37  ;;  %v5563_v35 = vpop.permute.xlu0 %5562 }
0x10d2   :  { %9134 = vmatprep.subr.bf16.mxu1 %v9859_v37  ;;  %v5568_v25 = vsel %vm787_vm4, %v5563_v35, 0 }
0x10d4   :  { %9119 = vmatmul.mubr.msk.bf16.vlgmr.msra.gmra.mxu0 %vm296_vm3, %v5219_v53 }
0x10d5   :  { %9129 = vmatpush3.bf16.xpose.msra.mxu0 %v5326_v1  ;;  %9130 = vmatprep.mubr.msk.bf16.mxu0 %vm9860_vm2, %v9859_v37 }
0x10d6   :  { %9140 = vmatprep.subr.bf16.mxu0 %v9859_v37 }
0x10d8   :  { %9125 = vmatmul.mubr.msk.bf16.vlgmr.msra.gmra.mxu1 %vm296_vm3, %v5269_v47 }
0x10d9   :  { %9135 = vmatpush3.bf16.xpose.msra.mxu1 %v5376_v6  ;;  %9136 = vmatprep.mubr.msk.bf16.mxu1 %vm9860_vm2, %v9859_v37 }
0x10da   :  { %9146 = vmatprep.subr.bf16.mxu1 %v9859_v37 }
0x10dc   :  { %9131 = vmatmul.mubr.msk.bf16.vlgmr.msra.gmra.mxu0 %vm296_vm3, %v5319_v55 }
0x10dd   :  { %9141 = vmatpush3.bf16.msra.mxu0 %v5520_v23  ;;  %9142 = vmatprep.mubr.msk.bf16.mxu0 %vm9860_vm2, %v9859_v37 }
0x10de   :  { %9152 = vmatprep.subr.bf16.mxu0 %v9859_v37 }
0x10e0   :  { %9137 = vmatmul.mubr.msk.bf16.vlgmr.msra.gmra.mxu1 %vm296_vm3, %v5369_v7 }
0x10e1   :  { %9147 = vmatpush3.bf16.msra.mxu1 %v5568_v25  ;;  %9148 = vmatprep.mubr.msk.bf16.mxu1 %vm9860_vm2, %v9859_v37 }
0x10e2   :  { %9158 = vmatprep.subr.bf16.mxu1 %v9859_v37 }
0x1109   :  { %v11157_v20 = vpop.f32.mrf.mxu0 }
0x110b   :  { %v9048_v16 = vpop.f32.mrf.mxu0 }
0x110d   :  { %v4679_v39 = vpop.f32.mrf.mxu0  ;;  %v11159_v22 = vpop.f32.mrf.mxu1 }
0x110f   :  { %v9049_v60 = vpop.f32.mrf.mxu0  ;;  %v9054_v40 = vpop.f32.mrf.mxu1 }
0x1111   :  { %v4727_v18 = vpop.f32.mrf.mxu1  ;;  %v11161_v28 = vpop.f32.mrf.mxu0 }
0x1113   :  { %v9055_v30 = vpop.f32.mrf.mxu1  ;;  %v9060_v33 = vpop.f32.mrf.mxu0 }
0x1115   :  { %v4775_v45 = vpop.f32.mrf.mxu0  ;;  %v11163_v57 = vpop.f32.mrf.mxu1 }
0x1117   :  { %v9061_v11 = vpop.f32.mrf.mxu0  ;;  %v9066_v42 = vpop.f32.mrf.mxu1 }
0x1119   :  { %v4823_v56 = vpop.f32.mrf.mxu1 }
0x111b   :  { %v9067_v46 = vpop.f32.mrf.mxu1 }
0x1147   :  { %v11165_v43 = vpop.f32.mrf.mxu0 }
0x1149   :  { %v9072_v41 = vpop.f32.mrf.mxu0 }
0x114b   :  { %v4871_v51 = vpop.f32.mrf.mxu0  ;;  %v11167_v62 = vpop.f32.mrf.mxu1 }
0x114d   :  { %v9073_v61 = vpop.f32.mrf.mxu0  ;;  %v9078_v2 = vpop.f32.mrf.mxu1 }
0x114f   :  { %v4919_v3 = vpop.f32.mrf.mxu1 }
0x1151   :  { %v9079_v9 = vpop.f32.mrf.mxu1 }
0x1152   :  { %v11188_v9 = vpop.permute.xlu1 %5610 }
0x117c   :  { %v11169_v44 = vpop.f32.mrf.mxu0 }
0x117e   :  { %v9084_v4 = vpop.f32.mrf.mxu0 }
0x117f   :  { %v11190_v4 = vpop.permute.xlu1 %5658 }
0x1180   :  { %v4967_v26 = vpop.f32.mrf.mxu0  ;;  %v11171_v50 = vpop.f32.mrf.mxu1 }
0x1182   :  { %v9085_v59 = vpop.f32.mrf.mxu0  ;;  %v9090_v10 = vpop.f32.mrf.mxu1 }
0x1184   :  { %v5015_v8 = vpop.f32.mrf.mxu1  ;;  %v5062_v34 = vpop.f32.mrf.mxu0 }
0x1185   :  { %v5418_v54 = vsel %vm296_vm3, %v5062_v34, -inf }
0x1186   :  { %v9091_v38 = vpop.f32.mrf.mxu1  ;;  %5419 = vmax.xlane.f32.xlu0 %v5418_v54  ;;  %v9096_v63 = vpop.f32.mrf.mxu0 }
0x1188   :  { %v5065_v52 = vpop.f32.mrf.mxu0  ;;  %v5112_v21 = vpop.f32.mrf.mxu1 }
0x1189   :  { %v5421_v13 = vsel %vm296_vm3, %v5112_v21, -inf }
0x118a   :  { %5422 = vmax.xlane.f32.xlu1 %v5421_v13  ;;  %v9097_v19 = vpop.f32.mrf.mxu0  ;;  %v9102_v29 = vpop.f32.mrf.mxu1 }
0x118c   :  { %v5115_v47 = vpop.f32.mrf.mxu1  ;;  %v5162_v5 = vpop.f32.mrf.mxu0 }
0x118d   :  { %v5424_v53 = vsel %vm296_vm3, %v5162_v5, -inf }
0x118e   :  { %v9103_v31 = vpop.f32.mrf.mxu1  ;;  %5425 = vmax.xlane.f32.xlu0 %v5424_v53  ;;  %v9108_v14 = vpop.f32.mrf.mxu0 }
0x1190   :  { %v5165_v15 = vpop.f32.mrf.mxu0  ;;  %v5212_v58 = vpop.f32.mrf.mxu1 }
0x1191   :  { %v5427_v7 = vsel %vm296_vm3, %v5212_v58, -inf }
0x1192   :  { %v9114_v1 = vpop.f32.mrf.mxu1  ;;  %5428 = vmax.xlane.f32.xlu0 %v5427_v7  ;;  %v9109_v55 = vpop.f32.mrf.mxu0 }
0x1194   :  { %v5215_v6 = vpop.f32.mrf.mxu1  ;;  %v5262_v32 = vpop.f32.mrf.mxu0 }
0x1195   :  { %v5430_v23 = vsel %vm296_vm3, %v5262_v32, -inf }
0x1196   :  { %v9115_v35 = vpop.f32.mrf.mxu1  ;;  %5431 = vmax.xlane.f32.xlu1 %v5430_v23  ;;  %v9120_v25 = vpop.f32.mrf.mxu0 }
0x1198   :  { %v5265_v16 = vpop.f32.mrf.mxu0  ;;  %v5312_v39 = vpop.f32.mrf.mxu1 }
0x1199   :  { %v5433_v60 = vsel %vm296_vm3, %v5312_v39, -inf }
0x119a   :  { %v9126_v40 = vpop.f32.mrf.mxu1  ;;  %5434 = vmax.xlane.f32.xlu0 %v5433_v60  ;;  %v9121_v18 = vpop.f32.mrf.mxu0 }
0x119c   :  { %v5315_v30 = vpop.f32.mrf.mxu1  ;;  %v11179_v33 = vpop.f32.mrf.mxu0 }
0x119d   :  { %v5436_v45 = vsel %vm296_vm3, %v11179_v33, -inf }
0x119e   :  { %v9127_v11 = vpop.f32.mrf.mxu1  ;;  %5437 = vmax.xlane.f32.xlu1 %v5436_v45  ;;  %v9132_v42 = vpop.f32.mrf.mxu0 }
0x11a0   :  { %v5365_v56 = vpop.f32.mrf.mxu0  ;;  %v5412_v46 = vpop.f32.mrf.mxu1 }
0x11a1   :  { %v5439_v41 = vsel %vm296_vm3, %v5412_v46, -inf }
0x11a2   :  { %v9138_v51 = vpop.f32.mrf.mxu1  ;;  %5440 = vmax.xlane.f32.xlu0 %v5439_v41  ;;  %v9133_v61 = vpop.f32.mrf.mxu0 }
0x11a4   :  { %v5415_v2 = vpop.f32.mrf.mxu1 }
0x11a6   :  { %v9139_v3 = vpop.f32.mrf.mxu1 }
0x11af   :  { %5754 = vrot.lane.b32.xlu1 %v10905_v36, %s9865_s17 }
0x11b8   :  { %5706 = vrot.lane.b32.xlu0 %v10899_v24, %s9865_s17 }
0x120f   :  { %v5420_v26 = vpop.xlane.xlu0 %5419 }
0x1210   :  { %v5442_v59 = vsub.f32 %v5062_v34, %v5420_v26 }
0x1212   :  { %v5450_v10 = vmul.f32 1.442695, %v5442_v59 }
0x1213   :  { %v5423_v8 = vpop.xlane.xlu1 %5422 }
0x1214   :  { %9718 = vpow2.f32 %v5450_v10  ;;  %v5443_v54 = vsub.f32 %v5112_v21, %v5423_v8 }
0x1216   :  { %v5452_v38 = vmul.f32 1.442695, %v5443_v54 }
0x1217   :  { %v5426_v63 = vpop.xlane.xlu0 %5425 }
0x1218   :  { %9720 = vpow2.f32 %v5452_v38  ;;  %v5444_v52 = vsub.f32 %v5162_v5, %v5426_v63  ;;  %v5616_v63 = vsel %vm787_vm4, %v11188_v9, 0 }
0x121a   :  { %v5454_v13 = vmul.f32 1.442695, %v5444_v52 }
0x121b   :  { %v5429_v19 = vpop.xlane.xlu0 %5428 }
0x121c   :  { %9722 = vpow2.f32 %v5454_v13  ;;  %v5445_v29 = vsub.f32 %v5212_v58, %v5429_v19 }
0x121e   :  { %v5456_v47 = vmul.f32 1.442695, %v5445_v29 }
0x121f   :  { %v5432_v53 = vpop.xlane.xlu1 %5431 }
0x1220   :  { %9724 = vpow2.f32 %v5456_v47  ;;  %v5446_v31 = vsub.f32 %v5262_v32, %v5432_v53  ;;  %v5664_v47 = vsel %vm787_vm4, %v11190_v4, 0 }
0x1221   :  { %v11192_v14 = vpop.eup %9718 }
0x1222   :  { %v5458_v15 = vmul.f32 1.442695, %v5446_v31  ;;  %v5466_v34 = vsel %vm296_vm3, %v11192_v14, 0.0 }
0x1223   :  { %5467 = vadd.xlane.f32.xlu1 %v5466_v34  ;;  %v5435_v21 = vpop.xlane.xlu0 %5434 }
0x1224   :  { %9726 = vpow2.f32 %v5458_v15  ;;  %v5447_v7 = vsub.f32 %v5312_v39, %v5435_v21 }
0x1225   :  { %v11196_v1 = vpop.eup %9720 }
0x1226   :  { %v5460_v5 = vmul.f32 1.442695, %v5447_v7  ;;  %v5469_v58 = vsel %vm296_vm3, %v11196_v1, 0.0 }
0x1227   :  { %5470 = vadd.xlane.f32.xlu0 %v5469_v58  ;;  %v5438_v60 = vpop.xlane.xlu1 %5437 }
0x1228   :  { %9728 = vpow2.f32 %v5460_v5  ;;  %v5448_v40 = vsub.f32 %v11179_v33, %v5438_v60 }
0x1229   :  { %v11200_v55 = vpop.eup %9722 }
0x122a   :  { %v5472_v6 = vsel %vm296_vm3, %v11200_v55, 0.0  ;;  %v5462_v30 = vmul.f32 1.442695, %v5448_v40 }
0x122b   :  { %5473 = vadd.xlane.f32.xlu1 %v5472_v6  ;;  %v5441_v18 = vpop.xlane.xlu0 %5440  ;;  %v5755_v33 = vpop.permute.xlu1 %5754 }
0x122c   :  { %v5449_v45 = vsub.f32 %v5412_v46, %v5441_v18  ;;  %9730 = vpow2.f32 %v5462_v30  ;;  %v5760_v21 = vsel %vm787_vm4, %v5755_v33, 0 }
0x122d   :  { %v11204_v32 = vpop.eup %9724 }
0x122e   :  { %v5475_v23 = vsel %vm296_vm3, %v11204_v32, 0.0  ;;  %v5464_v11 = vmul.f32 1.442695, %v5449_v45 }
0x122f   :  { %5476 = vadd.xlane.f32.xlu0 %v5475_v23  ;;  %v5707_v46 = vpop.permute.xlu0 %5706 }
0x1230   :  { %9732 = vpow2.f32 %v5464_v11 }
0x1231   :  { %v11208_v35 = vpop.eup %9726 }
0x1232   :  { %v5478_v25 = vsel %vm296_vm3, %v11208_v35, 0.0 }
0x1233   :  { %5479 = vadd.xlane.f32.xlu1 %v5478_v25 }
0x1235   :  { %v11212_v16 = vpop.eup %9728 }
0x1236   :  { %v5481_v39 = vsel %vm296_vm3, %v11212_v16, 0.0 }
0x1237   :  { %5482 = vadd.xlane.f32.xlu0 %v5481_v39 }
0x1239   :  { %v11221_v42 = vpop.eup %9730 }
0x123a   :  { %v5484_v56 = vsel %vm296_vm3, %v11221_v42, 0.0 }
0x123d   :  { %v11225_v41 = vpop.eup %9732 }
0x123e   :  { %v5487_v51 = vsel %vm296_vm3, %v11225_v41, 0.0 }
0x1244   :  { %5850 = vrot.lane.b32.xlu1 %v10911_v0, %s9865_s17 }
0x124d   :  { %5802 = vrot.lane.b32.xlu0 %v10903_v27, %s9865_s17 }
0x1268   :  { %5485 = vadd.xlane.f32.xlu1 %v5484_v56 }
0x126c   :  { %5488 = vadd.xlane.f32.xlu0 %v5487_v51 }
0x1279   :  { %5950 = vrot.lane.b32.xlu1 %v10889_v17, %s9866_s18 }
0x127d   :  { %5948 = vrot.lane.b32.xlu1 %v10889_v17, %s9867_s19 }
0x1281   :  { %6050 = vrot.lane.b32.xlu1 %v10895_v12, %s9866_s18 }
0x1282   :  { %5900 = vrot.lane.b32.xlu0 %v10883_v49, %s9866_s18 }
0x1285   :  { %6048 = vrot.lane.b32.xlu1 %v10895_v12, %s9867_s19 }
0x1286   :  { %5898 = vrot.lane.b32.xlu0 %v10883_v49, %s9867_s19 }
0x1289   :  { %6150 = vrot.lane.b32.xlu1 %v10905_v36, %s9866_s18 }
0x128a   :  { %6000 = vrot.lane.b32.xlu0 %v10887_v48, %s9866_s18 }
0x128d   :  { %6148 = vrot.lane.b32.xlu1 %v10905_v36, %s9867_s19 }
0x128e   :  { %5998 = vrot.lane.b32.xlu0 %v10887_v48, %s9867_s19 }
0x1291   :  { %6250 = vrot.lane.b32.xlu1 %v10911_v0, %s9866_s18 }
0x1292   :  { %6100 = vrot.lane.b32.xlu0 %v10899_v24, %s9866_s18 }
0x1295   :  { %6248 = vrot.lane.b32.xlu1 %v10911_v0, %s9867_s19 }
0x1296   :  { %6098 = vrot.lane.b32.xlu0 %v10899_v24, %s9867_s19 }
0x1299   :  { %6394 = vrot.lane.b32.xlu1 %v10883_v49, %s9868_s20 }
0x129a   :  { %6200 = vrot.lane.b32.xlu0 %v10903_v27, %s9866_s18 }
0x129d   :  { %6490 = vrot.lane.b32.xlu1 %v10887_v48, %s9868_s20 }
0x129e   :  { %6198 = vrot.lane.b32.xlu0 %v10903_v27, %s9867_s19 }
0x12a1   :  { %6538 = vrot.lane.b32.xlu1 %v10895_v12, %s9868_s20 }
0x12a2   :  { %6442 = vrot.lane.b32.xlu0 %v10889_v17, %s9868_s20 }
0x12ac   :  { %v5468_v61 = vpop.xlane.xlu1 %5467 }
0x12ad   :  { %9734 = vrcp.f32 %v5468_v61 }
0x12b0   :  { %v5471_v2 = vpop.xlane.xlu0 %5470 }
0x12b1   :  { %9736 = vrcp.f32 %v5471_v2 }
0x12b4   :  { %v5474_v3 = vpop.xlane.xlu1 %5473 }
0x12b5   :  { %9738 = vrcp.f32 %v5474_v3 }
0x12b8   :  { %v5477_v26 = vpop.xlane.xlu0 %5476 }
0x12b9   :  { %9740 = vrcp.f32 %v5477_v26 }
0x12ba   :  { %v9735_v59 = vpop.eup %9734 }
0x12bb   :  { %v5498_v10 = vmul.f32 %v9735_v59, %v11192_v14  ;;  %v5712_v14 = vsel %vm787_vm4, %v5707_v46, 0 }
0x12bc   :  { %v5480_v8 = vpop.xlane.xlu1 %5479 }
0x12bd   :  { %v5506_v54 = vpack.c.bf16 %v5498_v10, %v5498_v10  ;;  %9742 = vrcp.f32 %v5480_v8 }
0x12be   :  { %v9737_v38 = vpop.eup %9736 }
0x12bf   :  { %v5499_v52 = vmul.f32 %v9737_v38, %v11196_v1  ;;  %9143 = vmatmul.mubr.msk.bf16.vlgmr.msra.gmra.mxu0 %vm296_vm3, %v5506_v54 }
0x12c0   :  { %9153 = vmatpush3.bf16.msra.mxu0 %v5616_v63  ;;  %v5483_v13 = vpop.xlane.xlu0 %5482  ;;  %9154 = vmatprep.mubr.msk.bf16.mxu0 %vm9860_vm2, %v9859_v37 }
0x12c1   :  { %v5507_v19 = vpack.c.bf16 %v5499_v52, %v5499_v52  ;;  %9744 = vrcp.f32 %v5483_v13  ;;  %9164 = vmatprep.subr.bf16.mxu0 %v9859_v37 }
0x12c2   :  { %v9739_v29 = vpop.eup %9738 }
0x12c3   :  { %v5500_v53 = vmul.f32 %v9739_v29, %v11200_v55  ;;  %9149 = vmatmul.mubr.msk.bf16.vlgmr.msra.gmra.mxu1 %vm296_vm3, %v5507_v19 }
0x12c4   :  { %9159 = vmatpush3.bf16.msra.mxu1 %v5664_v47  ;;  %9160 = vmatprep.mubr.msk.bf16.mxu1 %vm9860_vm2, %v9859_v37  ;;  %v5803_v1 = vpop.permute.xlu0 %5802 }
0x12c5   :  { %v5508_v9 = vpack.c.bf16 %v5500_v53, %v5500_v53  ;;  %9170 = vmatprep.subr.bf16.mxu1 %v9859_v37  ;;  %v5808_v6 = vsel %vm787_vm4, %v5803_v1, 0 }
0x12c6   :  { %v9741_v31 = vpop.eup %9740 }
0x12c7   :  { %v5501_v15 = vmul.f32 %v9741_v31, %v11204_v32  ;;  %9155 = vmatmul.mubr.msk.bf16.vlgmr.msra.gmra.mxu0 %vm296_vm3, %v5508_v9  ;;  %v5851_v32 = vpop.permute.xlu1 %5850 }
0x12c8   :  { %9165 = vmatpush3.bf16.msra.mxu0 %v5712_v14  ;;  %9166 = vmatprep.mubr.msk.bf16.mxu0 %vm9860_vm2, %v9859_v37 }
0x12c9   :  { %v5509_v4 = vpack.c.bf16 %v5501_v15, %v5501_v15  ;;  %9176 = vmatprep.subr.bf16.mxu0 %v9859_v37 }
0x12ca   :  { %v9743_v34 = vpop.eup %9742 }
0x12cb   :  { %v5502_v7 = vmul.f32 %v9743_v34, %v11208_v35  ;;  %9161 = vmatmul.mubr.msk.bf16.vlgmr.msra.gmra.mxu1 %vm296_vm3, %v5509_v4  ;;  %v5856_v35 = vsel %vm787_vm4, %v5851_v32, 0 }
0x12cc   :  { %9171 = vmatpush3.bf16.msra.mxu1 %v5760_v21  ;;  %9172 = vmatprep.mubr.msk.bf16.mxu1 %vm9860_vm2, %v9859_v37 }
0x12cd   :  { %v5510_v5 = vpack.c.bf16 %v5502_v7, %v5502_v7  ;;  %9182 = vmatprep.subr.bf16.mxu1 %v9859_v37 }
0x12ce   :  { %v9745_v58 = vpop.eup %9744 }
0x12cf   :  { %v5503_v55 = vmul.f32 %v9745_v58, %v11212_v16  ;;  %9167 = vmatmul.mubr.msk.bf16.vlgmr.msra.gmra.mxu0 %vm296_vm3, %v5510_v5 }
0x12d0   :  { %9177 = vmatpush3.bf16.msra.mxu0 %v5808_v6  ;;  %9178 = vmatprep.mubr.msk.bf16.mxu0 %vm9860_vm2, %v9859_v37 }
0x12d1   :  { %v5511_v23 = vpack.c.bf16 %v5503_v55, %v5503_v55  ;;  %9188 = vmatprep.subr.bf16.mxu0 %v9859_v37 }
0x12d3   :  { %9173 = vmatmul.mubr.msk.bf16.vlgmr.msra.gmra.mxu1 %vm296_vm3, %v5511_v23 }
0x12d4   :  { %9183 = vmatpush3.bf16.msra.mxu1 %v5856_v35  ;;  %9184 = vmatprep.mubr.msk.bf16.mxu1 %vm9860_vm2, %v9859_v37 }
0x12d5   :  { %9194 = vmatprep.subr.bf16.mxu1 %v9859_v37 }
0x12f1   :  { %v5486_v25 = vpop.xlane.xlu1 %5485 }
0x12f2   :  { %9746 = vrcp.f32 %v5486_v25 }
0x12f5   :  { %v5951_v16 = vpop.permute.xlu1 %5950  ;;  %v5489_v39 = vpop.xlane.xlu0 %5488 }
0x12f6   :  { %9748 = vrcp.f32 %v5489_v39 }
0x12f9   :  { %v5949_v60 = vpop.permute.xlu1 %5948  ;;  %v5901_v40 = vpop.permute.xlu0 %5900 }
0x12fa   :  { %v5906_v2 = vsel %vm296_vm3, %v5901_v40, 0 }
0x12fd   :  { %v6051_v18 = vpop.permute.xlu1 %6050  ;;  %v5899_v30 = vpop.permute.xlu0 %5898 }
0x12fe   :  { %v6056_v54 = vsel %vm296_vm3, %v6051_v18, 0 }
0x12ff   :  { %v9747_v45 = vpop.eup %9746 }
0x1300   :  { %v5504_v11 = vmul.f32 %v9747_v45, %v11221_v42  ;;  %v5956_v42 = vsel %vm296_vm3, %v5951_v16, 0 }
0x1301   :  { %v6001_v56 = vpop.permute.xlu0 %6000  ;;  %v6049_v46 = vpop.permute.xlu1 %6048 }
0x1302   :  { %v5512_v51 = vpack.c.bf16 %v5504_v11, %v5504_v11 }
0x1303   :  { %v9749_v33 = vpop.eup %9748 }
0x1304   :  { %v5505_v61 = vmul.f32 %v9749_v33, %v11225_v41  ;;  %9179 = vmatmul.mubr.msk.bf16.vlgmr.msra.gmra.mxu0 %vm296_vm3, %v5512_v51  ;;  %v6006_v41 = vsel %vm296_vm3, %v6001_v56, 0 }
0x1305   :  { %9189 = vmatpush3.bf16.xpose.msra.mxu0 %v5906_v2  ;;  %9190 = vmatprep.mubr.msk.bf16.mxu0 %vm9860_vm2, %v9859_v37  ;;  %v5999_v26 = vpop.permute.xlu0 %5998  ;;  %v6151_v59 = vpop.permute.xlu1 %6150 }
0x1306   :  { %v5513_v3 = vpack.c.bf16 %v5505_v61, %v5505_v61  ;;  %9200 = vmatprep.subr.bf16.mxu0 %v9859_v37  ;;  %v6156_v13 = vsel %vm296_vm3, %v6151_v59, 0 }
0x1308   :  { %9185 = vmatmul.mubr.msk.bf16.vlgmr.msra.gmra.mxu1 %vm296_vm3, %v5513_v3 }
0x1309   :  { %9195 = vmatpush3.bf16.xpose.msra.mxu1 %v5956_v42  ;;  %9196 = vmatprep.mubr.msk.bf16.mxu1 %vm9860_vm2, %v9859_v37  ;;  %v6101_v10 = vpop.permute.xlu0 %6100  ;;  %v6149_v8 = vpop.permute.xlu1 %6148 }
0x130a   :  { %9206 = vmatprep.subr.bf16.mxu1 %v9859_v37  ;;  %v6106_v63 = vsel %vm296_vm3, %v6101_v10, 0 }
0x130c   :  { %9191 = vmatmul.mubr.msk.bf16.vlgmr.msra.gmra.mxu0 %vm296_vm3, %v5899_v30 }
0x130d   :  { %9201 = vmatpush3.bf16.xpose.msra.mxu0 %v6006_v41  ;;  %9202 = vmatprep.mubr.msk.bf16.mxu0 %vm9860_vm2, %v9859_v37  ;;  %v6099_v38 = vpop.permute.xlu0 %6098  ;;  %v6251_v52 = vpop.permute.xlu1 %6250 }
0x130e   :  { %9212 = vmatprep.subr.bf16.mxu0 %v9859_v37  ;;  %v6256_v9 = vsel %vm296_vm3, %v6251_v52, 0 }
0x1310   :  { %9197 = vmatmul.mubr.msk.bf16.vlgmr.msra.gmra.mxu1 %vm296_vm3, %v5949_v60 }
0x1311   :  { %9207 = vmatpush3.bf16.xpose.msra.mxu1 %v6056_v54  ;;  %9208 = vmatprep.mubr.msk.bf16.mxu1 %vm9860_vm2, %v9859_v37  ;;  %v6201_v19 = vpop.permute.xlu0 %6200  ;;  %v6249_v29 = vpop.permute.xlu1 %6248 }
0x1312   :  { %9218 = vmatprep.subr.bf16.mxu1 %v9859_v37  ;;  %v6206_v47 = vsel %vm296_vm3, %v6201_v19, 0 }
0x1314   :  { %9203 = vmatmul.mubr.msk.bf16.vlgmr.msra.gmra.mxu0 %vm296_vm3, %v5999_v26 }
0x1315   :  { %9213 = vmatpush3.bf16.xpose.msra.mxu0 %v6106_v63  ;;  %9214 = vmatprep.mubr.msk.bf16.mxu0 %vm9860_vm2, %v9859_v37  ;;  %v6199_v53 = vpop.permute.xlu0 %6198  ;;  %v6395_v31 = vpop.permute.xlu1 %6394 }
0x1316   :  { %9224 = vmatprep.subr.bf16.mxu0 %v9859_v37  ;;  %v6400_v14 = vsel %vm787_vm4, %v6395_v31, 0 }
0x1318   :  { %9209 = vmatmul.mubr.msk.bf16.vlgmr.msra.gmra.mxu1 %vm296_vm3, %v6049_v46 }
0x1319   :  { %9219 = vmatpush3.bf16.xpose.msra.mxu1 %v6156_v13  ;;  %9220 = vmatprep.mubr.msk.bf16.mxu1 %vm9860_vm2, %v9859_v37  ;;  %v6443_v15 = vpop.permute.xlu0 %6442 }
0x131a   :  { %9230 = vmatprep.subr.bf16.mxu1 %v9859_v37  ;;  %v6448_v4 = vsel %vm787_vm4, %v6443_v15, 0 }
0x131c   :  { %9215 = vmatmul.mubr.msk.bf16.vlgmr.msra.gmra.mxu0 %vm296_vm3, %v6099_v38 }
0x131d   :  { %9225 = vmatpush3.bf16.xpose.msra.mxu0 %v6206_v47  ;;  %9226 = vmatprep.mubr.msk.bf16.mxu0 %vm9860_vm2, %v9859_v37 }
0x131e   :  { %9236 = vmatprep.subr.bf16.mxu0 %v9859_v37 }
0x1320   :  { %9221 = vmatmul.mubr.msk.bf16.vlgmr.msra.gmra.mxu1 %vm296_vm3, %v6149_v8 }
0x1321   :  { %9231 = vmatpush3.bf16.xpose.msra.mxu1 %v6256_v9  ;;  %9232 = vmatprep.mubr.msk.bf16.mxu1 %vm9860_vm2, %v9859_v37 }
0x1322   :  { %9242 = vmatprep.subr.bf16.mxu1 %v9859_v37 }
0x1324   :  { %9227 = vmatmul.mubr.msk.bf16.vlgmr.msra.gmra.mxu0 %vm296_vm3, %v6199_v53 }
0x1325   :  { %9237 = vmatpush3.bf16.msra.mxu0 %v6400_v14  ;;  %9238 = vmatprep.mubr.msk.bf16.mxu0 %vm9860_vm2, %v9859_v37 }
0x1326   :  { %9248 = vmatprep.subr.bf16.mxu0 %v9859_v37 }
0x1328   :  { %9233 = vmatmul.mubr.msk.bf16.vlgmr.msra.gmra.mxu1 %vm296_vm3, %v6249_v29 }
0x1329   :  { %9243 = vmatpush3.bf16.msra.mxu1 %v6448_v4  ;;  %9244 = vmatprep.mubr.msk.bf16.mxu1 %vm9860_vm2, %v9859_v37 }
0x132a   :  { %9254 = vmatprep.subr.bf16.mxu1 %v9859_v37 }
0x137f   :  { %v11359_v34 = vpop.f32.mrf.mxu0 }
0x1381   :  { %v9144_v21 = vpop.f32.mrf.mxu0 }
0x1383   :  { %v5559_v7 = vpop.f32.mrf.mxu0  ;;  %v11361_v1 = vpop.f32.mrf.mxu1 }
0x1384   :  { %v9485_v5 = vpack.i.bf16 %v11361_v1, %v11359_v34 }
0x1385   :  { %v9145_v58 = vpop.f32.mrf.mxu0  ;;  %v9150_v55 = vpop.f32.mrf.mxu1 }
0x1387   :  { %v5607_v6 = vpop.f32.mrf.mxu1  ;;  %v11365_v32 = vpop.f32.mrf.mxu0 }
0x1389   :  { %v9151_v23 = vpop.f32.mrf.mxu1  ;;  %v9156_v35 = vpop.f32.mrf.mxu0 }
0x138b   :  { %v5655_v25 = vpop.f32.mrf.mxu0  ;;  %v11367_v16 = vpop.f32.mrf.mxu1 }
0x138c   :  { %v9490_v39 = vpack.i.bf16 %v11367_v16, %v11365_v32 }
0x138d   :  { %v9157_v60 = vpop.f32.mrf.mxu0  ;;  %v9162_v40 = vpop.f32.mrf.mxu1 }
0x138f   :  { %v5703_v18 = vpop.f32.mrf.mxu1  ;;  %v11371_v30 = vpop.f32.mrf.mxu0 }
0x1391   :  { %v9163_v45 = vpop.f32.mrf.mxu1  ;;  %v9168_v11 = vpop.f32.mrf.mxu0 }
0x1393   :  { %v5751_v56 = vpop.f32.mrf.mxu0  ;;  %v11373_v51 = vpop.f32.mrf.mxu1 }
0x1394   :  { %v9505_v33 = vpack.i.bf16 %v11373_v51, %v11371_v30 }
0x1395   :  { %v9169_v46 = vpop.f32.mrf.mxu0  ;;  %v9174_v61 = vpop.f32.mrf.mxu1 }
0x1397   :  { %v5799_v2 = vpop.f32.mrf.mxu1 }
0x1399   :  { %v9175_v3 = vpop.f32.mrf.mxu1 }
0x13c4   :  { %v11377_v26 = vpop.f32.mrf.mxu0 }
0x13c6   :  { %v9180_v42 = vpop.f32.mrf.mxu0 }
0x13c8   :  { %v5847_v59 = vpop.f32.mrf.mxu0  ;;  %v11379_v41 = vpop.f32.mrf.mxu1 }
0x13c9   :  { %v9510_v10 = vpack.i.bf16 %v11379_v41, %v11377_v26 }
0x13ca   :  { %v9181_v8 = vpop.f32.mrf.mxu0  ;;  %v9186_v54 = vpop.f32.mrf.mxu1 }
0x13cc   :  { %v5895_v38 = vpop.f32.mrf.mxu1  ;;  %v5942_v63 = vpop.f32.mrf.mxu0 }
0x13cd   :  { %v6298_v52 = vsel %vm296_vm3, %v5942_v63, -inf }
0x13ce   :  { %v9187_v13 = vpop.f32.mrf.mxu1  ;;  %6299 = vmax.xlane.f32.xlu0 %v6298_v52  ;;  %v9192_v19 = vpop.f32.mrf.mxu0 }
0x13d0   :  { %v5945_v29 = vpop.f32.mrf.mxu0  ;;  %v5992_v47 = vpop.f32.mrf.mxu1 }
0x13d1   :  { %v6301_v53 = vsel %vm296_vm3, %v5992_v47, -inf }
0x13d2   :  { %6302 = vmax.xlane.f32.xlu1 %v6301_v53  ;;  %v9193_v9 = vpop.f32.mrf.mxu0  ;;  %v9198_v31 = vpop.f32.mrf.mxu1 }
0x13d3   :  { %v11398_v31 = vpop.permute.xlu1 %6490 }
0x13d4   :  { %v5995_v14 = vpop.f32.mrf.mxu1  ;;  %v6042_v15 = vpop.f32.mrf.mxu0 }
0x13d5   :  { %v6304_v4 = vsel %vm296_vm3, %v6042_v15, -inf }
0x13d6   :  { %v9199_v21 = vpop.f32.mrf.mxu1  ;;  %6305 = vmax.xlane.f32.xlu0 %v6304_v4  ;;  %v9204_v7 = vpop.f32.mrf.mxu0 }
0x13d7   :  { %v11400_v14 = vpop.permute.xlu1 %6538 }
0x13d8   :  { %v6045_v58 = vpop.f32.mrf.mxu0  ;;  %v6092_v55 = vpop.f32.mrf.mxu1 }
0x13d9   :  { %v6307_v6 = vsel %vm296_vm3, %v6092_v55, -inf }
0x13da   :  { %v9210_v23 = vpop.f32.mrf.mxu1  ;;  %6308 = vmax.xlane.f32.xlu0 %v6307_v6  ;;  %v9205_v35 = vpop.f32.mrf.mxu0 }
0x13dc   :  { %v6095_v25 = vpop.f32.mrf.mxu1  ;;  %v6142_v60 = vpop.f32.mrf.mxu0 }
0x13dd   :  { %v6310_v40 = vsel %vm296_vm3, %v6142_v60, -inf }
0x13de   :  { %v9211_v18 = vpop.f32.mrf.mxu1  ;;  %6311 = vmax.xlane.f32.xlu1 %v6310_v40  ;;  %v9216_v45 = vpop.f32.mrf.mxu0 }
0x13e0   :  { %v6145_v11 = vpop.f32.mrf.mxu0  ;;  %v6192_v56 = vpop.f32.mrf.mxu1 }
0x13e1   :  { %v6313_v46 = vsel %vm296_vm3, %v6192_v56, -inf }
0x13e2   :  { %v9222_v61 = vpop.f32.mrf.mxu1  ;;  %6314 = vmax.xlane.f32.xlu0 %v6313_v46  ;;  %v9217_v2 = vpop.f32.mrf.mxu0 }
0x13e4   :  { %v6195_v3 = vpop.f32.mrf.mxu1  ;;  %v11389_v42 = vpop.f32.mrf.mxu0 }
0x13e5   :  { %v6316_v59 = vsel %vm296_vm3, %v11389_v42, -inf }
0x13e6   :  { %v9223_v8 = vpop.f32.mrf.mxu1  ;;  %6317 = vmax.xlane.f32.xlu1 %v6316_v59  ;;  %v9228_v54 = vpop.f32.mrf.mxu0 }
0x13e8   :  { %v6245_v38 = vpop.f32.mrf.mxu0  ;;  %v6292_v52 = vpop.f32.mrf.mxu1 }
0x13e9   :  { %v6319_v13 = vsel %vm296_vm3, %v6292_v52, -inf }
0x13ea   :  { %v9234_v19 = vpop.f32.mrf.mxu1  ;;  %6320 = vmax.xlane.f32.xlu0 %v6319_v13  ;;  %v9229_v29 = vpop.f32.mrf.mxu0 }
0x13ec   :  { %v6295_v53 = vpop.f32.mrf.mxu1 }
0x13ee   :  { %v9235_v9 = vpop.f32.mrf.mxu1 }
0x13f7   :  { %6634 = vrot.lane.b32.xlu1 %v10905_v36, %s9868_s20 }
0x1400   :  { %6586 = vrot.lane.b32.xlu0 %v10899_v24, %s9868_s20 }
0x1457   :  { %v6300_v4 = vpop.xlane.xlu0 %6299 }
0x1458   :  { %v6322_v21 = vsub.f32 %v5942_v63, %v6300_v4 }
0x145a   :  { %v6330_v7 = vmul.f32 1.442695, %v6322_v21 }
0x145b   :  { %v6303_v58 = vpop.xlane.xlu1 %6302 }
0x145c   :  { %9750 = vpow2.f32 %v6330_v7  ;;  %v6323_v6 = vsub.f32 %v5992_v47, %v6303_v58 }
0x145e   :  { %v6332_v23 = vmul.f32 1.442695, %v6323_v6 }
0x145f   :  { %v6306_v35 = vpop.xlane.xlu0 %6305 }
0x1460   :  { %9752 = vpow2.f32 %v6332_v23  ;;  %v6324_v25 = vsub.f32 %v6042_v15, %v6306_v35 }
0x1462   :  { %v6334_v40 = vmul.f32 1.442695, %v6324_v25 }
0x1463   :  { %v6309_v18 = vpop.xlane.xlu0 %6308 }
0x1464   :  { %9754 = vpow2.f32 %v6334_v40  ;;  %v6325_v45 = vsub.f32 %v6092_v55, %v6309_v18 }
0x1466   :  { %v6336_v11 = vmul.f32 1.442695, %v6325_v45 }
0x1467   :  { %v6312_v46 = vpop.xlane.xlu1 %6311 }
0x1468   :  { %9756 = vpow2.f32 %v6336_v11  ;;  %v6326_v61 = vsub.f32 %v6142_v60, %v6312_v46 }
0x1469   :  { %v11402_v2 = vpop.eup %9750 }
0x146a   :  { %v6338_v3 = vmul.f32 1.442695, %v6326_v61  ;;  %v6346_v63 = vsel %vm296_vm3, %v11402_v2, 0.0 }
0x146b   :  { %6347 = vadd.xlane.f32.xlu1 %v6346_v63  ;;  %v6315_v47 = vpop.xlane.xlu0 %6314 }
0x146c   :  { %9758 = vpow2.f32 %v6338_v3  ;;  %v6327_v59 = vsub.f32 %v6192_v56, %v6315_v47 }
0x146d   :  { %v11406_v8 = vpop.eup %9752 }
0x146e   :  { %v6340_v15 = vmul.f32 1.442695, %v6327_v59  ;;  %v6349_v55 = vsel %vm296_vm3, %v11406_v8, 0.0  ;;  %v6496_v59 = vsel %vm787_vm4, %v11398_v31, 0 }
0x146f   :  { %6350 = vadd.xlane.f32.xlu0 %v6349_v55  ;;  %v6318_v9 = vpop.xlane.xlu1 %6317 }
0x1470   :  { %9760 = vpow2.f32 %v6340_v15  ;;  %v6328_v4 = vsub.f32 %v11389_v42, %v6318_v9 }
0x1471   :  { %v11410_v54 = vpop.eup %9754 }
0x1472   :  { %v6352_v60 = vsel %vm296_vm3, %v11410_v54, 0.0  ;;  %v6342_v7 = vmul.f32 1.442695, %v6328_v4 }
0x1473   :  { %6353 = vadd.xlane.f32.xlu1 %v6352_v60  ;;  %v6321_v21 = vpop.xlane.xlu0 %6320  ;;  %v6635_v42 = vpop.permute.xlu1 %6634 }
0x1474   :  { %v6329_v58 = vsub.f32 %v6292_v52, %v6321_v21  ;;  %9762 = vpow2.f32 %v6342_v7  ;;  %v6640_v4 = vsel %vm787_vm4, %v6635_v42, 0 }
0x1475   :  { %v11414_v38 = vpop.eup %9756 }
0x1476   :  { %v6355_v13 = vsel %vm296_vm3, %v11414_v38, 0.0  ;;  %v6344_v6 = vmul.f32 1.442695, %v6329_v58 }
0x1477   :  { %6356 = vadd.xlane.f32.xlu0 %v6355_v13  ;;  %v6587_v52 = vpop.permute.xlu0 %6586  ;;  %v6544_v13 = vsel %vm787_vm4, %v11400_v14, 0 }
0x1478   :  { %9764 = vpow2.f32 %v6344_v6 }
0x1479   :  { %v11418_v56 = vpop.eup %9758 }
0x147a   :  { %v6358_v19 = vsel %vm296_vm3, %v11418_v56, 0.0 }
0x147b   :  { %6359 = vadd.xlane.f32.xlu1 %v6358_v19 }
0x147d   :  { %v11422_v29 = vpop.eup %9760 }
0x147e   :  { %v6361_v53 = vsel %vm296_vm3, %v11422_v29, 0.0 }
0x147f   :  { %6362 = vadd.xlane.f32.xlu0 %v6361_v53  ;;  %v6592_v53 = vsel %vm787_vm4, %v6587_v52, 0 }
0x1481   :  { %v11431_v23 = vpop.eup %9762 }
0x1482   :  { %v6364_v35 = vsel %vm296_vm3, %v11431_v23, 0.0 }
0x1485   :  { %v11435_v25 = vpop.eup %9764 }
0x1486   :  { %v6367_v40 = vsel %vm296_vm3, %v11435_v25, 0.0 }
0x148c   :  { %6730 = vrot.lane.b32.xlu1 %v10911_v0, %s9868_s20 }
0x1495   :  { %6682 = vrot.lane.b32.xlu0 %v10903_v27, %s9868_s20 }
0x14b0   :  { %6365 = vadd.xlane.f32.xlu1 %v6364_v35 }
0x14b4   :  { %6368 = vadd.xlane.f32.xlu0 %v6367_v40 }
0x14c1   :  { %6830 = vrot.lane.b32.xlu1 %v10889_v17, %s9869_s9 }
0x14c5   :  { %6828 = vrot.lane.b32.xlu1 %v10889_v17, %s9870_s21 }
0x14c9   :  { %6930 = vrot.lane.b32.xlu1 %v10895_v12, %s9869_s9 }
0x14ca   :  { %6780 = vrot.lane.b32.xlu0 %v10883_v49, %s9869_s9 }
0x14cd   :  { %6928 = vrot.lane.b32.xlu1 %v10895_v12, %s9870_s21 }
0x14ce   :  { %6778 = vrot.lane.b32.xlu0 %v10883_v49, %s9870_s21 }
0x14d1   :  { %7030 = vrot.lane.b32.xlu1 %v10905_v36, %s9869_s9 }
0x14d2   :  { %6880 = vrot.lane.b32.xlu0 %v10887_v48, %s9869_s9 }
0x14d5   :  { %7028 = vrot.lane.b32.xlu1 %v10905_v36, %s9870_s21 }
0x14d6   :  { %6878 = vrot.lane.b32.xlu0 %v10887_v48, %s9870_s21 }
0x14d9   :  { %7130 = vrot.lane.b32.xlu1 %v10911_v0, %s9869_s9 }
0x14da   :  { %6980 = vrot.lane.b32.xlu0 %v10899_v24, %s9869_s9 }
0x14dd   :  { %7128 = vrot.lane.b32.xlu1 %v10911_v0, %s9870_s21 }
0x14de   :  { %6978 = vrot.lane.b32.xlu0 %v10899_v24, %s9870_s21 }
0x14e1   :  { %7274 = vrot.lane.b32.xlu1 %v10883_v49, %s9871_s22 }
0x14e2   :  { %7080 = vrot.lane.b32.xlu0 %v10903_v27, %s9869_s9 }
0x14e6   :  { %7078 = vrot.lane.b32.xlu0 %v10903_v27, %s9870_s21 }
0x14f4   :  { %v6348_v18 = vpop.xlane.xlu1 %6347 }
0x14f5   :  { %9766 = vrcp.f32 %v6348_v18 }
0x14f8   :  { %v6351_v45 = vpop.xlane.xlu0 %6350 }
0x14f9   :  { %9768 = vrcp.f32 %v6351_v45 }
0x14fc   :  { %v6354_v11 = vpop.xlane.xlu1 %6353 }
0x14fd   :  { %9770 = vrcp.f32 %v6354_v11 }
0x1500   :  { %v6357_v46 = vpop.xlane.xlu0 %6356 }
0x1501   :  { %9772 = vrcp.f32 %v6357_v46 }
0x1502   :  { %v9767_v61 = vpop.eup %9766 }
0x1503   :  { %v6378_v3 = vmul.f32 %v9767_v61, %v11402_v2 }
0x1504   :  { %v6360_v49 = vpop.xlane.xlu1 %6359 }
0x1505   :  { %v6386_v63 = vpack.c.bf16 %v6378_v3, %v6378_v3  ;;  %9774 = vrcp.f32 %v6360_v49 }
0x1506   :  { %v9769_v47 = vpop.eup %9768 }
0x1507   :  { %v6379_v15 = vmul.f32 %v9769_v47, %v11406_v8  ;;  %9239 = vmatmul.mubr.msk.bf16.vlgmr.msra.gmra.mxu0 %vm296_vm3, %v6386_v63 }
0x1508   :  { %9249 = vmatpush3.bf16.msra.mxu0 %v6496_v59  ;;  %v6363_v55 = vpop.xlane.xlu0 %6362  ;;  %9250 = vmatprep.mubr.msk.bf16.mxu0 %vm9860_vm2, %v9859_v37  ;;  %v6731_v40 = vpop.permute.xlu1 %6730 }
0x1509   :  { %v6387_v60 = vpack.c.bf16 %v6379_v15, %v6379_v15  ;;  %9776 = vrcp.f32 %v6363_v55  ;;  %9260 = vmatprep.subr.bf16.mxu0 %v9859_v37  ;;  %v6736_v42 = vsel %vm787_vm4, %v6731_v40, 0 }
0x150a   :  { %v9771_v2 = vpop.eup %9770 }
0x150b   :  { %v6380_v19 = vmul.f32 %v9771_v2, %v11410_v54  ;;  %9245 = vmatmul.mubr.msk.bf16.vlgmr.msra.gmra.mxu1 %vm296_vm3, %v6387_v60 }
0x150c   :  { %9255 = vmatpush3.bf16.msra.mxu1 %v6544_v13  ;;  %9256 = vmatprep.mubr.msk.bf16.mxu1 %vm9860_vm2, %v9859_v37  ;;  %v6683_v7 = vpop.permute.xlu0 %6682 }
0x150d   :  { %v6388_v31 = vpack.c.bf16 %v6380_v19, %v6380_v19  ;;  %9266 = vmatprep.subr.bf16.mxu1 %v9859_v37  ;;  %v6688_v35 = vsel %vm787_vm4, %v6683_v7, 0 }
0x150e   :  { %v9773_v8 = vpop.eup %9772 }
0x150f   :  { %v6381_v9 = vmul.f32 %v9773_v8, %v11414_v38  ;;  %9251 = vmatmul.mubr.msk.bf16.vlgmr.msra.gmra.mxu0 %vm296_vm3, %v6388_v31 }
0x1510   :  { %9261 = vmatpush3.bf16.msra.mxu0 %v6592_v53  ;;  %9262 = vmatprep.mubr.msk.bf16.mxu0 %vm9860_vm2, %v9859_v37 }
0x1511   :  { %v6389_v14 = vpack.c.bf16 %v6381_v9, %v6381_v9  ;;  %9272 = vmatprep.subr.bf16.mxu0 %v9859_v37 }
0x1512   :  { %v9775_v54 = vpop.eup %9774 }
0x1513   :  { %v6382_v21 = vmul.f32 %v9775_v54, %v11418_v56  ;;  %9257 = vmatmul.mubr.msk.bf16.vlgmr.msra.gmra.mxu1 %vm296_vm3, %v6389_v14 }
0x1514   :  { %9267 = vmatpush3.bf16.msra.mxu1 %v6640_v4  ;;  %9268 = vmatprep.mubr.msk.bf16.mxu1 %vm9860_vm2, %v9859_v37 }
0x1515   :  { %v6390_v38 = vpack.c.bf16 %v6382_v21, %v6382_v21  ;;  %9278 = vmatprep.subr.bf16.mxu1 %v9859_v37 }
0x1516   :  { %v9777_v58 = vpop.eup %9776 }
0x1517   :  { %v6383_v6 = vmul.f32 %v9777_v58, %v11422_v29  ;;  %9263 = vmatmul.mubr.msk.bf16.vlgmr.msra.gmra.mxu0 %vm296_vm3, %v6390_v38 }
0x1518   :  { %9273 = vmatpush3.bf16.msra.mxu0 %v6688_v35  ;;  %9274 = vmatprep.mubr.msk.bf16.mxu0 %vm9860_vm2, %v9859_v37 }
0x1519   :  { %v6391_v56 = vpack.c.bf16 %v6383_v6, %v6383_v6  ;;  %9284 = vmatprep.subr.bf16.mxu0 %v9859_v37 }
0x151b   :  { %9269 = vmatmul.mubr.msk.bf16.vlgmr.msra.gmra.mxu1 %vm296_vm3, %v6391_v56 }
0x151c   :  { %9279 = vmatpush3.bf16.msra.mxu1 %v6736_v42  ;;  %9280 = vmatprep.mubr.msk.bf16.mxu1 %vm9860_vm2, %v9859_v37 }
0x151d   :  { %9290 = vmatprep.subr.bf16.mxu1 %v9859_v37 }
0x1539   :  { %v6366_v29 = vpop.xlane.xlu1 %6365 }
0x153a   :  { %9778 = vrcp.f32 %v6366_v29 }
0x153d   :  { %v6831_v52 = vpop.permute.xlu1 %6830  ;;  %v6369_v18 = vpop.xlane.xlu0 %6368 }
0x153e   :  { %9780 = vrcp.f32 %v6369_v18 }
0x1541   :  { %v6829_v45 = vpop.permute.xlu1 %6828  ;;  %v6781_v11 = vpop.permute.xlu0 %6780 }
0x1542   :  { %v6786_v60 = vsel %vm296_vm3, %v6781_v11, 0 }
0x1545   :  { %v6931_v46 = vpop.permute.xlu1 %6930  ;;  %v6779_v61 = vpop.permute.xlu0 %6778 }
0x1546   :  { %v6936_v53 = vsel %vm296_vm3, %v6931_v46, 0 }
0x1547   :  { %v9779_v3 = vpop.eup %9778 }
0x1548   :  { %v6384_v49 = vmul.f32 %v9779_v3, %v11431_v23  ;;  %v6836_v23 = vsel %vm296_vm3, %v6831_v52, 0 }
0x1549   :  { %v6881_v63 = vpop.permute.xlu0 %6880  ;;  %v6929_v15 = vpop.permute.xlu1 %6928 }
0x154a   :  { %v6392_v47 = vpack.c.bf16 %v6384_v49, %v6384_v49 }
0x154b   :  { %v9781_v59 = vpop.eup %9780 }
0x154c   :  { %v6385_v55 = vmul.f32 %v9781_v59, %v11435_v25  ;;  %9275 = vmatmul.mubr.msk.bf16.vlgmr.msra.gmra.mxu0 %vm296_vm3, %v6392_v47  ;;  %v6886_v25 = vsel %vm296_vm3, %v6881_v63, 0 }
0x154d   :  { %9285 = vmatpush3.bf16.xpose.msra.mxu0 %v6786_v60  ;;  %9286 = vmatprep.mubr.msk.bf16.mxu0 %vm9860_vm2, %v9859_v37  ;;  %v6879_v13 = vpop.permute.xlu0 %6878  ;;  %v7031_v19 = vpop.permute.xlu1 %7030 }
0x154e   :  { %v6393_v2 = vpack.c.bf16 %v6385_v55, %v6385_v55  ;;  %9296 = vmatprep.subr.bf16.mxu0 %v9859_v37  ;;  %v7036_v4 = vsel %vm296_vm3, %v7031_v19, 0 }
0x1550   :  { %9281 = vmatmul.mubr.msk.bf16.vlgmr.msra.gmra.mxu1 %vm296_vm3, %v6393_v2 }
0x1551   :  { %9291 = vmatpush3.bf16.xpose.msra.mxu1 %v6836_v23  ;;  %9292 = vmatprep.mubr.msk.bf16.mxu1 %vm9860_vm2, %v9859_v37  ;;  %v6981_v31 = vpop.permute.xlu0 %6980  ;;  %v7029_v8 = vpop.permute.xlu1 %7028 }
0x1552   :  { %9302 = vmatprep.subr.bf16.mxu1 %v9859_v37  ;;  %v6986_v14 = vsel %vm296_vm3, %v6981_v31, 0 }
0x1554   :  { %9287 = vmatmul.mubr.msk.bf16.vlgmr.msra.gmra.mxu0 %vm296_vm3, %v6779_v61 }
0x1555   :  { %9297 = vmatpush3.bf16.xpose.msra.mxu0 %v6886_v25  ;;  %9298 = vmatprep.mubr.msk.bf16.mxu0 %vm9860_vm2, %v9859_v37  ;;  %v6979_v9 = vpop.permute.xlu0 %6978  ;;  %v7131_v54 = vpop.permute.xlu1 %7130 }
0x1556   :  { %9308 = vmatprep.subr.bf16.mxu0 %v9859_v37  ;;  %v7136_v58 = vsel %vm296_vm3, %v7131_v54, 0 }
0x1558   :  { %9293 = vmatmul.mubr.msk.bf16.vlgmr.msra.gmra.mxu1 %vm296_vm3, %v6829_v45 }
0x1559   :  { %9303 = vmatpush3.bf16.xpose.msra.mxu1 %v6936_v53  ;;  %9304 = vmatprep.mubr.msk.bf16.mxu1 %vm9860_vm2, %v9859_v37  ;;  %v7081_v21 = vpop.permute.xlu0 %7080  ;;  %v7129_v7 = vpop.permute.xlu1 %7128 }
0x155a   :  { %9314 = vmatprep.subr.bf16.mxu1 %v9859_v37  ;;  %v7086_v38 = vsel %vm296_vm3, %v7081_v21, 0 }
0x155c   :  { %9299 = vmatmul.mubr.msk.bf16.vlgmr.msra.gmra.mxu0 %vm296_vm3, %v6879_v13 }
0x155d   :  { %9309 = vmatpush3.bf16.xpose.msra.mxu0 %v6986_v14  ;;  %9310 = vmatprep.mubr.msk.bf16.mxu0 %vm9860_vm2, %v9859_v37  ;;  %v7275_v6 = vpop.permute.xlu1 %7274  ;;  %v7079_v35 = vpop.permute.xlu0 %7078 }
0x155e   :  { %9320 = vmatprep.subr.bf16.mxu0 %v9859_v37  ;;  %v7280_v40 = vsel %vm787_vm4, %v7275_v6, 0 }
0x1560   :  { %9305 = vmatmul.mubr.msk.bf16.vlgmr.msra.gmra.mxu1 %vm296_vm3, %v6929_v15 }
0x1561   :  { %9315 = vmatpush3.bf16.xpose.msra.mxu1 %v7036_v4  ;;  %9316 = vmatprep.mubr.msk.bf16.mxu1 %vm9860_vm2, %v9859_v37 }
0x1562   :  { %9326 = vmatprep.subr.bf16.mxu1 %v9859_v37 }
0x1564   :  { %9311 = vmatmul.mubr.msk.bf16.vlgmr.msra.gmra.mxu0 %vm296_vm3, %v6979_v9 }
0x1565   :  { %9321 = vmatpush3.bf16.xpose.msra.mxu0 %v7086_v38  ;;  %9322 = vmatprep.mubr.msk.bf16.mxu0 %vm9860_vm2, %v9859_v37 }
0x1566   :  { %9332 = vmatprep.subr.bf16.mxu0 %v9859_v37 }
0x1568   :  { %9317 = vmatmul.mubr.msk.bf16.vlgmr.msra.gmra.mxu1 %vm296_vm3, %v7029_v8 }
0x1569   :  { %9327 = vmatpush3.bf16.xpose.msra.mxu1 %v7136_v58  ;;  %9328 = vmatprep.mubr.msk.bf16.mxu1 %vm9860_vm2, %v9859_v37 }
0x156a   :  { %9338 = vmatprep.subr.bf16.mxu1 %v9859_v37 }
0x156c   :  { %9323 = vmatmul.mubr.msk.bf16.vlgmr.msra.gmra.mxu0 %vm296_vm3, %v7079_v35 }
0x156d   :  { %9333 = vmatpush3.bf16.msra.mxu0 %v7280_v40  ;;  %9334 = vmatprep.mubr.msk.bf16.mxu0 %vm9860_vm2, %v9859_v37 }
0x156e   :  { %9344 = vmatprep.subr.bf16.mxu0 %v9859_v37 }
0x1570   :  { %9329 = vmatmul.mubr.msk.bf16.vlgmr.msra.gmra.mxu1 %vm296_vm3, %v7129_v7 }
0x1571   :  { %9340 = vmatprep.mubr.msk.bf16.mxu1 %vm9860_vm2, %v9859_v37 }
0x15c7   :  { %v11561_v56 = vpop.f32.mrf.mxu0 }
0x15c9   :  { %v9240_v42 = vpop.f32.mrf.mxu0 }
0x15cb   :  { %v6439_v29 = vpop.f32.mrf.mxu0  ;;  %v11563_v52 = vpop.f32.mrf.mxu1 }
0x15cc   :  { %v9495_v18 = vpack.i.bf16 %v11563_v52, %v11561_v56 }
0x15cd   :  { %v9241_v45 = vpop.f32.mrf.mxu0  ;;  %v9246_v11 = vpop.f32.mrf.mxu1 }
0x15cf   :  { %v6487_v46 = vpop.f32.mrf.mxu1  ;;  %v11567_v61 = vpop.f32.mrf.mxu0 }
0x15d1   :  { %v9247_v3 = vpop.f32.mrf.mxu1  ;;  %v9252_v49 = vpop.f32.mrf.mxu0 }
0x15d3   :  { %v6535_v63 = vpop.f32.mrf.mxu0  ;;  %v11569_v47 = vpop.f32.mrf.mxu1 }
0x15d4   :  { %v9500_v59 = vpack.i.bf16 %v11569_v47, %v11567_v61 }
0x15d5   :  { %v9253_v15 = vpop.f32.mrf.mxu0  ;;  %v9258_v55 = vpop.f32.mrf.mxu1 }
0x15d7   :  { %v6583_v60 = vpop.f32.mrf.mxu1  ;;  %v11573_v2 = vpop.f32.mrf.mxu0 }
0x15d9   :  { %v9259_v13 = vpop.f32.mrf.mxu1  ;;  %v9264_v23 = vpop.f32.mrf.mxu0 }
0x15db   :  { %v6631_v19 = vpop.f32.mrf.mxu0  ;;  %v11575_v25 = vpop.f32.mrf.mxu1 }
0x15dc   :  { %v9520_v31 = vpack.i.bf16 %v11575_v25, %v11573_v2 }
0x15dd   :  { %v9265_v8 = vpop.f32.mrf.mxu0  ;;  %v9270_v53 = vpop.f32.mrf.mxu1 }
0x15df   :  { %v6679_v9 = vpop.f32.mrf.mxu1 }
0x15e1   :  { %v9271_v14 = vpop.f32.mrf.mxu1 }
0x160c   :  { %v11579_v54 = vpop.f32.mrf.mxu0 }
0x160e   :  { %v9276_v4 = vpop.f32.mrf.mxu0 }
0x1610   :  { %v6727_v21 = vpop.f32.mrf.mxu0  ;;  %v11581_v7 = vpop.f32.mrf.mxu1 }
0x1611   :  { %v9530_v38 = vpack.i.bf16 %v11581_v7, %v11579_v54 }
0x1612   :  { %v9277_v58 = vpop.f32.mrf.mxu0  ;;  %v9282_v6 = vpop.f32.mrf.mxu1 }
0x1614   :  { %v6775_v35 = vpop.f32.mrf.mxu1  ;;  %v6822_v40 = vpop.f32.mrf.mxu0 }
0x1615   :  { %v7178_v42 = vsel %vm296_vm3, %v6822_v40, -inf }
0x1616   :  { %v9283_v29 = vpop.f32.mrf.mxu1  ;;  %7179 = vmax.xlane.f32.xlu0 %v7178_v42  ;;  %v9288_v45 = vpop.f32.mrf.mxu0 }
0x1618   :  { %v6825_v11 = vpop.f32.mrf.mxu0  ;;  %v6872_v46 = vpop.f32.mrf.mxu1 }
0x1619   :  { %v7181_v3 = vsel %vm296_vm3, %v6872_v46, -inf }
0x161a   :  { %7182 = vmax.xlane.f32.xlu1 %v7181_v3  ;;  %v9289_v49 = vpop.f32.mrf.mxu0  ;;  %v9294_v63 = vpop.f32.mrf.mxu1 }
0x161c   :  { %v6875_v15 = vpop.f32.mrf.mxu1  ;;  %v6922_v55 = vpop.f32.mrf.mxu0 }
0x161d   :  { %v7184_v60 = vsel %vm296_vm3, %v6922_v55, -inf }
0x161e   :  { %v9295_v13 = vpop.f32.mrf.mxu1  ;;  %7185 = vmax.xlane.f32.xlu0 %v7184_v60  ;;  %v9300_v23 = vpop.f32.mrf.mxu0 }
0x1620   :  { %v6925_v19 = vpop.f32.mrf.mxu0  ;;  %v6972_v8 = vpop.f32.mrf.mxu1 }
0x1621   :  { %v7187_v53 = vsel %vm296_vm3, %v6972_v8, -inf }
0x1622   :  { %v9306_v9 = vpop.f32.mrf.mxu1  ;;  %7188 = vmax.xlane.f32.xlu0 %v7187_v53  ;;  %v9301_v14 = vpop.f32.mrf.mxu0 }
0x1624   :  { %v6975_v4 = vpop.f32.mrf.mxu1  ;;  %v11589_v21 = vpop.f32.mrf.mxu0 }
0x1625   :  { %v7190_v58 = vsel %vm296_vm3, %v11589_v21, -inf }
0x1626   :  { %v9307_v6 = vpop.f32.mrf.mxu1  ;;  %7191 = vmax.xlane.f32.xlu1 %v7190_v58  ;;  %v9312_v35 = vpop.f32.mrf.mxu0 }
0x1628   :  { %v7025_v42 = vpop.f32.mrf.mxu0  ;;  %v11593_v29 = vpop.f32.mrf.mxu1 }
0x1629   :  { %v7193_v45 = vsel %vm296_vm3, %v11593_v29, -inf }
0x162a   :  { %v9318_v11 = vpop.f32.mrf.mxu1  ;;  %7194 = vmax.xlane.f32.xlu0 %v7193_v45  ;;  %v9313_v3 = vpop.f32.mrf.mxu0 }
0x162c   :  { %v7075_v49 = vpop.f32.mrf.mxu1  ;;  %v7122_v63 = vpop.f32.mrf.mxu0 }
0x162d   :  { %v7196_v15 = vsel %vm296_vm3, %v7122_v63, -inf }
0x162e   :  { %v9319_v60 = vpop.f32.mrf.mxu1  ;;  %7197 = vmax.xlane.f32.xlu1 %v7196_v15  ;;  %v9324_v13 = vpop.f32.mrf.mxu0 }
0x1630   :  { %v7125_v23 = vpop.f32.mrf.mxu0  ;;  %v7172_v19 = vpop.f32.mrf.mxu1 }
0x1631   :  { %v7199_v53 = vsel %vm296_vm3, %v7172_v19, -inf }
0x1632   :  { %v9330_v9 = vpop.f32.mrf.mxu1  ;;  %7200 = vmax.xlane.f32.xlu0 %v7199_v53  ;;  %v9325_v14 = vpop.f32.mrf.mxu0 }
0x1634   :  { %v7175_v4 = vpop.f32.mrf.mxu1 }
0x1636   :  { %v9331_v58 = vpop.f32.mrf.mxu1 }
0x163f   :  { %7370 = vrot.lane.b32.xlu1 %v10887_v48, %s9871_s22 }
0x1643   :  { %7418 = vrot.lane.b32.xlu1 %v10895_v12, %s9871_s22 }
0x1648   :  { %7322 = vrot.lane.b32.xlu0 %v10889_v17, %s9871_s22 }
0x169f   :  { %v7180_v6 = vpop.xlane.xlu0 %7179 }
0x16a0   :  { %v7202_v35 = vsub.f32 %v6822_v40, %v7180_v6 }
0x16a2   :  { %v7210_v42 = vmul.f32 1.442695, %v7202_v35 }
0x16a3   :  { %v7183_v45 = vpop.xlane.xlu1 %7182 }
0x16a4   :  { %9782 = vpow2.f32 %v7210_v42  ;;  %v7203_v11 = vsub.f32 %v6872_v46, %v7183_v45 }
0x16a6   :  { %v7212_v3 = vmul.f32 1.442695, %v7203_v11 }
0x16a7   :  { %v7186_v49 = vpop.xlane.xlu0 %7185 }
0x16a8   :  { %9784 = vpow2.f32 %v7212_v3  ;;  %v7204_v15 = vsub.f32 %v6922_v55, %v7186_v49 }
0x16aa   :  { %v7214_v60 = vmul.f32 1.442695, %v7204_v15 }
0x16ab   :  { %v7189_v13 = vpop.xlane.xlu0 %7188 }
0x16ac   :  { %9786 = vpow2.f32 %v7214_v60  ;;  %v7205_v48 = vsub.f32 %v6972_v8, %v7189_v13 }
0x16ae   :  { %v7216_v23 = vmul.f32 1.442695, %v7205_v48 }
0x16af   :  { %v7192_v35 = vpop.xlane.xlu1 %7191 }
0x16b0   :  { %9788 = vpow2.f32 %v7216_v23  ;;  %v7206_v42 = vsub.f32 %v11589_v21, %v7192_v35 }
0x16b1   :  { %v11605_v12 = vpop.eup %9782 }
0x16b2   :  { %v7226_v17 = vsel %vm296_vm3, %v11605_v12, 0.0  ;;  %v7218_v3 = vmul.f32 1.442695, %v7206_v42 }
0x16b3   :  { %7227 = vadd.xlane.f32.xlu1 %v7226_v17  ;;  %v7195_v53 = vpop.xlane.xlu0 %7194 }
0x16b4   :  { %v7207_v11 = vsub.f32 %v11593_v29, %v7195_v53  ;;  %9790 = vpow2.f32 %v7218_v3 }
0x16b5   :  { %v11609_v40 = vpop.eup %9784 }
0x16b6   :  { %v7229_v46 = vsel %vm296_vm3, %v11609_v40, 0.0  ;;  %v7220_v15 = vmul.f32 1.442695, %v7207_v11 }
0x16b7   :  { %7230 = vadd.xlane.f32.xlu0 %v7229_v46  ;;  %v7198_v45 = vpop.xlane.xlu1 %7197 }
0x16b8   :  { %v7208_v49 = vsub.f32 %v7122_v63, %v7198_v45  ;;  %9792 = vpow2.f32 %v7220_v15 }
0x16b9   :  { %v11613_v55 = vpop.eup %9786 }
0x16ba   :  { %v7232_v8 = vsel %vm296_vm3, %v11613_v55, 0.0  ;;  %v7222_v60 = vmul.f32 1.442695, %v7208_v49 }
0x16bb   :  { %7233 = vadd.xlane.f32.xlu1 %v7232_v8  ;;  %v7201_v9 = vpop.xlane.xlu0 %7200 }
0x16bc   :  { %v7209_v13 = vsub.f32 %v7172_v19, %v7201_v9  ;;  %9794 = vpow2.f32 %v7222_v60 }
0x16bd   :  { %v11617_v14 = vpop.eup %9788 }
0x16be   :  { %v7235_v4 = vsel %vm296_vm3, %v11617_v14, 0.0  ;;  %v7224_v48 = vmul.f32 1.442695, %v7209_v13 }
0x16bf   :  { %7236 = vadd.xlane.f32.xlu0 %v7235_v4  ;;  %v7323_v58 = vpop.permute.xlu0 %7322 }
0x16c0   :  { %v7328_v6 = vsel %vm787_vm4, %v7323_v58, 0  ;;  %9796 = vpow2.f32 %v7224_v48 }
0x16c1   :  { %9339 = vmatpush3.bf16.msra.mxu1 %v7328_v6 }
0x16c2   :  { %9350 = vmatprep.subr.bf16.mxu1 %v9859_v37 }
0x16cc   :  { %7514 = vrot.lane.b32.xlu1 %v10905_v36, %s9871_s22  ;;  %v11629_v36 = vpop.eup %9790 }
0x16cd   :  { %v11631_v23 = vpop.eup %9792 }
0x16ce   :  { %v11635_v21 = vpop.eup %9794  ;;  %v7241_v63 = vsel %vm296_vm3, %v11631_v23, 0.0 }
0x16cf   :  { %v7244_v29 = vsel %vm296_vm3, %v11635_v21, 0.0  ;;  %v11641_v19 = vpop.eup %9796 }
0x16d0   :  { %v7247_v17 = vsel %vm296_vm3, %v11641_v19, 0.0 }
0x16d5   :  { %7466 = vrot.lane.b32.xlu0 %v10899_v24, %s9871_s22  ;;  %v7238_v24 = vsel %vm296_vm3, %v11629_v36, 0.0 }
0x16f0   :  { %7239 = vadd.xlane.f32.xlu1 %v7238_v24 }
0x16f4   :  { %7245 = vadd.xlane.f32.xlu1 %v7244_v29  ;;  %7242 = vadd.xlane.f32.xlu0 %v7241_v63 }
0x16f8   :  { %7248 = vadd.xlane.f32.xlu0 %v7247_v17 }
0x1705   :  { %7610 = vrot.lane.b32.xlu1 %v10911_v0, %s9871_s22 }
0x1709   :  { %9491 = vrot.lane.b32.xlu1 %v9490_v39, %s9872_s23 }
0x170d   :  { %9501 = vrot.lane.b32.xlu1 %v9500_v59, %s9873_s24 }
0x170e   :  { %7562 = vrot.lane.b32.xlu0 %v10903_v27, %s9871_s22  ;;  %v7371_v27 = vpop.permute.xlu1 %7370 }
0x1711   :  { %9511 = vrot.lane.b32.xlu1 %v9510_v10, %s9872_s23  ;;  %v7376_v10 = vsel %vm787_vm4, %v7371_v27, 0 }
0x1712   :  { %9486 = vrot.lane.b32.xlu0 %v9485_v5, %s9872_s23  ;;  %v7419_v0 = vpop.permute.xlu1 %7418 }
0x1713   :  { %v7424_v56 = vsel %vm787_vm4, %v7419_v0, 0 }
0x1716   :  { %9496 = vrot.lane.b32.xlu0 %v9495_v18, %s9873_s24 }
0x171a   :  { %9506 = vrot.lane.b32.xlu0 %v9505_v33, %s9872_s23 }
0x173c   :  { %v7228_v32 = vpop.xlane.xlu1 %7227 }
0x173d   :  { %9798 = vrcp.f32 %v7228_v32 }
0x1740   :  { %v7231_v16 = vpop.xlane.xlu0 %7230 }
0x1741   :  { %9800 = vrcp.f32 %v7231_v16 }
0x1744   :  { %v7234_v39 = vpop.xlane.xlu1 %7233 }
0x1745   :  { %9802 = vrcp.f32 %v7234_v39 }
0x1748   :  { %v7237_v34 = vpop.xlane.xlu0 %7236 }
0x1749   :  { %9804 = vrcp.f32 %v7237_v34 }
0x174a   :  { %v9799_v1 = vpop.eup %9798 }
0x174b   :  { %v7258_v5 = vmul.f32 %v9799_v1, %v11605_v12 }
0x174c   :  { %v7467_v18 = vpop.permute.xlu0 %7466 }
0x174d   :  { %v7266_v26 = vpack.c.bf16 %v7258_v5, %v7258_v5  ;;  %v7472_v12 = vsel %vm787_vm4, %v7467_v18, 0 }
0x174e   :  { %v9801_v41 = vpop.eup %9800 }
0x174f   :  { %v7259_v30 = vmul.f32 %v9801_v41, %v11609_v40  ;;  %9335 = vmatmul.mubr.msk.bf16.vlgmr.msra.gmra.mxu0 %vm296_vm3, %v7266_v26  ;;  %v7515_v40 = vpop.permute.xlu1 %7514 }
0x1750   :  { %9345 = vmatpush3.bf16.msra.mxu0 %v7376_v10  ;;  %9346 = vmatprep.mubr.msk.bf16.mxu0 %vm9860_vm2, %v9859_v37  ;;  %v7520_v53 = vsel %vm787_vm4, %v7515_v40, 0 }
0x1751   :  { %v7267_v51 = vpack.c.bf16 %v7259_v30, %v7259_v30  ;;  %9356 = vmatprep.subr.bf16.mxu0 %v9859_v37 }
0x1752   :  { %v9803_v33 = vpop.eup %9802 }
0x1753   :  { %v7260_v52 = vmul.f32 %v9803_v33, %v11613_v55  ;;  %9341 = vmatmul.mubr.msk.bf16.vlgmr.msra.gmra.mxu1 %vm296_vm3, %v7267_v51 }
0x1754   :  { %9351 = vmatpush3.bf16.msra.mxu1 %v7424_v56  ;;  %9352 = vmatprep.mubr.msk.bf16.mxu1 %vm9860_vm2, %v9859_v37 }
0x1755   :  { %v7268_v61 = vpack.c.bf16 %v7260_v52, %v7260_v52  ;;  %9362 = vmatprep.subr.bf16.mxu1 %v9859_v37 }
0x1756   :  { %v9805_v47 = vpop.eup %9804 }
0x1757   :  { %v7261_v59 = vmul.f32 %v9805_v47, %v11617_v14  ;;  %9347 = vmatmul.mubr.msk.bf16.vlgmr.msra.gmra.mxu0 %vm296_vm3, %v7268_v61 }
0x1758   :  { %9357 = vmatpush3.bf16.msra.mxu0 %v7472_v12  ;;  %9358 = vmatprep.mubr.msk.bf16.mxu0 %vm9860_vm2, %v9859_v37 }
0x1759   :  { %v7269_v46 = vpack.c.bf16 %v7261_v59, %v7261_v59  ;;  %9368 = vmatprep.subr.bf16.mxu0 %v9859_v37 }
0x175b   :  { %9353 = vmatmul.mubr.msk.bf16.vlgmr.msra.gmra.mxu1 %vm296_vm3, %v7269_v46 }
0x175c   :  { %9363 = vmatpush3.bf16.msra.mxu1 %v7520_v53  ;;  %9364 = vmatprep.mubr.msk.bf16.mxu1 %vm9860_vm2, %v9859_v37 }
0x175d   :  { %9374 = vmatprep.subr.bf16.mxu1 %v9859_v37 }
0x1779   :  { %v7240_v55 = vpop.xlane.xlu1 %7239 }
0x177a   :  { %9806 = vrcp.f32 %v7240_v55 }
0x177d   :  { %v7246_v8 = vpop.xlane.xlu1 %7245  ;;  %v7243_v9 = vpop.xlane.xlu0 %7242 }
0x177e   :  { %9808 = vrcp.f32 %v7246_v8 }
0x177f   :  { %9810 = vrcp.f32 %v7243_v9 }
0x1781   :  { %v7249_v14 = vpop.xlane.xlu0 %7248  ;;  %v7611_v15 = vpop.permute.xlu1 %7610 }
0x1782   :  { %9812 = vrcp.f32 %v7249_v14  ;;  %v7616_v48 = vsel %vm787_vm4, %v7611_v15, 0 }
0x1785   :  { %v7563_v6 = vpop.permute.xlu0 %7562 }
0x1786   :  { %v7568_v11 = vsel %vm787_vm4, %v7563_v6, 0 }
0x1787   :  { %v9807_v4 = vpop.eup %9806 }
0x1788   :  { %v7262_v58 = vmul.f32 %v9807_v4, %v11629_v36 }
0x178a   :  { %v7270_v35 = vpack.c.bf16 %v7262_v58, %v7262_v58  ;;  %v9492_v58 = vpop.permute.xlu1 %9491 }
0x178b   :  { %v9809_v42 = vpop.eup %9808 }
0x178c   :  { %v9811_v45 = vpop.eup %9810  ;;  %9359 = vmatmul.mubr.msk.bf16.vlgmr.msra.gmra.mxu0 %vm296_vm3, %v7270_v35  ;;  %v7264_v49 = vmul.f32 %v9809_v42, %v11635_v21  ;;  %v9556_v21 = vld [vmem:[%s11806_s5 + $0x18] sm:$0xff]  }
0x178d   :  { %v7263_v3 = vmul.f32 %v9811_v45, %v11631_v23  ;;  %9369 = vmatpush3.bf16.msra.mxu0 %v7568_v11  ;;  %9370 = vmatprep.mubr.msk.bf16.mxu0 %vm9860_vm2, %v9859_v37 }
0x178e   :  { %v7272_v36 = vpack.c.bf16 %v7264_v49, %v7264_v49  ;;  %9380 = vmatprep.subr.bf16.mxu0 %v9556_v21  ;;  %v9502_v45 = vpop.permute.xlu1 %9501 }
0x178f   :  { %v7271_v60 = vpack.c.bf16 %v7263_v3, %v7263_v3  ;;  %v9813_v13 = vpop.eup %9812 }
0x1790   :  { %v7265_v23 = vmul.f32 %v9813_v13, %v11641_v19  ;;  %v9557_v19 = vld [vmem:[%s11806_s5 + $0x10] sm:$0xff]  }
0x1791   :  { %9365 = vmatmul.mubr.msk.bf16.vlgmr.msra.gmra.mxu1 %vm296_vm3, %v7271_v60 }
0x1792   :  { %9375 = vmatpush3.bf16.msra.mxu1 %v7616_v48  ;;  %9376 = vmatprep.mubr.msk.bf16.mxu1 %vm9860_vm2, %v9859_v37  ;;  %v7273_v24 = vpack.c.bf16 %v7265_v23, %v7265_v23 }
0x1793   :  { %9392 = vmatprep.subr.mxu1 %v9859_v37 }
0x1794   :  { %9371 = vmatmul.mubr.msk.bf16.vlgmr.msra.gmra.mxu0 %vm296_vm3, %v7272_v36 }
0x1795   :  { %9381 = vmatpush3.bf16.msra.mxu0 %v9556_v21 }
0x1796   :  { %9382 = vmatprep.subr.bf16.mxu0 %v9557_v19 }
0x1799   :  { %9377 = vmatmul.mubr.msk.bf16.vlgmr.msra.gmra.mxu1 %vm296_vm3, %v7273_v24  ;;  %9383 = vmatpush3.bf16.msra.mxu0 %v9557_v19  ;;  %v9494_v19 = vunpack.i.h.bf16 %v9492_v58 }
0x179a   :  { %9400 = vmatprep.mubr.msk.f32.mxu1 %vm9860_vm2, %v9859_v37 }
0x180f   :  { %v7316_v29 = vpop.f32.mrf.mxu0 }
0x1811   :  { %v9336_v63 = vpop.f32.mrf.mxu0 }
0x1813   :  { %v7319_v17 = vpop.f32.mrf.mxu0  ;;  %v7364_v27 = vpop.f32.mrf.mxu1 }
0x1814   :  { %v9515_v0 = vpack.i.bf16 %v7364_v27, %v7316_v29  ;;  %v9512_v29 = vpop.permute.xlu1 %9511  ;;  %v9493_v17 = vunpack.i.l.bf16 %v9492_v58  ;;  %v9504_v27 = vunpack.i.h.bf16 %v9502_v45 }
0x1815   :  { %v9337_v32 = vpop.f32.mrf.mxu0  ;;  %v9342_v16 = vpop.f32.mrf.mxu1 }
0x1816   :  { %9516 = vrot.lane.b32.xlu0 %v9515_v0, %s9874_s27  ;;  %v9503_v0 = vunpack.i.l.bf16 %v9502_v45  ;;  %v7756_v32 = vsel %vm296_vm3, %v11161_v28, %v9493_v17 }
0x1817   :  { %v7367_v39 = vpop.f32.mrf.mxu1  ;;  %v7412_v34 = vpop.f32.mrf.mxu0 }
0x1819   :  { %v9343_v1 = vpop.f32.mrf.mxu1  ;;  %v9348_v5 = vpop.f32.mrf.mxu0 }
0x181a   :  { %9521 = vrot.lane.b32.xlu0 %v9520_v31, %s9873_s24 }
0x181b   :  { %v7415_v26 = vpop.f32.mrf.mxu0  ;;  %v7460_v41 = vpop.f32.mrf.mxu1 }
0x181c   :  { %v9525_v10 = vpack.i.bf16 %v7460_v41, %v7412_v34  ;;  %v7764_v34 = vsel %vm94_vm0, %v7756_v32, %v9503_v0 }
0x181d   :  { %v9349_v30 = vpop.f32.mrf.mxu0  ;;  %v9354_v51 = vpop.f32.mrf.mxu1 }
0x181e   :  { %9526 = vrot.lane.b32.xlu1 %v9525_v10, %s9874_s27 }
0x181f   :  { %v7463_v33 = vpop.f32.mrf.mxu1 }
0x1821   :  { %v9355_v56 = vpop.f32.mrf.mxu1 }
0x1822   :  { %9531 = vrot.lane.b32.xlu1 %v9530_v38, %s9873_s24  ;;  %v9487_v38 = vpop.permute.xlu0 %9486 }
0x1823   :  { %v9489_v35 = vunpack.i.h.bf16 %v9487_v38  ;;  %v9488_v42 = vunpack.i.l.bf16 %v9487_v38 }
0x1825   :  { %v7755_v15 = vsel %vm296_vm3, %v11159_v22, %v9489_v35  ;;  %v7754_v60 = vsel %vm296_vm3, %v11157_v20, %v9488_v42  ;;  %v7757_v20 = vsel %vm296_vm3, %v11163_v57, %v9494_v19  ;;  %v7949_v35 = vld [vmem:[%s11809_s8] sm:$0xff] }
0x1826   :  { %v9497_v4 = vpop.permute.xlu0 %9496  ;;  %v7765_v1 = vsel %vm94_vm0, %v7757_v20, %v9504_v27  ;;  %v7953_v42 = vld [vmem:[#allocation2] sm:$0x1] }
0x1827   :  { %v9499_v11 = vunpack.i.h.bf16 %v9497_v4  ;;  %v9498_v3 = vunpack.i.l.bf16 %v9497_v4  ;;  %9405 = vpush %v7953_v42 }
0x1829   :  { %v7762_v36 = vsel %vm94_vm0, %v7754_v60, %v9498_v3  ;;  %v7763_v23 = vsel %vm94_vm0, %v7755_v15, %v9499_v11  ;;  %v8268_v15 = vld [vmem:[%s11807_s6 + $0x1] ss:$0 sm:$0xff] }
0x182a   :  { %v9507_v6 = vpop.permute.xlu0 %9506 }
0x182b   :  { %v9509_v30 = vunpack.i.h.bf16 %v9507_v6  ;;  %v9508_v51 = vunpack.i.l.bf16 %v9507_v6  ;;  %v7950_v6 = vld [vmem:[%s11809_s8 + $0x8] sm:$0xff] }
0x182d   :  { %v7759_v28 = vsel %vm296_vm3, %v11167_v62, %v9509_v30 }
0x184c   :  { %v7508_v52 = vpop.f32.mrf.mxu0 }
0x184e   :  { %v9360_v18 = vpop.f32.mrf.mxu0 }
0x1850   :  { %v7511_v61 = vpop.f32.mrf.mxu0 }
0x1851   :  { %v7556_v47 = vpop.f32.mrf.mxu1 }
0x1852   :  { %v9535_v2 = vpack.i.bf16 %v7556_v47, %v7508_v52  ;;  %v9361_v25 = vpop.f32.mrf.mxu0  ;;  %v7758_v52 = vsel %vm296_vm3, %v11165_v43, %v9508_v51 }
0x1853   :  { %v9366_v31 = vpop.f32.mrf.mxu1 }
0x1854   :  { %9536 = vrot.lane.b32.xlu0 %v9535_v2, %s9874_s27  ;;  %v7604_v59 = vpop.f32.mrf.mxu0 }
0x1855   :  { %v7559_v12 = vpop.f32.mrf.mxu1 }
0x1856   :  { %v9372_v40 = vpop.f32.mrf.mxu0 }
0x1857   :  { %v9367_v46 = vpop.f32.mrf.mxu1  ;;  %v9514_v40 = vunpack.i.h.bf16 %v9512_v29 }
0x1858   :  { %v7607_v53 = vpop.f32.mrf.mxu0  ;;  %v9513_v46 = vunpack.i.l.bf16 %v9512_v29  ;;  %s9406_s6 = spop %9405 }
0x1859   :  { %v7652_v55 = vpop.f32.mrf.mxu1  ;;  %v7761_v43 = vsel %vm296_vm3, %v11171_v50, %v9514_v40  ;;  %v7952_v50 = vld [vmem:[%s11809_s8 + $0x18] sm:$0xff] }
0x185a   :  { %v9540_v8 = vpack.i.bf16 %v7652_v55, %v7604_v59  ;;  %v9373_v9 = vpop.f32.mrf.mxu0  ;;  %9393 = vmatpush3.msra.mxu1 %v7952_v50 }
0x185b   :  { %v9378_v14 = vpop.f32.mrf.mxu1  ;;  %9394 = vmatprep.subr.mxu1 %v9859_v37 }
0x185c   :  { %9541 = vrot.lane.b32.xlu1 %v9540_v8, %s9874_s27  ;;  %v7760_v8 = vsel %vm296_vm3, %v11169_v44, %v9513_v46  ;;  %v7951_v44 = vld [vmem:[%s11809_s8 + $0x10] sm:$0xff] }
0x185d   :  { %v7655_v54 = vpop.f32.mrf.mxu1  ;;  %9395 = vmatpush3.msra.mxu1 %v7951_v44 }
0x185e   :  { %9396 = vmatprep.subr.mxu1 %v9859_v37 }
0x185f   :  { %v9379_v7 = vpop.f32.mrf.mxu1  ;;  %9397 = vmatpush3.msra.mxu1 %v7950_v6 }
0x1860   :  { %9398 = vmatprep.subr.mxu1 %v9859_v37 }
0x1861   :  { %9399 = vmatpush3.msra.mxu1 %v7949_v35 }
0x1888   :  { %v9517_v49 = vpop.permute.xlu0 %9516 }
0x1889   :  { %v9519_v13 = vunpack.i.h.bf16 %v9517_v49  ;;  %v9518_v48 = vunpack.i.l.bf16 %v9517_v49 }
0x188b   :  { %v7770_v24 = vsel %vm3919_vm5, %v7762_v36, %v9518_v48  ;;  %v7771_v21 = vsel %vm3919_vm5, %v7763_v23, %v9519_v13  ;;  %v7884_v48 = vld [vmem:[%s11808_s7] sm:$0xff]  ;;  %s9875_s7 = smov [#allocation6]  }
0x188c   :  { %v7778_v63 = vpack.c.bf16 %v7771_v21, %v7770_v24  ;;  %v9522_v10 = vpop.permute.xlu0 %9521  ;;  %s8090_s8 = sshll.u32 %s9875_s7, 4  ;;  %s8091_s8 = int_to_ptr.vmem [resolvable:$true] %s8090_s8 }
0x188d   :  { %v9524_v57 = vunpack.i.h.bf16 %v9522_v10  ;;  %v9523_v33 = vunpack.i.l.bf16 %v9522_v10  ;;  %s9834_s26 = scalar_lea.vmem %s8091_s8, 16  ;;  %s9838_s1 = scalar_lea.vmem %s8091_s8, 32 }
0x188e   :  { %9384 = vmatprep.mubr.msk.bf16.mxu0 %vm207_vm1, %v7778_v63  ;;  %p9835_p5 = scmp.ne.s32.totalorder %s8091_s8, %s9834_s26  ;;  %p9839_p6 = scmp.lt.s32.totalorder %s8091_s8, %s8091_s8 }
0x188f   :  { %v7766_v47 = vsel %vm94_vm0, %v7758_v52, %v9523_v33  ;;  %v7767_v2 = vsel %vm94_vm0, %v7759_v28, %v9524_v57  ;;  %p9840_p7 = scmp.lt.s32.totalorder %s9838_s1, %s9834_s26 }
0x1890   :  { %v9527_v22 = vpop.permute.xlu1 %9526 }
0x1891   :  { %v9529_v16 = vunpack.i.h.bf16 %v9527_v22  ;;  %v9528_v39 = vunpack.i.l.bf16 %v9527_v22  ;;  %p9841_p8 = por %p9840_p7, %p9839_p6 }
0x1893   :  { %v7773_v5 = vsel %vm3919_vm5, %v7765_v1, %v9529_v16  ;;  %v7772_v26 = vsel %vm3919_vm5, %v7764_v34, %v9528_v39  ;;  %p9842_p9 = pnand %p9841_p8, %p9835_p5 }
0x1894   :  { %v7779_v41 = vpack.c.bf16 %v7773_v5, %v7772_v26  ;;  %v9532_v25 = vpop.permute.xlu1 %9531 }
0x1895   :  { %v9534_v53 = vunpack.i.h.bf16 %v9532_v25  ;;  %v9533_v55 = vunpack.i.l.bf16 %v9532_v25 }
0x1896   :  { %9385 = vmatmul.mubr.msk.bf16.vlgmr.msra.gmra.mxu0 %vm207_vm1, %v7779_v41 }
0x1897   :  { %v7769_v54 = vsel %vm94_vm0, %v7761_v43, %v9534_v53  ;;  %v7768_v7 = vsel %vm94_vm0, %v7760_v8, %v9533_v55 }
0x18c6   :  { %v9537_v56 = vpop.permute.xlu0 %9536 }
0x18c7   :  { %v9539_v18 = vunpack.i.h.bf16 %v9537_v56  ;;  %v9538_v61 = vunpack.i.l.bf16 %v9537_v56 }
0x18c9   :  { %v7774_v31 = vsel %vm3919_vm5, %v7766_v47, %v9538_v61  ;;  %v7775_v59 = vsel %vm3919_vm5, %v7767_v2, %v9539_v18 }
0x18ca   :  { %v7780_v12 = vpack.c.bf16 %v7775_v59, %v7774_v31 }
0x18cc   :  { %9388 = vmatprep.mubr.msk.bf16.mxu0 %vm207_vm1, %v7780_v12 }
0x18ce   :  { %v9542_v62 = vpop.permute.xlu1 %9541 }
0x18cf   :  { %v9544_v9 = vunpack.i.h.bf16 %v9542_v62  ;;  %v9543_v14 = vunpack.i.l.bf16 %v9542_v62 }
0x18d1   :  { %v7777_v38 = vsel %vm3919_vm5, %v7769_v54, %v9544_v9  ;;  %v7776_v4 = vsel %vm3919_vm5, %v7768_v7, %v9543_v14 }
0x18d2   :  { %v7781_v58 = vpack.c.bf16 %v7777_v38, %v7776_v4 }
0x18d4   :  { %9389 = vmatmul.mubr.msk.bf16.gmra.mxu0 %vm207_vm1, %v7781_v58 }
0x1956   :  { %v9386_v45 = vpop.f32.mrf.mxu0 }
0x1957   :  { %v7862_v23 = vadd.f32 %v9386_v45, %v8268_v15 }
0x1958   :  { %v7853_v11 = vpop.f32.mrf.mxu0 }
0x1959   :  { %v7854_v13 = vadd.f32 %v8268_v15, %v7853_v11  ;;  %v7887_v29 = vmul.f32 %v7884_v48, %v7862_v23 }
0x195a   :  { %v9387_v3 = vpop.f32.mrf.mxu0 }
0x195b   :  { %v7885_v37 = vmul.f32 %v7884_v48, %v7854_v13  ;;  %v7865_v24 = vadd.f32 %v9387_v3, %v8268_v15  ;;  %v7907_v27 = vsel %vm207_vm1, %v7887_v29, 0.0 }
0x195c   :  { %v7856_v49 = vpop.f32.mrf.mxu0  ;;  %v7908_v32 = vrot.slane %v7907_v27, 4 }
0x195d   :  { %v7857_v60 = vadd.f32 %v8268_v15, %v7856_v49  ;;  %v7893_v63 = vsel %vm207_vm1, %v7885_v37, 0.0  ;;  %v7888_v19 = vmul.f32 %v7884_v48, %v7865_v24 }
0x195e   :  { %v7894_v0 = vrot.slane %v7893_v63, 4  ;;  %v7909_v5 = vadd.f32 %v7908_v32, %v7907_v27 }
0x195f   :  { %v7886_v36 = vmul.f32 %v7884_v48, %v7857_v60  ;;  %v7914_v22 = vsel %vm207_vm1, %v7888_v19, 0.0 }
0x1960   :  { %v7895_v16 = vadd.f32 %v7894_v0, %v7893_v63  ;;  %v7915_v39 = vrot.slane %v7914_v22, 4  ;;  %v7910_v28 = vrot.slane %v7909_v5, 2 }
0x1961   :  { %v7900_v21 = vsel %vm207_vm1, %v7886_v36, 0.0 }
0x1962   :  { %v7901_v17 = vrot.slane %v7900_v21, 4  ;;  %v7896_v41 = vrot.slane %v7895_v16, 2  ;;  %v7916_v30 = vadd.f32 %v7915_v39, %v7914_v22  ;;  %v7911_v62 = vadd.f32 %v7910_v28, %v7909_v5 }
0x1964   :  { %v7902_v20 = vadd.f32 %v7901_v17, %v7900_v21  ;;  %v7897_v47 = vadd.f32 %v7896_v41, %v7895_v16  ;;  %v7917_v31 = vrot.slane %v7916_v30, 2  ;;  %v7912_v35 = vrot.slane %v7911_v62, 1 }
0x1966   :  { %v7903_v34 = vrot.slane %v7902_v20, 2  ;;  %v7898_v9 = vrot.slane %v7897_v47, 1  ;;  %v7918_v7 = vadd.f32 %v7917_v31, %v7916_v30  ;;  %v7913_v23 = vadd.f32 %v7912_v35, %v7911_v62 }
0x1968   :  { %v7904_v33 = vadd.f32 %v7903_v34, %v7902_v20  ;;  %v7899_v42 = vadd.f32 %v7898_v9, %v7897_v47  ;;  %v7919_v49 = vrot.slane %v7918_v7, 1 }
0x196a   :  { %v7905_v46 = vrot.slane %v7904_v33, 1  ;;  %v7920_v63 = vadd.f32 %v7919_v49, %v7918_v7 }
0x196c   :  { %v7906_v58 = vadd.f32 %v7905_v46, %v7904_v33 }
0x196e   :  { %v7965_v60 = vsel %vm7964_vm6, %v7906_v58, %v7899_v42 }
0x196f   :  { %v7967_v24 = vsel %vm7966_vm7, %v7913_v23, %v7965_v60 }
0x1970   :  { %v7969_v27 = vsel %vm7968_vm8, %v7920_v63, %v7967_v24 }
0x1994   :  { %v9390_v1 = vpop.f32.mrf.mxu0 }
0x1995   :  { %v7878_v26 = vadd.f32 %v9390_v1, %v8268_v15  ;;  %v7955_v1 = vstv %s9406_s6 }
0x1996   :  { %v7869_v10 = vpop.f32.mrf.mxu0 }
0x1997   :  { %v7891_v51 = vmul.f32 %v7884_v48, %v7878_v26  ;;  %v7870_v57 = vadd.f32 %v8268_v15, %v7869_v10 }
0x1998   :  { %v9391_v56 = vpop.f32.mrf.mxu0 }
0x1999   :  { %v7935_v52 = vsel %vm207_vm1, %v7891_v51, 0.0  ;;  %v7889_v18 = vmul.f32 %v7884_v48, %v7870_v57  ;;  %v7881_v61 = vadd.f32 %v9391_v56, %v8268_v15 }
0x199a   :  { %v7936_v2 = vrot.slane %v7935_v52, 4  ;;  %v7872_v25 = vpop.f32.mrf.mxu0 }
0x199b   :  { %v7921_v59 = vsel %vm207_vm1, %v7889_v18, 0.0  ;;  %v7892_v12 = vmul.f32 %v7884_v48, %v7881_v61  ;;  %v7873_v40 = vadd.f32 %v8268_v15, %v7872_v25 }
0x199c   :  { %v7937_v53 = vadd.f32 %v7936_v2, %v7935_v52  ;;  %v7922_v55 = vrot.slane %v7921_v59, 4 }
0x199d   :  { %v7942_v43 = vsel %vm207_vm1, %v7892_v12, 0.0  ;;  %v7890_v8 = vmul.f32 %v7884_v48, %v7873_v40 }
0x199e   :  { %v7923_v14 = vadd.f32 %v7922_v55, %v7921_v59  ;;  %v7943_v54 = vrot.slane %v7942_v43, 4  ;;  %v7938_v38 = vrot.slane %v7937_v53, 2 }
0x199f   :  { %v7928_v4 = vsel %vm207_vm1, %v7890_v8, 0.0 }
0x19a0   :  { %v7924_v50 = vrot.slane %v7923_v14, 2  ;;  %v7944_v44 = vadd.f32 %v7943_v54, %v7942_v43  ;;  %v7929_v6 = vrot.slane %v7928_v4, 4  ;;  %v7939_v15 = vadd.f32 %v7938_v38, %v7937_v53 }
0x19a2   :  { %v7925_v45 = vadd.f32 %v7924_v50, %v7923_v14  ;;  %v7945_v11 = vrot.slane %v7944_v44, 2  ;;  %v7930_v3 = vadd.f32 %v7929_v6, %v7928_v4  ;;  %v7940_v21 = vrot.slane %v7939_v15, 1 }
0x19a4   :  { %v7926_v13 = vrot.slane %v7925_v45, 1  ;;  %v7946_v48 = vadd.f32 %v7945_v11, %v7944_v44  ;;  %v7931_v36 = vrot.slane %v7930_v3, 2  ;;  %v7941_v22 = vadd.f32 %v7940_v21, %v7939_v15 }
0x19a6   :  { %v7932_v37 = vadd.f32 %v7931_v36, %v7930_v3  ;;  %v7927_v29 = vadd.f32 %v7926_v13, %v7925_v45  ;;  %v7947_v19 = vrot.slane %v7946_v48, 1 }
0x19a8   :  { %v7933_v17 = vrot.slane %v7932_v37, 1  ;;  %v7971_v20 = vsel %vm7970_vm9, %v7927_v29, %v7969_v27  ;;  %v7948_v32 = vadd.f32 %v7947_v19, %v7946_v48 }
0x19aa   :  { %v7934_v0 = vadd.f32 %v7933_v17, %v7932_v37 }
0x19ac   :  { %v7973_v16 = vsel %vm7972_vm10, %v7934_v0, %v7971_v20 }
0x19ad   :  { %v7975_v39 = vsel %vm7974_vm11, %v7941_v22, %v7973_v16 }
0x19ae   :  { %v7977_v34 = vsel %vm7976_vm12, %v7948_v32, %v7975_v39 }
0x19af   :  { %9401 = vmatmul.mubr.msk.f32.vlgmr.msra.gmra.mxu1 %vm207_vm1, %v7977_v34 }
0x1a6f   :  { %v8046_v5 = vpop.f32.mrf.mxu1 }
0x1a70   :  { %v8047_v26 = vadd.f32 %v8046_v5, %v7955_v1 }
0x1a71   :  { %v9402_v41 = vpop.f32.mrf.mxu1 }
0x1a72   :  { %8050 = vxpose.xlu0.b32.start.end [1/1] (short) (narrow) %v8047_v26, 8 }
0x1aee   :  { %v8066_v10 = vpop.trf.xlu0 }
0x1aef   :  { %8083 = vst.msk [vmem:[#allocation6] sm:$0x1] %vm8082_vm13, %v8066_v10 }
0x1af0   :  { %9845 = shalt.err (!%p9842_p9)
}
0x1af1   :  { %8093 = dma.vmem_to_hbm [thread:$0]  %s8091_s8, 16, %s11811_s10, [#allocation5]  }
0x1af2   :  { %9856 = dma.done.wait [#allocation5], 16  }
0x1af3   :  { %9857 = vsyncadd [#allocation5], 4294967280 }
0x1af4   :  { %8097 = vsyncpa [#allocation4], 1 }
0x1af5   :  { %8098 = vsyncpa [#allocation5], 1 }

</bundles_post_ra>
